<compile_context>
chip_gen: v6e
topology: v6e:2x2x1
jax: 0.10.0
libtpu: 0.0.40
codegen_flags: <defaults>
</compile_context>

<pallas_src>
import functools
import math

import jax
import jax.numpy as jnp
from jax.experimental import pallas as pl
from jax.experimental.pallas import tpu as pltpu

_EPS = 1e-5
_SLOPE = 0.01


# ------------------------------ Pallas kernel -------------------------------

def _basic_block_sep_in_kernel(x_ref, wdw1_ref, wpw1_ref, wdw2_ref,
                               g2a_ref, b2a_ref, wpw2_ref, g2b_ref, b2b_ref,
                               o_ref, pad_ref):
    _, H, W, C = x_ref.shape

    def depthwise3x3(src, wdw_ref):
        # src: (H, W, C) f32 value. Zero-pad into the VMEM scratch, then
        # accumulate the 9 taps as shifted per-channel multiply-adds
        # (no im2col, no HBM intermediates).
        pad_ref[...] = jnp.zeros_like(pad_ref)
        pad_ref[1:H + 1, 1:W + 1, :] = src
        acc = jnp.zeros((H, W, C), jnp.float32)
        for di in range(3):
            for dj in range(3):
                t = 3 * di + dj
                tap = pad_ref[di:di + H, dj:dj + W, :]
                acc = acc + tap * wdw_ref[t:t + 1, :]        # (1, C) broadcast
        return acc

    def inst_norm(y2d, gamma=None, beta=None):
        # InstanceNorm2d: per-(sample, channel) stats over spatial positions,
        # biased variance, eps=1e-5.
        mean = jnp.mean(y2d, axis=0, keepdims=True)
        var = jnp.mean(jnp.square(y2d - mean), axis=0, keepdims=True)
        yhat = (y2d - mean) * jax.lax.rsqrt(var + _EPS)
        if gamma is not None:
            yhat = yhat * gamma + beta
        return yhat

    def leaky_relu(y):
        return jnp.where(y >= 0.0, y, _SLOPE * y)

    def pointwise(y2d, w_ref):
        # 1x1 conv == channel matmul on the MXU: bf16 operands, f32 accumulation.
        return jnp.dot(y2d.astype(jnp.bfloat16), w_ref[...],
                       preferred_element_type=jnp.float32)

    # ---- conv_sep1: dw3x3 -> 1x1 -> InstanceNorm(affine=False) -> LeakyReLU
    y = depthwise3x3(x_ref[0], wdw1_ref)
    y = pointwise(y.reshape(H * W, C), wpw1_ref)
    y = leaky_relu(inst_norm(y))

    # ---- conv2: dw3x3 -> IN(affine) -> LeakyReLU -> 1x1 -> IN(affine)
    z = depthwise3x3(y.reshape(H, W, C), wdw2_ref)
    z = inst_norm(z.reshape(H * W, C), g2a_ref[...], b2a_ref[...])
    z = leaky_relu(z)
    z = pointwise(z, wpw2_ref)
    z = inst_norm(z, g2b_ref[...], b2b_ref[...])

    # ---- residual add (downsample is None, stride=1) + LeakyReLU
    out = leaky_relu(z + x_ref[0].reshape(H * W, C))
    o_ref[0] = out.reshape(H, W, C)


# ------------------------------ forward wrapper ------------------------------

def basic_block_sep_in_forward(params, x_nchw):
    """NCHW in -> NCHW out; channels ride the TPU lane axis internally (NHWC)."""
    x = jnp.transpose(x_nchw, (0, 2, 3, 1)).astype(jnp.float32)   # -> NHWC
    N, H, W, C = x.shape

    w_dw1 = params["w_dw1"]                        # (9, C)  f32
    w_pw1 = params["w_pw1"].astype(jnp.bfloat16)   # (C, C)  bf16 for the MXU
    w_dw2 = params["w_dw2"]
    g2a, b2a = params["in2a"]                      # (1, C)  f32
    w_pw2 = params["w_pw2"].astype(jnp.bfloat16)
    g2b, b2b = params["in2b"]

    flops = N * (2 * H * W * C * C * 2 + 2 * H * W * C * 9 * 2)
    bytes_accessed = (2 * N * H * W * C * 4                  # activation in + out
                      + 2 * 9 * C * 4 + 2 * C * C * 2 + 4 * C * 4)

    out = pl.pallas_call(
        _basic_block_sep_in_kernel,
        out_shape=jax.ShapeDtypeStruct((N, H, W, C), jnp.float32),
        grid=(N,),
        in_specs=[
            pl.BlockSpec((1, H, W, C), lambda n: (n, 0, 0, 0)),   # x
            pl.BlockSpec((9, C), lambda n: (0, 0)),               # w_dw1
            pl.BlockSpec((C, C), lambda n: (0, 0)),               # w_pw1
            pl.BlockSpec((9, C), lambda n: (0, 0)),               # w_dw2
            pl.BlockSpec((1, C), lambda n: (0, 0)),               # gamma (conv2 IN-a)
            pl.BlockSpec((1, C), lambda n: (0, 0)),               # beta  (conv2 IN-a)
            pl.BlockSpec((C, C), lambda n: (0, 0)),               # w_pw2
            pl.BlockSpec((1, C), lambda n: (0, 0)),               # gamma (conv2 IN-b)
            pl.BlockSpec((1, C), lambda n: (0, 0)),               # beta  (conv2 IN-b)
        ],
        out_specs=pl.BlockSpec((1, H, W, C), lambda n: (n, 0, 0, 0)),
        scratch_shapes=[pltpu.VMEM((H + 2, W + 2, C), jnp.float32)],
        compiler_params=pltpu.CompilerParams(
            dimension_semantics=("parallel",)),
        cost_estimate=pl.CostEstimate(
            flops=flops, transcendentals=N * 3 * C,
            bytes_accessed=bytes_accessed),
    )(x, w_dw1, w_pw1, w_dw2, g2a, b2a, w_pw2, g2b, b2b)
    return jnp.transpose(out, (0, 3, 1, 2))                       # -> NCHW


# --------------------------- pure-JAX f32 reference --------------------------

def _reference_forward(params, x_nchw):
    x = jnp.transpose(x_nchw, (0, 2, 3, 1)).astype(jnp.float32)
    N, H, W, C = x.shape

    def depthwise(y, wdw):
        yp = jnp.pad(y, ((0, 0), (1, 1), (1, 1), (0, 0)))
        out = jnp.zeros_like(y)
        for di in range(3):
            for dj in range(3):
                out = out + yp[:, di:di + H, dj:dj + W, :] * wdw[3 * di + dj]
        return out

    def inst_norm(y, gamma=None, beta=None):
        mean = jnp.mean(y, axis=(1, 2), keepdims=True)
        var = jnp.mean(jnp.square(y - mean), axis=(1, 2), keepdims=True)
        yh = (y - mean) / jnp.sqrt(var + _EPS)
        if gamma is not None:
            yh = yh * gamma.reshape(1, 1, 1, -1) + beta.reshape(1, 1, 1, -1)
        return yh

    leaky = lambda v: jnp.where(v >= 0.0, v, _SLOPE * v)

    y = depthwise(x, params["w_dw1"])
    y = jnp.einsum("nhwc,cd->nhwd", y, params["w_pw1"])
    y = leaky(inst_norm(y))
    z = depthwise(y, params["w_dw2"])
    g2a, b2a = params["in2a"]
    z = leaky(inst_norm(z, g2a, b2a))
    z = jnp.einsum("nhwc,cd->nhwd", z, params["w_pw2"])
    g2b, b2b = params["in2b"]
    z = inst_norm(z, g2b, b2b)
    out = leaky(z + x)
    return jnp.transpose(out, (0, 3, 1, 2))


# ------------------------------ parameter init -------------------------------

def init_params(key, channels):
    c = channels
    ks = jax.random.split(key, 6)

    def dw(k):      # depthwise 3x3 weight, stored tap-major: (9, C); fan_in = 9
        return (jax.random.normal(k, (9, c)) / 3.0).astype(jnp.float32)

    def pw(k):      # pointwise 1x1 weight, stored (C_in, C_out); fan_in = c
        return (jax.random.normal(k, (c, c)) / math.sqrt(c)).astype(jnp.float32)

    def affine(k):
        k1, k2 = jax.random.split(k)
        gamma = jax.random.uniform(k1, (1, c), minval=0.5, maxval=1.5).astype(jnp.float32)
        beta = (0.1 * jax.random.normal(k2, (1, c))).astype(jnp.float32)
        return gamma, beta

    return {
        "w_dw1": dw(ks[0]),      # conv_sep1 depthwise
        "w_pw1": pw(ks[1]),      # conv_sep1 pointwise
        "w_dw2": dw(ks[2]),      # conv2 depthwise
        "in2a": affine(ks[3]),   # conv2 InstanceNorm (affine=True) after depthwise
        "w_pw2": pw(ks[4]),      # conv2 pointwise
        "in2b": affine(ks[5]),   # conv2 InstanceNorm (affine=True) after pointwise
    }


# ----------------------------------- main ------------------------------------

if __name__ == "__main__":
    key = jax.random.PRNGKey(0)
    pkey, xkey = jax.random.split(key)

    N, C, H, W = 2, 128, 16, 16          # inplanes = planes = 128, stride = 1
    params = init_params(pkey, C)
    x = jax.random.uniform(xkey, (N, C, H, W), dtype=jnp.float32)

    fwd = jax.jit(functools.partial(basic_block_sep_in_forward, params))
    out = fwd(x)
    jax.block_until_ready(out)

    assert out.shape == (N, C, H, W), out.shape
    assert out.dtype == jnp.float32

    # Validate against the pure-f32 JAX reference (kernel uses bf16 MXU operands
    # with f32 accumulation, so allow a small tolerance).
    ref = _reference_forward(params, x)
    max_err = float(jnp.max(jnp.abs(out - ref)))
    max_ref = float(jnp.max(jnp.abs(ref)))
    assert max_err <= 5e-2 * max(1.0, max_ref), (max_err, max_ref)

    print("KERNEL_OK")
</pallas_src>

<mosaic_0001>
module attributes {stable_mosaic.version = 11 : i64} {
  func.func @_basic_block_sep_in_kernel(%arg0: i32, %arg1: memref<1x16x16x128xf32, #tpu.memory_space<vmem>>, %arg2: memref<9x128xf32, #tpu.memory_space<vmem>>, %arg3: memref<128x128xbf16, #tpu.memory_space<vmem>>, %arg4: memref<9x128xf32, #tpu.memory_space<vmem>>, %arg5: memref<1x128xf32, #tpu.memory_space<vmem>>, %arg6: memref<1x128xf32, #tpu.memory_space<vmem>>, %arg7: memref<128x128xbf16, #tpu.memory_space<vmem>>, %arg8: memref<1x128xf32, #tpu.memory_space<vmem>>, %arg9: memref<1x128xf32, #tpu.memory_space<vmem>>, %arg10: memref<1x16x16x128xf32, #tpu.memory_space<vmem>>, %arg11: memref<18x18x128xf32, #tpu.memory_space<vmem>>) attributes {dimension_semantics = [#tpu.dimension_semantics<parallel>], iteration_bounds = array<i64: 2>, scalar_prefetch = 0 : i64, scratch_operands = 1 : i64, tpu.core_type = #tpu.core_type<tc>, window_params = [{transform_indices = @transform_0, window_bounds = array<i64: 1, 16, 16, 128>}, {pipeline_mode = #tpu.pipeline_mode<synchronous>, transform_indices = @transform_1, window_bounds = array<i64: 9, 128>}, {pipeline_mode = #tpu.pipeline_mode<synchronous>, transform_indices = @transform_2, window_bounds = array<i64: 128, 128>}, {pipeline_mode = #tpu.pipeline_mode<synchronous>, transform_indices = @transform_3, window_bounds = array<i64: 9, 128>}, {pipeline_mode = #tpu.pipeline_mode<synchronous>, transform_indices = @transform_4, window_bounds = array<i64: 1, 128>}, {pipeline_mode = #tpu.pipeline_mode<synchronous>, transform_indices = @transform_5, window_bounds = array<i64: 1, 128>}, {pipeline_mode = #tpu.pipeline_mode<synchronous>, transform_indices = @transform_6, window_bounds = array<i64: 128, 128>}, {pipeline_mode = #tpu.pipeline_mode<synchronous>, transform_indices = @transform_7, window_bounds = array<i64: 1, 128>}, {pipeline_mode = #tpu.pipeline_mode<synchronous>, transform_indices = @transform_8, window_bounds = array<i64: 1, 128>}, {transform_indices = @transform_9, window_bounds = array<i64: 1, 16, 16, 128>}]} {
    %c0 = arith.constant 0 : index
    %c0_0 = arith.constant 0 : index
    %c0_1 = arith.constant 0 : index
    %c0_2 = arith.constant 0 : index
    %0 = vector.load %arg1[%c0, %c0_0, %c0_1, %c0_2] : memref<1x16x16x128xf32, #tpu.memory_space<vmem>>, vector<1x16x16x128xf32>
    %1 = vector.shape_cast %0 : vector<1x16x16x128xf32> to vector<16x16x128xf32>
    %cst = arith.constant 0.000000e+00 : f32
    %2 = vector.broadcast %cst : f32 to vector<18x18x128xf32>
    %c0_3 = arith.constant 0 : index
    %c0_4 = arith.constant 0 : index
    %c0_5 = arith.constant 0 : index
    %3 = vector.load %arg11[%c0_3, %c0_4, %c0_5] : memref<18x18x128xf32, #tpu.memory_space<vmem>>, vector<18x18x128xf32>
    tpu.vector_store %arg11[%c0_3, %c0_4, %c0_5], %2 {strides = array<i32>} : memref<18x18x128xf32, #tpu.memory_space<vmem>>, vector<18x18x128xf32>,
    %c1 = arith.constant 1 : index
    %c1_6 = arith.constant 1 : index
    %c0_7 = arith.constant 0 : index
    %4 = vector.load %arg11[%c1, %c1_6, %c0_7] : memref<18x18x128xf32, #tpu.memory_space<vmem>>, vector<16x16x128xf32>
    tpu.vector_store %arg11[%c1, %c1_6, %c0_7], %1 {strides = array<i32>} : memref<18x18x128xf32, #tpu.memory_space<vmem>>, vector<16x16x128xf32>,
    %cst_8 = arith.constant 0.000000e+00 : f32
    %5 = vector.broadcast %cst_8 : f32 to vector<16x16x128xf32>
    %c0_9 = arith.constant 0 : index
    %c0_10 = arith.constant 0 : index
    %c0_11 = arith.constant 0 : index
    %6 = vector.load %arg11[%c0_9, %c0_10, %c0_11] : memref<18x18x128xf32, #tpu.memory_space<vmem>>, vector<16x16x128xf32>
    %c0_12 = arith.constant 0 : index
    %c0_13 = arith.constant 0 : index
    %7 = vector.load %arg2[%c0_12, %c0_13] : memref<9x128xf32, #tpu.memory_space<vmem>>, vector<1x128xf32>
    %8 = vector.shape_cast %7 : vector<1x128xf32> to vector<1x1x128xf32>
    %9 = vector.broadcast %8 : vector<1x1x128xf32> to vector<16x16x128xf32>
    %10 = arith.mulf %6, %9 : vector<16x16x128xf32>
    %11 = arith.addf %5, %10 : vector<16x16x128xf32>
    %c0_14 = arith.constant 0 : index
    %c1_15 = arith.constant 1 : index
    %c0_16 = arith.constant 0 : index
    %12 = vector.load %arg11[%c0_14, %c1_15, %c0_16] : memref<18x18x128xf32, #tpu.memory_space<vmem>>, vector<16x16x128xf32>
    %c1_17 = arith.constant 1 : index
    %c0_18 = arith.constant 0 : index
    %13 = vector.load %arg2[%c1_17, %c0_18] : memref<9x128xf32, #tpu.memory_space<vmem>>, vector<1x128xf32>
    %14 = vector.shape_cast %13 : vector<1x128xf32> to vector<1x1x128xf32>
    %15 = vector.broadcast %14 : vector<1x1x128xf32> to vector<16x16x128xf32>
    %16 = arith.mulf %12, %15 : vector<16x16x128xf32>
    %17 = arith.addf %11, %16 : vector<16x16x128xf32>
    %c0_19 = arith.constant 0 : index
    %c2 = arith.constant 2 : index
    %c0_20 = arith.constant 0 : index
    %18 = vector.load %arg11[%c0_19, %c2, %c0_20] : memref<18x18x128xf32, #tpu.memory_space<vmem>>, vector<16x16x128xf32>
    %c2_21 = arith.constant 2 : index
    %c0_22 = arith.constant 0 : index
    %19 = vector.load %arg2[%c2_21, %c0_22] : memref<9x128xf32, #tpu.memory_space<vmem>>, vector<1x128xf32>
    %20 = vector.shape_cast %19 : vector<1x128xf32> to vector<1x1x128xf32>
    %21 = vector.broadcast %20 : vector<1x1x128xf32> to vector<16x16x128xf32>
    %22 = arith.mulf %18, %21 : vector<16x16x128xf32>
    %23 = arith.addf %17, %22 : vector<16x16x128xf32>
    %c1_23 = arith.constant 1 : index
    %c0_24 = arith.constant 0 : index
    %c0_25 = arith.constant 0 : index
    %24 = vector.load %arg11[%c1_23, %c0_24, %c0_25] : memref<18x18x128xf32, #tpu.memory_space<vmem>>, vector<16x16x128xf32>
    %c3 = arith.constant 3 : index
    %c0_26 = arith.constant 0 : index
    %25 = vector.load %arg2[%c3, %c0_26] : memref<9x128xf32, #tpu.memory_space<vmem>>, vector<1x128xf32>
    %26 = vector.shape_cast %25 : vector<1x128xf32> to vector<1x1x128xf32>
    %27 = vector.broadcast %26 : vector<1x1x128xf32> to vector<16x16x128xf32>
    %28 = arith.mulf %24, %27 : vector<16x16x128xf32>
    %29 = arith.addf %23, %28 : vector<16x16x128xf32>
    %c1_27 = arith.constant 1 : index
    %c1_28 = arith.constant 1 : index
    %c0_29 = arith.constant 0 : index
    %30 = vector.load %arg11[%c1_27, %c1_28, %c0_29] : memref<18x18x128xf32, #tpu.memory_space<vmem>>, vector<16x16x128xf32>
    %c4 = arith.constant 4 : index
    %c0_30 = arith.constant 0 : index
    %31 = vector.load %arg2[%c4, %c0_30] : memref<9x128xf32, #tpu.memory_space<vmem>>, vector<1x128xf32>
    %32 = vector.shape_cast %31 : vector<1x128xf32> to vector<1x1x128xf32>
    %33 = vector.broadcast %32 : vector<1x1x128xf32> to vector<16x16x128xf32>
    %34 = arith.mulf %30, %33 : vector<16x16x128xf32>
    %35 = arith.addf %29, %34 : vector<16x16x128xf32>
    %c1_31 = arith.constant 1 : index
    %c2_32 = arith.constant 2 : index
    %c0_33 = arith.constant 0 : index
    %36 = vector.load %arg11[%c1_31, %c2_32, %c0_33] : memref<18x18x128xf32, #tpu.memory_space<vmem>>, vector<16x16x128xf32>
    %c5 = arith.constant 5 : index
    %c0_34 = arith.constant 0 : index
    %37 = vector.load %arg2[%c5, %c0_34] : memref<9x128xf32, #tpu.memory_space<vmem>>, vector<1x128xf32>
    %38 = vector.shape_cast %37 : vector<1x128xf32> to vector<1x1x128xf32>
    %39 = vector.broadcast %38 : vector<1x1x128xf32> to vector<16x16x128xf32>
    %40 = arith.mulf %36, %39 : vector<16x16x128xf32>
    %41 = arith.addf %35, %40 : vector<16x16x128xf32>
    %c2_35 = arith.constant 2 : index
    %c0_36 = arith.constant 0 : index
    %c0_37 = arith.constant 0 : index
    %42 = vector.load %arg11[%c2_35, %c0_36, %c0_37] : memref<18x18x128xf32, #tpu.memory_space<vmem>>, vector<16x16x128xf32>
    %c6 = arith.constant 6 : index
    %c0_38 = arith.constant 0 : index
    %43 = vector.load %arg2[%c6, %c0_38] : memref<9x128xf32, #tpu.memory_space<vmem>>, vector<1x128xf32>
    %44 = vector.shape_cast %43 : vector<1x128xf32> to vector<1x1x128xf32>
    %45 = vector.broadcast %44 : vector<1x1x128xf32> to vector<16x16x128xf32>
    %46 = arith.mulf %42, %45 : vector<16x16x128xf32>
    %47 = arith.addf %41, %46 : vector<16x16x128xf32>
    %c2_39 = arith.constant 2 : index
    %c1_40 = arith.constant 1 : index
    %c0_41 = arith.constant 0 : index
    %48 = vector.load %arg11[%c2_39, %c1_40, %c0_41] : memref<18x18x128xf32, #tpu.memory_space<vmem>>, vector<16x16x128xf32>
    %c7 = arith.constant 7 : index
    %c0_42 = arith.constant 0 : index
    %49 = vector.load %arg2[%c7, %c0_42] : memref<9x128xf32, #tpu.memory_space<vmem>>, vector<1x128xf32>
    %50 = vector.shape_cast %49 : vector<1x128xf32> to vector<1x1x128xf32>
    %51 = vector.broadcast %50 : vector<1x1x128xf32> to vector<16x16x128xf32>
    %52 = arith.mulf %48, %51 : vector<16x16x128xf32>
    %53 = arith.addf %47, %52 : vector<16x16x128xf32>
    %c2_43 = arith.constant 2 : index
    %c2_44 = arith.constant 2 : index
    %c0_45 = arith.constant 0 : index
    %54 = vector.load %arg11[%c2_43, %c2_44, %c0_45] : memref<18x18x128xf32, #tpu.memory_space<vmem>>, vector<16x16x128xf32>
    %c8 = arith.constant 8 : index
    %c0_46 = arith.constant 0 : index
    %55 = vector.load %arg2[%c8, %c0_46] : memref<9x128xf32, #tpu.memory_space<vmem>>, vector<1x128xf32>
    %56 = vector.shape_cast %55 : vector<1x128xf32> to vector<1x1x128xf32>
    %57 = vector.broadcast %56 : vector<1x1x128xf32> to vector<16x16x128xf32>
    %58 = arith.mulf %54, %57 : vector<16x16x128xf32>
    %59 = arith.addf %53, %58 : vector<16x16x128xf32>
    %60 = vector.shape_cast %59 : vector<16x16x128xf32> to vector<256x128xf32>
    %61 = arith.truncf %60 : vector<256x128xf32> to vector<256x128xbf16>
    %c0_47 = arith.constant 0 : index
    %c0_48 = arith.constant 0 : index
    %62 = vector.load %arg3[%c0_47, %c0_48] : memref<128x128xbf16, #tpu.memory_space<vmem>>, vector<128x128xbf16>
    %cst_49 = arith.constant dense<0.000000e+00> : vector<256x128xf32>
    %63 = tpu.matmul %61, %62, %cst_49 {dimension_numbers = #tpu.dot_dimension_numbers<[1], [0], [0], [1], [0, 0, 1, 1], [], []>} : vector<256x128xbf16>, vector<128x128xbf16>, vector<256x128xf32> -> vector<256x128xf32>
    %cst_50 = arith.constant dense<0.000000e+00> : vector<128xf32>
    %64 = vector.multi_reduction <add>, %63, %cst_50 [0] : vector<256x128xf32> to vector<128xf32>
    %65 = vector.shape_cast %64 : vector<128xf32> to vector<1x128xf32>
    %cst_51 = arith.constant 2.560000e+02 : f32
    %66 = vector.broadcast %cst_51 : f32 to vector<1x128xf32>
    %67 = arith.divf %65, %66 : vector<1x128xf32>
    %68 = vector.broadcast %67 : vector<1x128xf32> to vector<256x128xf32>
    %69 = arith.subf %63, %68 : vector<256x128xf32>
    %70 = arith.mulf %69, %69 : vector<256x128xf32>
    %cst_52 = arith.constant dense<0.000000e+00> : vector<128xf32>
    %71 = vector.multi_reduction <add>, %70, %cst_52 [0] : vector<256x128xf32> to vector<128xf32>
    %72 = vector.shape_cast %71 : vector<128xf32> to vector<1x128xf32>
    %cst_53 = arith.constant 2.560000e+02 : f32
    %73 = vector.broadcast %cst_53 : f32 to vector<1x128xf32>
    %74 = arith.divf %72, %73 : vector<1x128xf32>
    %75 = vector.broadcast %67 : vector<1x128xf32> to vector<256x128xf32>
    %76 = arith.subf %63, %75 : vector<256x128xf32>
    %cst_54 = arith.constant 9.99999974E-6 : f32
    %77 = vector.broadcast %cst_54 : f32 to vector<1x128xf32>
    %78 = arith.addf %74, %77 : vector<1x128xf32>
    %79 = math.rsqrt %78 : vector<1x128xf32>
    %80 = vector.broadcast %79 : vector<1x128xf32> to vector<256x128xf32>
    %81 = arith.mulf %76, %80 : vector<256x128xf32>
    %cst_55 = arith.constant 0.000000e+00 : f32
    %82 = vector.broadcast %cst_55 : f32 to vector<256x128xf32>
    %83 = arith.cmpf oge, %81, %82 : vector<256x128xf32>
    %cst_56 = arith.constant 0.00999999977 : f32
    %84 = vector.broadcast %cst_56 : f32 to vector<256x128xf32>
    %85 = arith.mulf %84, %81 : vector<256x128xf32>
    %86 = arith.select %83, %81, %85 : vector<256x128xi1>, vector<256x128xf32>
    %87 = vector.shape_cast %86 : vector<256x128xf32> to vector<16x16x128xf32>
    %cst_57 = arith.constant 0.000000e+00 : f32
    %88 = vector.broadcast %cst_57 : f32 to vector<18x18x128xf32>
    %c0_58 = arith.constant 0 : index
    %c0_59 = arith.constant 0 : index
    %c0_60 = arith.constant 0 : index
    %89 = vector.load %arg11[%c0_58, %c0_59, %c0_60] : memref<18x18x128xf32, #tpu.memory_space<vmem>>, vector<18x18x128xf32>
    tpu.vector_store %arg11[%c0_58, %c0_59, %c0_60], %88 {strides = array<i32>} : memref<18x18x128xf32, #tpu.memory_space<vmem>>, vector<18x18x128xf32>,
    %c1_61 = arith.constant 1 : index
    %c1_62 = arith.constant 1 : index
    %c0_63 = arith.constant 0 : index
    %90 = vector.load %arg11[%c1_61, %c1_62, %c0_63] : memref<18x18x128xf32, #tpu.memory_space<vmem>>, vector<16x16x128xf32>
    tpu.vector_store %arg11[%c1_61, %c1_62, %c0_63], %87 {strides = array<i32>} : memref<18x18x128xf32, #tpu.memory_space<vmem>>, vector<16x16x128xf32>,
    %cst_64 = arith.constant 0.000000e+00 : f32
    %91 = vector.broadcast %cst_64 : f32 to vector<16x16x128xf32>
    %c0_65 = arith.constant 0 : index
    %c0_66 = arith.constant 0 : index
    %c0_67 = arith.constant 0 : index
    %92 = vector.load %arg11[%c0_65, %c0_66, %c0_67] : memref<18x18x128xf32, #tpu.memory_space<vmem>>, vector<16x16x128xf32>
    %c0_68 = arith.constant 0 : index
    %c0_69 = arith.constant 0 : index
    %93 = vector.load %arg4[%c0_68, %c0_69] : memref<9x128xf32, #tpu.memory_space<vmem>>, vector<1x128xf32>
    %94 = vector.shape_cast %93 : vector<1x128xf32> to vector<1x1x128xf32>
    %95 = vector.broadcast %94 : vector<1x1x128xf32> to vector<16x16x128xf32>
    %96 = arith.mulf %92, %95 : vector<16x16x128xf32>
    %97 = arith.addf %91, %96 : vector<16x16x128xf32>
    %c0_70 = arith.constant 0 : index
    %c1_71 = arith.constant 1 : index
    %c0_72 = arith.constant 0 : index
    %98 = vector.load %arg11[%c0_70, %c1_71, %c0_72] : memref<18x18x128xf32, #tpu.memory_space<vmem>>, vector<16x16x128xf32>
    %c1_73 = arith.constant 1 : index
    %c0_74 = arith.constant 0 : index
    %99 = vector.load %arg4[%c1_73, %c0_74] : memref<9x128xf32, #tpu.memory_space<vmem>>, vector<1x128xf32>
    %100 = vector.shape_cast %99 : vector<1x128xf32> to vector<1x1x128xf32>
    %101 = vector.broadcast %100 : vector<1x1x128xf32> to vector<16x16x128xf32>
    %102 = arith.mulf %98, %101 : vector<16x16x128xf32>
    %103 = arith.addf %97, %102 : vector<16x16x128xf32>
    %c0_75 = arith.constant 0 : index
    %c2_76 = arith.constant 2 : index
    %c0_77 = arith.constant 0 : index
    %104 = vector.load %arg11[%c0_75, %c2_76, %c0_77] : memref<18x18x128xf32, #tpu.memory_space<vmem>>, vector<16x16x128xf32>
    %c2_78 = arith.constant 2 : index
    %c0_79 = arith.constant 0 : index
    %105 = vector.load %arg4[%c2_78, %c0_79] : memref<9x128xf32, #tpu.memory_space<vmem>>, vector<1x128xf32>
    %106 = vector.shape_cast %105 : vector<1x128xf32> to vector<1x1x128xf32>
    %107 = vector.broadcast %106 : vector<1x1x128xf32> to vector<16x16x128xf32>
    %108 = arith.mulf %104, %107 : vector<16x16x128xf32>
    %109 = arith.addf %103, %108 : vector<16x16x128xf32>
    %c1_80 = arith.constant 1 : index
    %c0_81 = arith.constant 0 : index
    %c0_82 = arith.constant 0 : index
    %110 = vector.load %arg11[%c1_80, %c0_81, %c0_82] : memref<18x18x128xf32, #tpu.memory_space<vmem>>, vector<16x16x128xf32>
    %c3_83 = arith.constant 3 : index
    %c0_84 = arith.constant 0 : index
    %111 = vector.load %arg4[%c3_83, %c0_84] : memref<9x128xf32, #tpu.memory_space<vmem>>, vector<1x128xf32>
    %112 = vector.shape_cast %111 : vector<1x128xf32> to vector<1x1x128xf32>
    %113 = vector.broadcast %112 : vector<1x1x128xf32> to vector<16x16x128xf32>
    %114 = arith.mulf %110, %113 : vector<16x16x128xf32>
    %115 = arith.addf %109, %114 : vector<16x16x128xf32>
    %c1_85 = arith.constant 1 : index
    %c1_86 = arith.constant 1 : index
    %c0_87 = arith.constant 0 : index
    %116 = vector.load %arg11[%c1_85, %c1_86, %c0_87] : memref<18x18x128xf32, #tpu.memory_space<vmem>>, vector<16x16x128xf32>
    %c4_88 = arith.constant 4 : index
    %c0_89 = arith.constant 0 : index
    %117 = vector.load %arg4[%c4_88, %c0_89] : memref<9x128xf32, #tpu.memory_space<vmem>>, vector<1x128xf32>
    %118 = vector.shape_cast %117 : vector<1x128xf32> to vector<1x1x128xf32>
    %119 = vector.broadcast %118 : vector<1x1x128xf32> to vector<16x16x128xf32>
    %120 = arith.mulf %116, %119 : vector<16x16x128xf32>
    %121 = arith.addf %115, %120 : vector<16x16x128xf32>
    %c1_90 = arith.constant 1 : index
    %c2_91 = arith.constant 2 : index
    %c0_92 = arith.constant 0 : index
    %122 = vector.load %arg11[%c1_90, %c2_91, %c0_92] : memref<18x18x128xf32, #tpu.memory_space<vmem>>, vector<16x16x128xf32>
    %c5_93 = arith.constant 5 : index
    %c0_94 = arith.constant 0 : index
    %123 = vector.load %arg4[%c5_93, %c0_94] : memref<9x128xf32, #tpu.memory_space<vmem>>, vector<1x128xf32>
    %124 = vector.shape_cast %123 : vector<1x128xf32> to vector<1x1x128xf32>
    %125 = vector.broadcast %124 : vector<1x1x128xf32> to vector<16x16x128xf32>
    %126 = arith.mulf %122, %125 : vector<16x16x128xf32>
    %127 = arith.addf %121, %126 : vector<16x16x128xf32>
    %c2_95 = arith.constant 2 : index
    %c0_96 = arith.constant 0 : index
    %c0_97 = arith.constant 0 : index
    %128 = vector.load %arg11[%c2_95, %c0_96, %c0_97] : memref<18x18x128xf32, #tpu.memory_space<vmem>>, vector<16x16x128xf32>
    %c6_98 = arith.constant 6 : index
    %c0_99 = arith.constant 0 : index
    %129 = vector.load %arg4[%c6_98, %c0_99] : memref<9x128xf32, #tpu.memory_space<vmem>>, vector<1x128xf32>
    %130 = vector.shape_cast %129 : vector<1x128xf32> to vector<1x1x128xf32>
    %131 = vector.broadcast %130 : vector<1x1x128xf32> to vector<16x16x128xf32>
    %132 = arith.mulf %128, %131 : vector<16x16x128xf32>
    %133 = arith.addf %127, %132 : vector<16x16x128xf32>
    %c2_100 = arith.constant 2 : index
    %c1_101 = arith.constant 1 : index
    %c0_102 = arith.constant 0 : index
    %134 = vector.load %arg11[%c2_100, %c1_101, %c0_102] : memref<18x18x128xf32, #tpu.memory_space<vmem>>, vector<16x16x128xf32>
    %c7_103 = arith.constant 7 : index
    %c0_104 = arith.constant 0 : index
    %135 = vector.load %arg4[%c7_103, %c0_104] : memref<9x128xf32, #tpu.memory_space<vmem>>, vector<1x128xf32>
    %136 = vector.shape_cast %135 : vector<1x128xf32> to vector<1x1x128xf32>
    %137 = vector.broadcast %136 : vector<1x1x128xf32> to vector<16x16x128xf32>
    %138 = arith.mulf %134, %137 : vector<16x16x128xf32>
    %139 = arith.addf %133, %138 : vector<16x16x128xf32>
    %c2_105 = arith.constant 2 : index
    %c2_106 = arith.constant 2 : index
    %c0_107 = arith.constant 0 : index
    %140 = vector.load %arg11[%c2_105, %c2_106, %c0_107] : memref<18x18x128xf32, #tpu.memory_space<vmem>>, vector<16x16x128xf32>
    %c8_108 = arith.constant 8 : index
    %c0_109 = arith.constant 0 : index
    %141 = vector.load %arg4[%c8_108, %c0_109] : memref<9x128xf32, #tpu.memory_space<vmem>>, vector<1x128xf32>
    %142 = vector.shape_cast %141 : vector<1x128xf32> to vector<1x1x128xf32>
    %143 = vector.broadcast %142 : vector<1x1x128xf32> to vector<16x16x128xf32>
    %144 = arith.mulf %140, %143 : vector<16x16x128xf32>
    %145 = arith.addf %139, %144 : vector<16x16x128xf32>
    %146 = vector.shape_cast %145 : vector<16x16x128xf32> to vector<256x128xf32>
    %c0_110 = arith.constant 0 : index
    %c0_111 = arith.constant 0 : index
    %147 = vector.load %arg5[%c0_110, %c0_111] : memref<1x128xf32, #tpu.memory_space<vmem>>, vector<1x128xf32>
    %c0_112 = arith.constant 0 : index
    %c0_113 = arith.constant 0 : index
    %148 = vector.load %arg6[%c0_112, %c0_113] : memref<1x128xf32, #tpu.memory_space<vmem>>, vector<1x128xf32>
    %cst_114 = arith.constant dense<0.000000e+00> : vector<128xf32>
    %149 = vector.multi_reduction <add>, %146, %cst_114 [0] : vector<256x128xf32> to vector<128xf32>
    %150 = vector.shape_cast %149 : vector<128xf32> to vector<1x128xf32>
    %cst_115 = arith.constant 2.560000e+02 : f32
    %151 = vector.broadcast %cst_115 : f32 to vector<1x128xf32>
    %152 = arith.divf %150, %151 : vector<1x128xf32>
    %153 = vector.broadcast %152 : vector<1x128xf32> to vector<256x128xf32>
    %154 = arith.subf %146, %153 : vector<256x128xf32>
    %155 = arith.mulf %154, %154 : vector<256x128xf32>
    %cst_116 = arith.constant dense<0.000000e+00> : vector<128xf32>
    %156 = vector.multi_reduction <add>, %155, %cst_116 [0] : vector<256x128xf32> to vector<128xf32>
    %157 = vector.shape_cast %156 : vector<128xf32> to vector<1x128xf32>
    %cst_117 = arith.constant 2.560000e+02 : f32
    %158 = vector.broadcast %cst_117 : f32 to vector<1x128xf32>
    %159 = arith.divf %157, %158 : vector<1x128xf32>
    %160 = vector.broadcast %152 : vector<1x128xf32> to vector<256x128xf32>
    %161 = arith.subf %146, %160 : vector<256x128xf32>
    %cst_118 = arith.constant 9.99999974E-6 : f32
    %162 = vector.broadcast %cst_118 : f32 to vector<1x128xf32>
    %163 = arith.addf %159, %162 : vector<1x128xf32>
    %164 = math.rsqrt %163 : vector<1x128xf32>
    %165 = vector.broadcast %164 : vector<1x128xf32> to vector<256x128xf32>
    %166 = arith.mulf %161, %165 : vector<256x128xf32>
    %167 = vector.broadcast %147 : vector<1x128xf32> to vector<256x128xf32>
    %168 = arith.mulf %166, %167 : vector<256x128xf32>
    %169 = vector.broadcast %148 : vector<1x128xf32> to vector<256x128xf32>
    %170 = arith.addf %168, %169 : vector<256x128xf32>
    %cst_119 = arith.constant 0.000000e+00 : f32
    %171 = vector.broadcast %cst_119 : f32 to vector<256x128xf32>
    %172 = arith.cmpf oge, %170, %171 : vector<256x128xf32>
    %cst_120 = arith.constant 0.00999999977 : f32
    %173 = vector.broadcast %cst_120 : f32 to vector<256x128xf32>
    %174 = arith.mulf %173, %170 : vector<256x128xf32>
    %175 = arith.select %172, %170, %174 : vector<256x128xi1>, vector<256x128xf32>
    %176 = arith.truncf %175 : vector<256x128xf32> to vector<256x128xbf16>
    %c0_121 = arith.constant 0 : index
    %c0_122 = arith.constant 0 : index
    %177 = vector.load %arg7[%c0_121, %c0_122] : memref<128x128xbf16, #tpu.memory_space<vmem>>, vector<128x128xbf16>
    %cst_123 = arith.constant dense<0.000000e+00> : vector<256x128xf32>
    %178 = tpu.matmul %176, %177, %cst_123 {dimension_numbers = #tpu.dot_dimension_numbers<[1], [0], [0], [1], [0, 0, 1, 1], [], []>} : vector<256x128xbf16>, vector<128x128xbf16>, vector<256x128xf32> -> vector<256x128xf32>
    %c0_124 = arith.constant 0 : index
    %c0_125 = arith.constant 0 : index
    %179 = vector.load %arg8[%c0_124, %c0_125] : memref<1x128xf32, #tpu.memory_space<vmem>>, vector<1x128xf32>
    %c0_126 = arith.constant 0 : index
    %c0_127 = arith.constant 0 : index
    %180 = vector.load %arg9[%c0_126, %c0_127] : memref<1x128xf32, #tpu.memory_space<vmem>>, vector<1x128xf32>
    %cst_128 = arith.constant dense<0.000000e+00> : vector<128xf32>
    %181 = vector.multi_reduction <add>, %178, %cst_128 [0] : vector<256x128xf32> to vector<128xf32>
    %182 = vector.shape_cast %181 : vector<128xf32> to vector<1x128xf32>
    %cst_129 = arith.constant 2.560000e+02 : f32
    %183 = vector.broadcast %cst_129 : f32 to vector<1x128xf32>
    %184 = arith.divf %182, %183 : vector<1x128xf32>
    %185 = vector.broadcast %184 : vector<1x128xf32> to vector<256x128xf32>
    %186 = arith.subf %178, %185 : vector<256x128xf32>
    %187 = arith.mulf %186, %186 : vector<256x128xf32>
    %cst_130 = arith.constant dense<0.000000e+00> : vector<128xf32>
    %188 = vector.multi_reduction <add>, %187, %cst_130 [0] : vector<256x128xf32> to vector<128xf32>
    %189 = vector.shape_cast %188 : vector<128xf32> to vector<1x128xf32>
    %cst_131 = arith.constant 2.560000e+02 : f32
    %190 = vector.broadcast %cst_131 : f32 to vector<1x128xf32>
    %191 = arith.divf %189, %190 : vector<1x128xf32>
    %192 = vector.broadcast %184 : vector<1x128xf32> to vector<256x128xf32>
    %193 = arith.subf %178, %192 : vector<256x128xf32>
    %cst_132 = arith.constant 9.99999974E-6 : f32
    %194 = vector.broadcast %cst_132 : f32 to vector<1x128xf32>
    %195 = arith.addf %191, %194 : vector<1x128xf32>
    %196 = math.rsqrt %195 : vector<1x128xf32>
    %197 = vector.broadcast %196 : vector<1x128xf32> to vector<256x128xf32>
    %198 = arith.mulf %193, %197 : vector<256x128xf32>
    %199 = vector.broadcast %179 : vector<1x128xf32> to vector<256x128xf32>
    %200 = arith.mulf %198, %199 : vector<256x128xf32>
    %201 = vector.broadcast %180 : vector<1x128xf32> to vector<256x128xf32>
    %202 = arith.addf %200, %201 : vector<256x128xf32>
    %c0_133 = arith.constant 0 : index
    %c0_134 = arith.constant 0 : index
    %c0_135 = arith.constant 0 : index
    %c0_136 = arith.constant 0 : index
    %203 = vector.load %arg1[%c0_133, %c0_134, %c0_135, %c0_136] : memref<1x16x16x128xf32, #tpu.memory_space<vmem>>, vector<1x16x16x128xf32>
    %204 = vector.shape_cast %203 : vector<1x16x16x128xf32> to vector<16x16x128xf32>
    %205 = vector.shape_cast %204 : vector<16x16x128xf32> to vector<256x128xf32>
    %206 = arith.addf %202, %205 : vector<256x128xf32>
    %cst_137 = arith.constant 0.000000e+00 : f32
    %207 = vector.broadcast %cst_137 : f32 to vector<256x128xf32>
    %208 = arith.cmpf oge, %206, %207 : vector<256x128xf32>
    %cst_138 = arith.constant 0.00999999977 : f32
    %209 = vector.broadcast %cst_138 : f32 to vector<256x128xf32>
    %210 = arith.mulf %209, %206 : vector<256x128xf32>
    %211 = arith.select %208, %206, %210 : vector<256x128xi1>, vector<256x128xf32>
    %212 = vector.shape_cast %211 : vector<256x128xf32> to vector<16x16x128xf32>
    %c0_139 = arith.constant 0 : index
    %c0_140 = arith.constant 0 : index
    %c0_141 = arith.constant 0 : index
    %c0_142 = arith.constant 0 : index
    %213 = vector.load %arg10[%c0_139, %c0_140, %c0_141, %c0_142] : memref<1x16x16x128xf32, #tpu.memory_space<vmem>>, vector<1x16x16x128xf32>
    %214 = vector.shape_cast %213 : vector<1x16x16x128xf32> to vector<16x16x128xf32>
    %215 = vector.shape_cast %212 : vector<16x16x128xf32> to vector<1x16x16x128xf32>
    tpu.vector_store %arg10[%c0_139, %c0_140, %c0_141, %c0_142], %215 {strides = array<i32>} : memref<1x16x16x128xf32, #tpu.memory_space<vmem>>, vector<1x16x16x128xf32>,
    return
  }
  func.func @transform_0(%arg0: i32) -> (i32, i32, i32, i32) {
    %c0_i32 = arith.constant 0 : i32
    %c0_i32_0 = arith.constant 0 : i32
    %c0_i32_1 = arith.constant 0 : i32
    %c0_i32_2 = arith.constant 0 : i32
    return %arg0, %c0_i32, %c0_i32_0, %c0_i32_1 : i32, i32, i32, i32
  }
  func.func @transform_1(%arg0: i32) -> (i32, i32) {
    %c0_i32 = arith.constant 0 : i32
    %c0_i32_0 = arith.constant 0 : i32
    %c0_i32_1 = arith.constant 0 : i32
    return %c0_i32, %c0_i32_0 : i32, i32
  }
  func.func @transform_2(%arg0: i32) -> (i32, i32) {
    %c0_i32 = arith.constant 0 : i32
    %c0_i32_0 = arith.constant 0 : i32
    %c0_i32_1 = arith.constant 0 : i32
    return %c0_i32, %c0_i32_0 : i32, i32
  }
  func.func @transform_3(%arg0: i32) -> (i32, i32) {
    %c0_i32 = arith.constant 0 : i32
    %c0_i32_0 = arith.constant 0 : i32
    %c0_i32_1 = arith.constant 0 : i32
    return %c0_i32, %c0_i32_0 : i32, i32
  }
  func.func @transform_4(%arg0: i32) -> (i32, i32) {
    %c0_i32 = arith.constant 0 : i32
    %c0_i32_0 = arith.constant 0 : i32
    %c0_i32_1 = arith.constant 0 : i32
    return %c0_i32, %c0_i32_0 : i32, i32
  }
  func.func @transform_5(%arg0: i32) -> (i32, i32) {
    %c0_i32 = arith.constant 0 : i32
    %c0_i32_0 = arith.constant 0 : i32
    %c0_i32_1 = arith.constant 0 : i32
    return %c0_i32, %c0_i32_0 : i32, i32
  }
  func.func @transform_6(%arg0: i32) -> (i32, i32) {
    %c0_i32 = arith.constant 0 : i32
    %c0_i32_0 = arith.constant 0 : i32
    %c0_i32_1 = arith.constant 0 : i32
    return %c0_i32, %c0_i32_0 : i32, i32
  }
  func.func @transform_7(%arg0: i32) -> (i32, i32) {
    %c0_i32 = arith.constant 0 : i32
    %c0_i32_0 = arith.constant 0 : i32
    %c0_i32_1 = arith.constant 0 : i32
    return %c0_i32, %c0_i32_0 : i32, i32
  }
  func.func @transform_8(%arg0: i32) -> (i32, i32) {
    %c0_i32 = arith.constant 0 : i32
    %c0_i32_0 = arith.constant 0 : i32
    %c0_i32_1 = arith.constant 0 : i32
    return %c0_i32, %c0_i32_0 : i32, i32
  }
  func.func @transform_9(%arg0: i32) -> (i32, i32, i32, i32) {
    %c0_i32 = arith.constant 0 : i32
    %c0_i32_0 = arith.constant 0 : i32
    %c0_i32_1 = arith.constant 0 : i32
    %c0_i32_2 = arith.constant 0 : i32
    return %arg0, %c0_i32, %c0_i32_0, %c0_i32_1 : i32, i32, i32, i32
  }
}

</mosaic_0001>

<bundles_post_ra>
// kernel: basic_block_sep_in_forward.1
= control target key start
LH: loop header
LB: loop body
LE: loop exit
PB: predicated region body
PF: predicated region fallthrough
CT: control target
= control target key end

     0   :  { %s8388_s0 = inlined_call_operand.hbm [shape: f32[2,16,16,128], index: 0, kind: input, shape index: {}]   ;;  %s8389_s1 = inlined_call_operand.hbm [shape: f32[9,128], index: 1, kind: input, shape index: {}]   ;;  %s8390_s2 = inlined_call_operand.hbm [shape: bf16[128,128], index: 2, kind: input, shape index: {}]   ;;  %s8391_s3 = inlined_call_operand.hbm [shape: f32[9,128], index: 3, kind: input, shape index: {}]   ;;  %s8392_s4 = inlined_call_operand.vmem [shape: f32[1,128], index: 4, kind: input, shape index: {}]   ;;  %s8393_s5 = inlined_call_operand.vmem [shape: f32[1,128], index: 5, kind: input, shape index: {}]   ;;  %s8394_s6 = inlined_call_operand.hbm [shape: bf16[128,128], index: 6, kind: input, shape index: {}]   ;;  %s8395_s7 = inlined_call_operand.vmem [shape: f32[1,128], index: 7, kind: input, shape index: {}]   ;;  %s8396_s8 = inlined_call_operand.vmem [shape: f32[1,128], index: 8, kind: input, shape index: {}]   ;;  %s8397_s9 = inlined_call_operand.hbm [shape: f32[2,16,16,128], index: 9, kind: output, shape index: {}]  }
   0x1   :  { %8589 = sst [smem:[#allocation104_spill]] %s8389_s1 }
   0x2   :  { %8590 = sst [smem:[#allocation105_spill]] %s8390_s2 }
   0x3   :  { %8591 = sst [smem:[#allocation106_spill]] %s8391_s3 }
   0x4   :  { %14 = vsyncpa [#allocation4], 0 }
   0x5   :  { %16 = vsyncpa [#allocation4 + $0x1], 0 }
   0x6   :  { %17 = vsyncpa [#allocation7], 0 }
   0x7   :  { %18 = vsyncpa [#allocation10], 0 }
   0x8   :  { %19 = vsyncpa [#allocation5], 0 }
   0x9   :  { %21 = vsyncpa [#allocation5 + $0x1], 0  ;;  %s4711_s30 = smov 0   ;;  %s4713_s10 = smov 0  }
   0xa   :  { %s4715_s11 = smov 0   ;;  %s4717_s12 = smov 0  }
   0xb LB: > { %s4732_s13 = sadd.s32 4294967295, %s4646_s12   ;;  %s4104_s14 = sadd.s32 4294967294, %s4646_s12   ;;  %s4646_s12 = sphi %s4717_s12, %s8969_s12   ;;  %s4642_s11 = sphi %s4715_s11, %s8968_s11   ;;  %s4638_s10 = sphi %s4713_s10, %s8967_s10   ;;  %s4634_s30 = sphi %s4711_s30, %s8966_s30  }
   0xc   : > { %p47_p0 = scmp.ne.s32.totalorder %s4638_s10, %s4634_s30  ;;  %p8398_p1 = scmp.eq.s32.totalorder %s4732_s13, 0 }
   0xd   : > { %p239_p2 = scmp.eq.s32.totalorder %s4732_s13, 1  ;;  %p245_p3 = scmp.eq.s32.totalorder %s4104_s14, 1 }
   0xe   : > { %p4741_p4 = por %p8398_p1, %p47_p0  ;;  %p4105_p5 = scmp.ge.s32.totalorder %s4646_s12, 1 }
   0xf   : > { %p4746_p6 = por %p245_p3, %p47_p0  ;;  %p252_p7 = scmp.lt.s32.totalorder %s4646_s12, 3 }
  0x10   : > { %s8592_s15 = scalar_select %p4741_p4, 1, 0 }
  0x11   : > { %s8593_s16 = scalar_select %p4746_p6, 1, 0 }
  0x12   : > { %p4751_p8 = pnand %p4105_p5, %p252_p7  ;;  %s4648_s18 = smov [#allocation6]  }
  0x13   : > { %s264_s19 = sshll.u32 %s4648_s18, 4  ;;  %s4649_s21 = smov [#allocation9]   ;;  %s265_s19 = int_to_ptr.vmem [resolvable:$true] %s264_s19 }
  0x14   : > { %s8594_s17 = scalar_select %p4751_p8, 1, 0 }
  0x15   : > { %p4330_p9 = pneg %p4751_p8  ;;  %s290_s22 = sshll.u32 %s4649_s21, 4  ;;  %s291_s22 = int_to_ptr.vmem [resolvable:$true] %s290_s22 }
  0x16   : > { %s4650_s23 = smov [#allocation8]   ;;  %s4453_s25 = scalar_lea.vmem %s265_s19, 256 }
  0x17   : > { %p4760_p11 = pnand %p4330_p9, %p8398_p1  ;;  %s277_s24 = sshll.u32 %s4650_s23, 4  ;;  %s278_s24 = int_to_ptr.vmem [resolvable:$true] %s277_s24 }
  0x18   : > { %p4454_p13 = scmp.ne.s32.totalorder %s265_s19, %s4453_s25  ;;  %p4461_p5 = scmp.lt.s32.totalorder %s265_s19, %s265_s19 }
  0x19   : > { %p4444_p12 = pneg %p4760_p11  ;;  %p4462_p7 = scmp.lt.s32.totalorder %s4453_s25, %s4453_s25 }
  0x1b   : > { %p4456_p0 = pnand %p4454_p13, %p4444_p12  ;;  %p4463_p9 = por %p4462_p7, %p4461_p5 }
  0x1d   : > { %p4457_p3 = pneg %p4456_p0 }
  0x1f   : > { %p4464_p10 = pnand %p4463_p9, %p4457_p3 }
  0x21   : > { %4467 = shalt.err (!%p4464_p10)
}
  0x22   : > { %s8399_s26 = smov 128   ;;  %s8400_s27 = smov 8  }
  0x23   : > { %s8596_s1 = sld [smem:[#allocation104_spill]]  ;;  %s4479_s14 = scalar_lea.vmem %s291_s22, 256 }
  0x24   : > { %p4480_p13 = scmp.ne.s32.totalorder %s291_s22, %s4479_s14  ;;  %p4487_p3 = scmp.lt.s32.totalorder %s291_s22, %s291_s22 }
  0x25   : > { %p4488_p10 = scmp.lt.s32.totalorder %s4479_s14, %s4479_s14 }
  0x26   : > { %p4482_p0 = pnand %p4480_p13, %p4444_p12 }
  0x27   : > { %p4489_p7 = por %p4488_p10, %p4487_p3 }
  0x28   : > { %p4483_p5 = pneg %p4482_p0 }
  0x29   : > { %4333 = dma.hbm_to_vmem [thread:$0]  (!%p4760_p11), %s8596_s1, 256, %s265_s19, [#allocation7], %s8399_s26, %s8399_s26, %s8400_s27  }
  0x2a   : > { %p4490_p9 = pnand %p4489_p7, %p4483_p5 }
  0x2c   : > { %4493 = shalt.err (!%p4490_p9)
}
  0x2d   : > { %s8597_s3 = sld [smem:[#allocation106_spill]]  ;;  %s4505_s19 = scalar_lea.vmem %s278_s24, 1024 }
  0x2e   : > { %p4506_p1 = scmp.ne.s32.totalorder %s278_s24, %s4505_s19  ;;  %p4513_p3 = scmp.lt.s32.totalorder %s278_s24, %s278_s24 }
  0x2f   : > { %p4514_p5 = scmp.lt.s32.totalorder %s4505_s19, %s4505_s19 }
  0x30   : > { %p4508_p13 = pnand %p4506_p1, %p4444_p12 }
  0x31   : > { %p4515_p10 = por %p4514_p5, %p4513_p3 }
  0x32   : > { %p4509_p0 = pneg %p4508_p13 }
  0x33   : > { %4339 = dma.hbm_to_vmem [thread:$0]  (!%p4760_p11), %s8597_s3, 256, %s291_s22, [#allocation10], %s8399_s26, %s8399_s26, %s8400_s27  }
  0x34   : > { %p4516_p7 = pnand %p4515_p10, %p4509_p0 }
  0x36   : > { %4519 = shalt.err (!%p4516_p7)
}
  0x37   : > { %s4653_s23 = smov 64   ;;  %s4654_s25 = smov 4  }
  0x38   : > { %s8598_s2 = sld [smem:[#allocation105_spill]]  ;;  %s4655_s22 = smov [#allocation11]  }
  0x39   : > { %s309_s14 = sshll.u32 %s4655_s22, 4  ;;  %s310_s14 = int_to_ptr.vmem [resolvable:$true] %s309_s14 }
  0x3a   : > { %s4531_s18 = scalar_lea.vmem %s310_s14, 1024  ;;  %p4539_p0 = scmp.lt.s32.totalorder %s310_s14, %s310_s14 }
  0x3b   : > { %p4532_p1 = scmp.ne.s32.totalorder %s310_s14, %s4531_s18  ;;  %p4540_p3 = scmp.lt.s32.totalorder %s4531_s18, %s4531_s18 }
  0x3d   : > { %p4534_p9 = pnand %p4532_p1, %p4444_p12  ;;  %p4541_p5 = por %p4540_p3, %p4539_p0 }
  0x3e   : > { %4336 = dma.hbm_to_vmem [thread:$0]  (!%p4760_p11), %s8598_s2, 1024, %s278_s24, [#allocation7], %s4653_s23, %s4653_s23, %s4654_s25  }
  0x3f   : > { %p4535_p13 = pneg %p4534_p9 }
  0x41   : > { %p4542_p10 = pnand %p4541_p5, %p4535_p13 }
  0x43   : > { %4545 = shalt.err (!%p4542_p10)
}
  0x44   : > { %4342 = dma.hbm_to_vmem [thread:$0]  (!%p4760_p11), %s8394_s6, 1024, %s310_s14, [#allocation10], %s4653_s23, %s4653_s23, %s4654_s25  }
  0x45   : > { %s4805_s24 = sadd.s32 1, %s4646_s12   ;;  %s34_s28 = sadd.s32 1, %s4642_s11 }
  0x46   : > { %s31_s20 = ssub.s32 %s4646_s12, %s4805_s24  ;;  %p41_p12 = scmp.ne.s32.totalorder %s4642_s11, %s4638_s10 }
  0x47   : > { %p32_p7 = scmp.eq.s32.totalorder %s31_s20, 0  ;;  %p42_p1 = scmp.eq.s32.totalorder %s4646_s12, 0 }
  0x48   : > { %p4815_p9 = por %p239_p2, %p41_p12  ;;  %p4355_p13 = scmp.lt.s32.totalorder %s4646_s12, 2 }
  0x49   : > { %s4821_s22 = scalar_select %p32_p7, %s4642_s11, %s34_s28  }
  0x4a   : > { %s8599_s29 = scalar_select %p4815_p9, 1, 0 }
  0x4b   : > { %p43_p0 = por %p42_p1, %p41_p12  ;;  %s329_s18 = sand.u32 1, %s4642_s11  }
  0x4c   : > { %s4111_s21 = sshll.u32 %s329_s18, 8  ;;  %s4164_s23 = sshll.u32 %s4646_s12, 12 }
  0x4d   : > { %s4828_s19 = scalar_lea.hbm %s8388_s0, %s4164_s23  ;;  %s333_s20 = scalar_lea.vmem [#allocation3], %s4111_s21 }
  0x4e   : > { %s340_s26 = sshll.u32 %s333_s20, 4  ;;  %p4832_p2 = pnand %p4355_p13, %p43_p0  ;;  %s4830_s26 = int_to_ptr.vmem [resolvable:$true] %s340_s26 }
  0x4f   : > { %s4836_s28 = scalar_lea.sflag [#allocation4], %s329_s18  ;;  %s4546_s1 = scalar_lea.hbm %s4828_s19, 4096 }
  0x50   : > { %p4547_p11 = scmp.ne.s32.totalorder %s4828_s19, %s4546_s1  ;;  %p4548_p3 = pneg %p4832_p2 }
  0x51   : > { %s4551_s21 = scalar_lea.hbm %s8388_s0, 8192  ;;  %p4552_p12 = scmp.lt.s32.totalorder %s4828_s19, %s8388_s0 }
  0x52   : > { %p4549_p5 = pnand %p4548_p3, %p4547_p11  ;;  %p4553_p7 = scmp.lt.s32.totalorder %s4551_s21, %s4546_s1 }
  0x54   : > { %p4550_p10 = pneg %p4549_p5  ;;  %p4554_p1 = por %p4553_p7, %p4552_p12 }
  0x56   : > { %p4555_p13 = pnand %p4554_p1, %p4550_p10 }
  0x58   : > { %4558 = shalt.err (!%p4555_p13)
}
  0x59   : > { %s4559_s18 = scalar_lea.vmem %s4830_s26, 4096  ;;  %s4656_s2 = smov [#allocation3]  }
  0x5a   : > { %p4560_p0 = scmp.ne.s32.totalorder %s4830_s26, %s4559_s18  ;;  %s4564_s3 = sshll.u32 %s4656_s2, 4  ;;  %s4565_s3 = int_to_ptr.vmem [resolvable:$false] %s4564_s3 }
  0x5b   : > { %s4566_s23 = scalar_lea.vmem %s4565_s3, 8192  ;;  %p4567_p5 = scmp.lt.s32.totalorder %s4830_s26, %s4565_s3 }
  0x5c   : > { %p4562_p6 = pnand %p4560_p0, %p4548_p3  ;;  %p4568_p9 = scmp.lt.s32.totalorder %s4566_s23, %s4559_s18 }
  0x5e   : > { %p4563_p11 = pneg %p4562_p6  ;;  %p4569_p4 = por %p4568_p9, %p4567_p5 }
  0x60   : > { %p4570_p8 = pnand %p4569_p4, %p4563_p11 }
  0x62   : > { %4573 = shalt.err (!%p4570_p8)
}
  0x63   : > { %s8601_s1 = smov 8   ;;  %s8602_s25 = smov 128  }
  0x64   : > { %4346 = dma.hbm_to_vmem [thread:$0]  (!%p4832_p2), %s4828_s19, 4096, %s4830_s26, %s4836_s28, %s8602_s25, %s8602_s25, %s8601_s1  }
  0x65   : > { %p8603_p6 = scmp.ne.s32.totalorder %s8594_s17, 0 }
  0x67   : > { %352 = sbr.rel (%p8603_p6) target bundleno = 1423 (0x58f), region = 56 }
  0x6c   : > { %s4863_s2 = sand.u32 1, %s4638_s10   ;;  %p8604_p4 = scmp.ne.s32.totalorder %s8592_s15, 0 }
  0x6d   : > { %s4115_s3 = sshll.u32 %s4863_s2, 8  ;;  %s355_s21 = scalar_lea.sflag [#allocation4], %s4863_s2 }
  0x6e   : > { %s4869_s27 = scalar_lea.vmem [#allocation3], %s4115_s3 }
  0x6f   : > { %4617 = dma.done.wait (%p8604_p4), %s355_s21, 4096  }
  0x70   : > { %4619 = vsyncadd (%p8604_p4), %s355_s21, 4294963200  ;;  %p8605_p8 = scmp.eq.s32.totalorder %s4732_s13, 0 }
  0x72   : > { %4621 = dma.done.wait (%p8605_p8), [#allocation7], 1280   ;;  %p8606_p9 = pmov %p8605_p8 }
  0x73   : > { %p8607_p2 = pmov %p8605_p8 }
  0x74   : > { %4623 = vsyncadd (%p8606_p9), [#allocation7], 4294966016 }
  0x75   : > { %4625 = dma.done.wait (%p8607_p2), [#allocation10], 1280   ;;  %p8608_p3 = pmov %p8607_p2 }
  0x76   : > { %v8404_v0 = vmov 0.0   ;;  %v4404_v1 = vld [vmem:[#allocation8 + $0x38] sm:$0xff]   ;;  %v4405_v2 = vld [vmem:[#allocation8 + $0x30] sm:$0xff]   ;;  %v4406_v3 = vld [vmem:[#allocation8 + $0x28] sm:$0xff]   ;;  %s7982_s23 = scalar_lea.vmem [#allocation12], %s4115_s3  ;;  %s4165_s1 = sshll.u32 %s4732_s13, 12 }
  0x77   : > { %4627 = vsyncadd (%p8608_p3), [#allocation10], 4294966016  ;;  %442 = vst [vmem:[#allocation2] sm:$0xff] %v8404_v0  ;;  %4214 = vmatprep.subr.bf16.mxu0 %v4404_v1  ;;  %v4407_v4 = vld [vmem:[#allocation8 + $0x20] sm:$0xff]   ;;  %v410_v5 = vld [vmem:[%s4869_s27] sm:$0xff]  ;;  %s3993_s25 = sshll.u32 %s7982_s23, 4  ;;  %s8319_s21 = scalar_lea.hbm %s8397_s9, %s4165_s1  ;;  %s8321_s25 = int_to_ptr.vmem [resolvable:$true] %s3993_s25 }
  0x78   : > { %443 = vst [vmem:[#allocation2 + $0x8] sm:$0xff] %v8404_v0  ;;  %444 = vst [vmem:[#allocation2 + $0x10] sm:$0x3] %v8404_v0  ;;  %4215 = vmatpush3.bf16.msra.mxu0 %v4404_v1  ;;  %v411_v6 = vld [vmem:[%s4869_s27 + $0x8] sm:$0xff]  ;;  %v412_v7 = vld [vmem:[%s4869_s27 + $0x10] sm:$0xff]  ;;  %s4574_s15 = scalar_lea.vmem %s8321_s25, 4096 }
  0x79   : > { %445 = vst [vmem:[#allocation2 + $0x18] sm:$0xff] %v8404_v0  ;;  %446 = vst [vmem:[#allocation2 + $0x20] sm:$0xff] %v8404_v0  ;;  %4216 = vmatprep.subr.bf16.mxu0 %v4405_v2  ;;  %v413_v8 = vld [vmem:[%s4869_s27 + $0x18] sm:$0xff]  ;;  %v4941_v9 = vld [vmem:[#allocation6] ss:$0 sm:$0xff]  ;;  %p4575_p10 = scmp.ne.s32.totalorder %s8321_s25, %s4574_s15  ;;  %p8963_p12 = scmp.ne.s32.totalorder %s8599_s29, 0 }
  0x7a   : > { %447 = vst [vmem:[#allocation2 + $0x28] sm:$0x3] %v8404_v0  ;;  %448 = vst [vmem:[#allocation2 + $0x30] sm:$0xff] %v8404_v0  ;;  %v566_v11 = vmul.f32 0.0, %v4941_v9  ;;  %v4944_v13 = vld [vmem:[#allocation6 + $0x1] ss:$0 sm:$0xff] }
  0x7b   : > { %449 = vst [vmem:[#allocation2 + $0x38] sm:$0xff] %v8404_v0  ;;  %450 = vst [vmem:[#allocation2 + $0x40] sm:$0x3] %v8404_v0  ;;  %v4946_v15 = vld [vmem:[#allocation8 + $0x18] sm:$0xff]   ;;  %v4950_v19 = vld [vmem:[#allocation6 + $0x2] ss:$0 sm:$0xff]  ;;  %v4954_v20 = vmul.f32 %v4944_v13, %v410_v5  ;;  %v4957_v21 = vmul.f32 %v4944_v13, %v411_v6  ;;  %v4970_v27 = vmul.f32 %v4944_v13, %v412_v7  ;;  %p4576_p7 = pnand %p4575_p10, %p8963_p12 }
  0x7c   : > { %451 = vst [vmem:[#allocation2 + $0x48] sm:$0xff] %v8404_v0  ;;  %452 = vst [vmem:[#allocation2 + $0x50] sm:$0xff] %v8404_v0  ;;  %4217 = vmatpush3.bf16.msra.mxu0 %v4405_v2  ;;  %v4961_v24 = vld [vmem:[#allocation6 + $0x3] ss:$0 sm:$0xff]  ;;  %v4963_v25 = vld [vmem:[#allocation6 + $0x4] ss:$0 sm:$0xff]  ;;  %v4973_v28 = vmul.f32 %v4944_v13, %v413_v8 }
  0x7d   : > { %453 = vst [vmem:[#allocation2 + $0x58] sm:$0x3] %v8404_v0  ;;  %454 = vst [vmem:[#allocation2 + $0x60] sm:$0xff] %v8404_v0  ;;  %4218 = vmatprep.subr.bf16.mxu0 %v4406_v3  ;;  %v4965_v26 = vld [vmem:[#allocation6 + $0x5] ss:$0 sm:$0xff]  ;;  %v4976_v31 = vmul.f32 %v4963_v25, %v410_v5  ;;  %v4979_v32 = vmul.f32 %v4963_v25, %v411_v6  ;;  %v4999_v40 = vld [vmem:[%s4869_s27 + $0x28] sm:$0xff]  ;;  %v5003_v41 = vmul.f32 %v4963_v25, %v412_v7  ;;  %p4577_p1 = pneg %p4576_p7 }
  0x7e   : > { %455 = vst [vmem:[#allocation2 + $0x68] sm:$0xff] %v8404_v0  ;;  %456 = vst [vmem:[#allocation2 + $0x70] sm:$0x3] %v8404_v0  ;;  %v4981_v33 = vld [vmem:[#allocation6 + $0x6] ss:$0 sm:$0xff]  ;;  %v5006_v42 = vmul.f32 %v4963_v25, %v413_v8  ;;  %v5009_v43 = vld [vmem:[%s4869_s27 + $0x30] sm:$0xff]  ;;  %v5041_v56 = vmul.f32 %v4963_v25, %v4999_v40 }
  0x7f   : > { %457 = vst [vmem:[#allocation2 + $0x78] sm:$0xff] %v8404_v0  ;;  %458 = vst [vmem:[#allocation2 + $0x80] sm:$0xff] %v8404_v0  ;;  %v630_v10 = vld [vmem:[#allocation2 + $0x1] sm:$0xff]  ;;  %v631_v12 = vld [vmem:[#allocation2 + $0x9] sm:$0xff]  ;;  %s4658_s17 = smov [#allocation12]  }
  0x80   : > { %459 = vst [vmem:[#allocation2 + $0x88] sm:$0x3] %v8404_v0  ;;  %460 = vst [vmem:[#allocation2 + $0x90] sm:$0xff] %v8404_v0  ;;  %v731_v14 = vld [vmem:[#allocation2 + $0x2] sm:$0xff]  ;;  %4219 = vmatpush3.bf16.msra.mxu0 %v4406_v3  ;;  %v667_v16 = vmul.f32 %v4944_v13, %v630_v10  ;;  %v668_v17 = vmul.f32 %v4944_v13, %v631_v12  ;;  %v732_v18 = vld [vmem:[#allocation2 + $0xa] sm:$0xff]  ;;  %s4578_s26 = sshll.u32 %s4658_s17, 4  ;;  %s4579_s26 = int_to_ptr.vmem [resolvable:$false] %s4578_s26 }
  0x81   : > { %461 = vst [vmem:[#allocation2 + $0x98] sm:$0xff] %v8404_v0  ;;  %462 = vst [vmem:[#allocation2 + $0xa0] sm:$0x3] %v8404_v0  ;;  %4220 = vmatprep.subr.bf16.mxu0 %v4407_v4  ;;  %v768_v22 = vmul.f32 %v4950_v19, %v731_v14  ;;  %v769_v23 = vmul.f32 %v4950_v19, %v732_v18  ;;  %v4983_v34 = vld [vmem:[#allocation6 + $0x7] ss:$0 sm:$0xff]  ;;  %v5012_v44 = vld [vmem:[%s4869_s27 + $0x38] sm:$0xff]  ;;  %p4581_p13 = scmp.lt.s32.totalorder %s8321_s25, %s4579_s26 }
  0x82   : > { %463 = vst [vmem:[#allocation2 + $0xa8] sm:$0xff] %v8404_v0  ;;  %464 = vst [vmem:[#allocation2 + $0xb0] sm:$0xff] %v8404_v0  ;;  %v699_v29 = vadd.f32 %v667_v16, %v566_v11  ;;  %v700_v30 = vadd.f32 %v668_v17, %v566_v11  ;;  %v4986_v35 = vld [vmem:[%s4869_s27 + $0x20] sm:$0xff]  ;;  %v4991_v37 = vmul.f32 %v4983_v34, %v412_v7  ;;  %v4996_v39 = vld [vmem:[#allocation6 + $0x8] ss:$0 sm:$0xff]  ;;  %s4580_s19 = scalar_lea.vmem %s4579_s26, 8192 }
  0x83   : > { %465 = vst [vmem:[#allocation2 + $0xb8] sm:$0x3] %v8404_v0  ;;  %466 = vst [vmem:[#allocation2 + $0xc0] sm:$0xff] %v8404_v0  ;;  %v4988_v36 = vld [vmem:[#allocation8 + $0x10] sm:$0xff]   ;;  %v4994_v38 = vmul.f32 %v4983_v34, %v413_v8  ;;  %v5017_v47 = vmul.f32 %v4983_v34, %v4986_v35  ;;  %v5021_v48 = vmul.f32 %v4983_v34, %v4999_v40  ;;  %v5029_v50 = vld [vmem:[%s4869_s27 + $0x48] sm:$0xff]  ;;  %p4582_p0 = scmp.lt.s32.totalorder %s4580_s19, %s4574_s15 }
  0x84   : > { %467 = vst [vmem:[#allocation2 + $0xc8] sm:$0xff] %v8404_v0  ;;  %468 = vst [vmem:[#allocation2 + $0xd0] sm:$0x3] %v8404_v0  ;;  %4221 = vmatpush3.bf16.msra.mxu0 %v4407_v4  ;;  %v800_v45 = vadd.f32 %v768_v22, %v699_v29  ;;  %v801_v46 = vadd.f32 %v769_v23, %v700_v30  ;;  %v5026_v49 = vld [vmem:[%s4869_s27 + $0x40] sm:$0xff]  ;;  %v5032_v51 = vld [vmem:[%s4869_s27 + $0x50] sm:$0xff]  ;;  %v5037_v55 = vmul.f32 %v4963_v25, %v4986_v35 }
  0x85   : > { %469 = vst [vmem:[#allocation2 + $0xd8] sm:$0xff] %v8404_v0  ;;  %470 = vst [vmem:[#allocation2 + $0xe0] sm:$0xff] %v8404_v0  ;;  %4222 = vmatprep.subr.bf16.mxu0 %v4946_v15  ;;  %v5045_v57 = vmul.f32 %v4983_v34, %v5009_v43  ;;  %v5049_v58 = vmul.f32 %v4983_v34, %v5012_v44  ;;  %v5063_v3 = vld [vmem:[#allocation8 + $0x8] sm:$0xff]   ;;  %v5101_v18 = vld [vmem:[%s4869_s27 + $0x68] sm:$0xff]  ;;  %p4583_p11 = por %p4582_p0, %p4581_p13 }
  0x86   : > { %471 = vst [vmem:[#allocation2 + $0xe8] sm:$0x3] %v8404_v0  ;;  %472 = vst [vmem:[#allocation2 + $0xf0] sm:$0xff] %v8404_v0  ;;  %v5082_v11 = vld [vmem:[%s4869_s27 + $0x58] sm:$0xff]  ;;  %v5104_v22 = vld [vmem:[%s4869_s27 + $0x70] sm:$0xff] }
  0x87   : > { %473 = vst [vmem:[#allocation2 + $0xf8] sm:$0xff] %v8404_v0  ;;  %474 = vst [vmem:[#allocation2 + $0x100] sm:$0x3] %v8404_v0  ;;  %p4584_p5 = pnand %p4583_p11, %p4577_p1 }
  0x88   : > { %475 = vst [vmem:[#allocation2 + $0x108] sm:$0xff] %v8404_v0  ;;  %476 = vst [vmem:[#allocation2 + $0x110] sm:$0xff] %v8404_v0  ;;  %4223 = vmatpush3.bf16.msra.mxu0 %v4946_v15  ;;  %v5098_v15 = vld [vmem:[%s4869_s27 + $0x60] sm:$0xff] }
  0x89   : > { %477 = vst [vmem:[#allocation2 + $0x118] sm:$0x3] %v8404_v0  ;;  %478 = vst [vmem:[#allocation2 + $0x120] sm:$0xff] %v8404_v0  ;;  %4224 = vmatprep.subr.bf16.mxu0 %v4988_v36 }
  0x8a   : > { %479 = vst [vmem:[#allocation2 + $0x128] sm:$0xff] %v8404_v0  ;;  %480 = vst [vmem:[#allocation2 + $0x130] sm:$0x3] %v8404_v0 }
  0x8b   : > { %481 = vst [vmem:[#allocation2 + $0x138] sm:$0xff] %v8404_v0  ;;  %482 = vst [vmem:[#allocation2 + $0x140] sm:$0xff] %v8404_v0 }
  0x8c   : > { %483 = vst [vmem:[#allocation2 + $0x148] sm:$0x3] %v8404_v0  ;;  %484 = vst [vmem:[#allocation2 + $0x150] sm:$0xff] %v8404_v0  ;;  %4225 = vmatpush3.bf16.msra.mxu0 %v4988_v36 }
  0x8d   : > { %485 = vst [vmem:[#allocation2 + $0x158] sm:$0xff] %v8404_v0  ;;  %486 = vst [vmem:[#allocation2 + $0x160] sm:$0x3] %v8404_v0  ;;  %4226 = vmatprep.subr.bf16.mxu0 %v5063_v3 }
  0x8e   : > { %487 = vst [vmem:[#allocation2 + $0x168] sm:$0xff] %v8404_v0  ;;  %488 = vst [vmem:[#allocation2 + $0x170] sm:$0xff] %v8404_v0 }
  0x8f   : > { %489 = vst [vmem:[#allocation2 + $0x178] sm:$0x3] %v8404_v0  ;;  %490 = vst [vmem:[#allocation2 + $0x180] sm:$0xff] %v8404_v0 }
  0x90   : > { %491 = vst [vmem:[#allocation2 + $0x188] sm:$0xff] %v8404_v0  ;;  %492 = vst [vmem:[#allocation2 + $0x190] sm:$0x3] %v8404_v0  ;;  %4227 = vmatpush3.bf16.msra.mxu0 %v5063_v3 }
  0x91   : > { %493 = vst [vmem:[#allocation2 + $0x198] sm:$0xff] %v8404_v0  ;;  %494 = vst [vmem:[#allocation2 + $0x1a0] sm:$0xff] %v8404_v0 }
  0x92   : > { %495 = vst [vmem:[#allocation2 + $0x1a8] sm:$0x3] %v8404_v0  ;;  %497 = vst [vmem:[#allocation2 + $0x19] sm:$0xff] %v410_v5 }
  0x93   : > { %498 = vst [vmem:[#allocation2 + $0x21] sm:$0xff] %v411_v6  ;;  %499 = vst [vmem:[#allocation2 + $0x31] sm:$0xff] %v412_v7 }
  0x94   : > { %500 = vst [vmem:[#allocation2 + $0x39] sm:$0xff] %v413_v8  ;;  %1951 = vst [vmem:[#allocation2] sm:$0xff] %v8404_v0 }
  0x95   : > { %1952 = vst [vmem:[#allocation2 + $0x8] sm:$0xff] %v8404_v0  ;;  %1953 = vst [vmem:[#allocation2 + $0x10] sm:$0x3] %v8404_v0 }
  0x96   : > { %501 = vst [vmem:[#allocation2 + $0x49] sm:$0xff] %v4986_v35  ;;  %502 = vst [vmem:[#allocation2 + $0x51] sm:$0xff] %v4999_v40 }
  0x97   : > { %503 = vst [vmem:[#allocation2 + $0x61] sm:$0xff] %v5009_v43  ;;  %504 = vst [vmem:[#allocation2 + $0x69] sm:$0xff] %v5012_v44 }
  0x98   : > { %8609 = vst [vmem:[#allocation17_spill] sm:$0xff] %v5029_v50  ;;  %8610 = vst [vmem:[#allocation18_spill] sm:$0xff] %v5032_v51 }
  0x99   : > { %v832_v52 = vld [vmem:[#allocation2 + $0x18] sm:$0xff]  ;;  %505 = vst [vmem:[#allocation2 + $0x79] sm:$0xff] %v5026_v49  ;;  %506 = vst [vmem:[#allocation2 + $0x81] sm:$0xff] %v5029_v50 }
  0x9a   : > { %v833_v53 = vld [vmem:[#allocation2 + $0x20] sm:$0xff]  ;;  %507 = vst [vmem:[#allocation2 + $0x91] sm:$0xff] %v5032_v51  ;;  %v869_v59 = vmul.f32 %v4961_v24, %v832_v52  ;;  %v5057_v63 = vld [vmem:[#allocation2 + $0x30] sm:$0xff]  ;;  %v568_v2 = vmul.f32 %v4941_v9, %v832_v52  ;;  %8611 = vst [vmem:[#allocation19_spill] sm:$0xff] %v5082_v11 }
  0x9b   : > { %v1034_v54 = vld [vmem:[#allocation2 + $0x1a] sm:$0xff]  ;;  %v870_v60 = vmul.f32 %v4961_v24, %v833_v53  ;;  %v1035_v61 = vld [vmem:[#allocation2 + $0x22] sm:$0xff]  ;;  %v5068_v5 = vmul.f32 %v4981_v33, %v5057_v63  ;;  %v5074_v7 = vld [vmem:[#allocation2 + $0x32] sm:$0xff]  ;;  %v569_v10 = vmul.f32 %v4941_v9, %v833_v53  ;;  %508 = vst [vmem:[#allocation2 + $0x99] sm:$0xff] %v5082_v11 }
  0x9c   : > { %v1071_v62 = vmul.f32 %v4965_v26, %v1034_v54  ;;  %v5059_v1 = vld [vmem:[#allocation2 + $0x38] sm:$0xff]  ;;  %1954 = vst [vmem:[#allocation2 + $0x18] sm:$0xff] %v8404_v0  ;;  %v1072_v4 = vmul.f32 %v4965_v26, %v1035_v61  ;;  %1956 = vst [vmem:[#allocation2 + $0x28] sm:$0x3] %v8404_v0  ;;  %v901_v12 = vadd.f32 %v869_v59, %v800_v45  ;;  %v5118_v52 = vld [vmem:[%s4869_s27 + $0x80] sm:$0xff] }
  0x9d   : > { %v5072_v6 = vmul.f32 %v4981_v33, %v5059_v1  ;;  %v5076_v8 = vld [vmem:[#allocation2 + $0x3a] sm:$0xff]  ;;  %1955 = vst [vmem:[#allocation2 + $0x20] sm:$0xff] %v8404_v0  ;;  %v902_v14 = vadd.f32 %v870_v60, %v801_v46  ;;  %v5087_v16 = vmul.f32 %v4996_v39, %v5074_v7  ;;  %1957 = vst [vmem:[#allocation2 + $0x30] sm:$0xff] %v8404_v0  ;;  %v5114_v46 = vld [vmem:[%s4869_s27 + $0x78] sm:$0xff] }
  0x9e   : > { %v5091_v17 = vmul.f32 %v4996_v39, %v5076_v8  ;;  %1958 = vst [vmem:[#allocation2 + $0x38] sm:$0xff] %v8404_v0  ;;  %1959 = vst [vmem:[#allocation2 + $0x40] sm:$0x3] %v8404_v0  ;;  %v701_v23 = vadd.f32 %v4954_v20, %v568_v2  ;;  %v702_v29 = vadd.f32 %v4957_v21, %v569_v10  ;;  %v5121_v53 = vld [vmem:[%s4869_s27 + $0x88] sm:$0xff]  ;;  %v5129_v60 = vld [vmem:[#allocation2 + $0x48] sm:$0xff] }
  0x9f   : > { %8612 = vst [vmem:[#allocation20_spill] sm:$0xff] %v5098_v15  ;;  %8613 = vst [vmem:[#allocation21_spill] sm:$0xff] %v5101_v18  ;;  %v770_v30 = vmul.f32 %v4950_v19, %v1034_v54  ;;  %v771_v45 = vmul.f32 %v4950_v19, %v1035_v61  ;;  %v1002_v20 = vadd.f32 %v4976_v31, %v901_v12  ;;  %v5135_v61 = vld [vmem:[%s4869_s27 + $0x90] sm:$0xff]  ;;  %v5138_v2 = vld [vmem:[%s4869_s27 + $0x98] sm:$0xff] }
  0xa0   : > { %8614 = vst [vmem:[#allocation22_spill] sm:$0xff] %v5104_v22  ;;  %509 = vst [vmem:[#allocation2 + $0xa9] sm:$0xff] %v5098_v15  ;;  %v1003_v21 = vadd.f32 %v4979_v32, %v902_v14  ;;  %v871_v54 = vmul.f32 %v4961_v24, %v5057_v63  ;;  %v872_v59 = vmul.f32 %v4961_v24, %v5059_v1  ;;  %v5140_v31 = vld [vmem:[#allocation8] sm:$0xff]   ;;  %v5146_v0 = vld [vmem:[#allocation2 + $0x50] sm:$0xff] }
  0xa1   : > { %510 = vst [vmem:[#allocation2 + $0xb1] sm:$0xff] %v5101_v18  ;;  %8615 = vst [vmem:[#allocation23_spill] sm:$0xff] %v5114_v46  ;;  %v802_v32 = vadd.f32 %v770_v30, %v701_v23  ;;  %v803_v10 = vadd.f32 %v771_v45, %v702_v29  ;;  %v1073_v12 = vmul.f32 %v4965_v26, %v5074_v7  ;;  %v5167_v18 = vld [vmem:[#allocation2 + $0x62] sm:$0xff]  ;;  %v5198_v50 = vld [vmem:[#allocation2 + $0x90] sm:$0xff]  ;;  %4228 = vmatprep.subr.bf16.mxu0 %v5140_v31 }
  0xa2   : > { %511 = vst [vmem:[#allocation2 + $0xc1] sm:$0xff] %v5104_v22  ;;  %8616 = vst [vmem:[#allocation24_spill] sm:$0xff] %v5118_v52  ;;  %v1074_v14 = vmul.f32 %v4965_v26, %v5076_v8  ;;  %v1103_v23 = vadd.f32 %v1071_v62, %v1002_v20  ;;  %v1104_v29 = vadd.f32 %v1072_v4, %v1003_v21  ;;  %v5165_v22 = vld [vmem:[#allocation2 + $0x68] sm:$0xff]  ;;  %v5185_v15 = vld [vmem:[#allocation2 + $0x80] sm:$0xff]  ;;  %4229 = vmatpush3.bf16.msra.mxu0 %v5140_v31 }
  0xa3   : > { %8617 = vst [vmem:[#allocation25_spill] sm:$0xff] %v5121_v53  ;;  %512 = vst [vmem:[#allocation2 + $0xc9] sm:$0xff] %v5114_v46  ;;  %v5148_v46 = vld [vmem:[#allocation2 + $0x4a] sm:$0xff]  ;;  %v5157_v30 = vmul.f32 %v4981_v33, %v5129_v60  ;;  %v5161_v45 = vmul.f32 %v4981_v33, %v5146_v0  ;;  %v903_v36 = vadd.f32 %v871_v54, %v802_v32  ;;  %v5196_v51 = vld [vmem:[#allocation2 + $0x82] sm:$0xff] }
  0xa4   : > { %513 = vst [vmem:[#allocation2 + $0xd9] sm:$0xff] %v5118_v52  ;;  %514 = vst [vmem:[#allocation2 + $0xe1] sm:$0xff] %v5121_v53  ;;  %v5150_v52 = vld [vmem:[#allocation2 + $0x52] sm:$0xff]  ;;  %v5163_v53 = vld [vmem:[#allocation2 + $0x60] sm:$0xff]  ;;  %v904_v62 = vadd.f32 %v872_v59, %v803_v10  ;;  %v5175_v4 = vmul.f32 %v4996_v39, %v5148_v46  ;;  %v1205_v11 = vadd.f32 %v5068_v5, %v1103_v23 }
  0xa5   : > { %8618 = vst [vmem:[#allocation26_spill] sm:$0xff] %v5135_v61  ;;  %8619 = vst [vmem:[#allocation27_spill] sm:$0xff] %v5138_v2  ;;  %v5179_v20 = vmul.f32 %v4996_v39, %v5150_v52  ;;  %v5181_v21 = vld [vmem:[#allocation2 + $0x6a] sm:$0xff]  ;;  %v1206_v54 = vadd.f32 %v5072_v6, %v1104_v29  ;;  %v570_v59 = vmul.f32 %v4941_v9, %v5057_v63  ;;  %v5194_v10 = vld [vmem:[#allocation2 + $0x7a] sm:$0xff] }
  0xa6   : > { %515 = vst [vmem:[#allocation2 + $0xf1] sm:$0xff] %v5135_v61  ;;  %516 = vst [vmem:[#allocation2 + $0xf9] sm:$0xff] %v5138_v2  ;;  %v8620_v61 = vmov 0.0   ;;  %v5183_v2 = vld [vmem:[#allocation2 + $0x78] sm:$0xff]  ;;  %v571_v32 = vmul.f32 %v4941_v9, %v5059_v1  ;;  %v1004_v5 = vadd.f32 %v5003_v41, %v903_v36  ;;  %v1005_v6 = vadd.f32 %v5006_v42, %v904_v62 }
  0xa7   : > { %1962 = vst [vmem:[#allocation2 + $0x58] sm:$0x3] %v8620_v61  ;;  %1960 = vst [vmem:[#allocation2 + $0x48] sm:$0xff] %v8620_v61  ;;  %v772_v63 = vmul.f32 %v4950_v19, %v5074_v7  ;;  %v773_v1 = vmul.f32 %v4950_v19, %v5076_v8  ;;  %v5208_v23 = vld [vmem:[#allocation2 + $0x98] sm:$0xff]  ;;  %v1306_v41 = vadd.f32 %v4991_v37, %v1205_v11  ;;  %v5222_v36 = vld [vmem:[#allocation2 + $0xa8] sm:$0xff] }
  0xa8   : > { %1961 = vst [vmem:[#allocation2 + $0x50] sm:$0xff] %v8620_v61  ;;  %1963 = vst [vmem:[#allocation2 + $0x60] sm:$0xff] %v8620_v61  ;;  %v5210_v29 = vld [vmem:[#allocation2 + $0x92] sm:$0xff]  ;;  %v1307_v42 = vadd.f32 %v4994_v38, %v1206_v54  ;;  %v703_v7 = vadd.f32 %v4970_v27, %v570_v59  ;;  %v704_v8 = vadd.f32 %v4973_v28, %v571_v32 }
  0xa9   : > { %8621 = vst [vmem:[#allocation28_spill] sm:$0xff] %v5196_v51  ;;  %1965 = vst [vmem:[#allocation2 + $0x70] sm:$0x3] %v8620_v61  ;;  %v5212_v51 = vld [vmem:[#allocation2 + $0x9a] sm:$0xff]  ;;  %v5224_v62 = vld [vmem:[#allocation2 + $0xb0] sm:$0xff]  ;;  %v1105_v37 = vadd.f32 %v1073_v12, %v1004_v5  ;;  %v1106_v38 = vadd.f32 %v1074_v14, %v1005_v6  ;;  %v873_v27 = vmul.f32 %v4961_v24, %v5129_v60 }
  0xaa   : > { %1964 = vst [vmem:[#allocation2 + $0x68] sm:$0xff] %v8620_v61  ;;  %8622 = vst [vmem:[#allocation29_spill] sm:$0xff] %v5212_v51  ;;  %v5226_v51 = vld [vmem:[#allocation2 + $0xaa] sm:$0xff]  ;;  %v874_v28 = vmul.f32 %v4961_v24, %v5146_v0  ;;  %v5236_v3 = vld [vmem:[#allocation2 + $0xb2] sm:$0xff]  ;;  %v1407_v59 = vadd.f32 %v5087_v16, %v1306_v41  ;;  %v1408_v32 = vadd.f32 %v5091_v17, %v1307_v42 }
  0xab   : > { %1966 = vst [vmem:[#allocation2 + $0x78] sm:$0xff] %v8620_v61  ;;  %1967 = vst [vmem:[#allocation2 + $0x80] sm:$0xff] %v8620_v61  ;;  %v5238_v11 = vld [vmem:[#allocation2 + $0xc0] sm:$0xff]  ;;  %v5240_v54 = vld [vmem:[#allocation2 + $0xc8] sm:$0xff]  ;;  %v804_v12 = vadd.f32 %v772_v63, %v703_v7  ;;  %v805_v14 = vadd.f32 %v773_v1, %v704_v8  ;;  %v1075_v16 = vmul.f32 %v4965_v26, %v5148_v46 }
  0xac   : > { %1968 = vst [vmem:[#allocation2 + $0x88] sm:$0x3] %v8620_v61  ;;  %8623 = vst [vmem:[#allocation30_spill] sm:$0xff] %v5226_v51  ;;  %v5245_v5 = vld [vmem:[#allocation2 + $0xc2] sm:$0xff]  ;;  %v5247_v6 = vld [vmem:[#allocation2 + $0xca] sm:$0xff]  ;;  %v1076_v17 = vmul.f32 %v4965_v26, %v5150_v52  ;;  %v1177_v7 = vmul.f32 %v4981_v33, %v5163_v53 }
  0xad   : > { %1969 = vst [vmem:[#allocation2 + $0x90] sm:$0xff] %v8620_v61  ;;  %1970 = vst [vmem:[#allocation2 + $0x98] sm:$0xff] %v8620_v61  ;;  %v5249_v51 = vld [vmem:[#allocation2 + $0xd8] sm:$0xff]  ;;  %v5259_v63 = vld [vmem:[#allocation2 + $0xe0] sm:$0xff]  ;;  %v906_v42 = vadd.f32 %v874_v28, %v805_v14  ;;  %v1178_v28 = vmul.f32 %v4981_v33, %v5165_v22 }
  0xae   : > { %1971 = vst [vmem:[#allocation2 + $0xa0] sm:$0x3] %v8620_v61  ;;  %8624 = vst [vmem:[#allocation31_spill] sm:$0xff] %v5238_v11  ;;  %v1208_v11 = vadd.f32 %v5161_v45, %v1106_v38  ;;  %v5261_v1 = vld [vmem:[#allocation2 + $0xda] sm:$0xff]  ;;  %v5263_v41 = vld [vmem:[#allocation2 + $0xe2] sm:$0xff]  ;;  %v905_v45 = vadd.f32 %v873_v27, %v804_v12 }
  0xaf   : > { %8625 = vst [vmem:[#allocation32_spill] sm:$0xff] %v5240_v54  ;;  %1972 = vst [vmem:[#allocation2 + $0xa8] sm:$0xff] %v8620_v61  ;;  %v1207_v54 = vadd.f32 %v5157_v30, %v1105_v37  ;;  %v1439_v30 = vpack.c.bf16 %v1408_v32, %v1407_v59  ;;  %v5271_v8 = vld [vmem:[#allocation2 + $0xf0] sm:$0xff]  ;;  %v5273_v37 = vld [vmem:[#allocation2 + $0xf8] sm:$0xff]  ;;  %v5286_v59 = vmul.f32 %v4996_v39, %v5167_v18 }
  0xb0   : > { %1973 = vst [vmem:[#allocation2 + $0xb0] sm:$0xff] %v8620_v61  ;;  %1974 = vst [vmem:[#allocation2 + $0xb8] sm:$0x3] %v8620_v61  ;;  %v5275_v38 = vld [vmem:[#allocation2 + $0xf2] sm:$0xff]  ;;  %v1309_v27 = vadd.f32 %v5021_v48, %v1208_v11  ;;  %v5288_v32 = vld [vmem:[#allocation2 + $0xfa] sm:$0xff]  ;;  %v1007_v48 = vadd.f32 %v5041_v56, %v906_v42  ;;  %v5301_v11 = vmul.f32 %v4996_v39, %v5181_v21 }
  0xb1   : > { %1975 = vst [vmem:[#allocation2 + $0xc0] sm:$0xff] %v8620_v61  ;;  %1976 = vst [vmem:[#allocation2 + $0xc8] sm:$0xff] %v8620_v61  ;;  %v1308_v31 = vadd.f32 %v5017_v47, %v1207_v54  ;;  %v5291_v12 = vld [vmem:[%s4869_s27 + $0xa0] sm:$0xff]  ;;  %v5294_v14 = vld [vmem:[%s4869_s27 + $0xa8] sm:$0xff]  ;;  %4230 = vmatprep.mubr.bf16.mxu0 %v1439_v30  ;;  %v1006_v47 = vadd.f32 %v5037_v55, %v905_v45  ;;  %v572_v54 = vmul.f32 %v4941_v9, %v5129_v60 }
  0xb2   : > { %1977 = vst [vmem:[#allocation2 + $0xd0] sm:$0x3] %v8620_v61  ;;  %1978 = vst [vmem:[#allocation2 + $0xd8] sm:$0xff] %v8620_v61  ;;  %v5311_v30 = vld [vmem:[%s4869_s27 + $0xb8] sm:$0xff]  ;;  %v5316_v55 = vld [vmem:[%s4869_s27 + $0xc0] sm:$0xff]  ;;  %v1410_v60 = vadd.f32 %v5179_v20, %v1309_v27  ;;  %v573_v45 = vmul.f32 %v4941_v9, %v5146_v0  ;;  %v673_v42 = vmul.f32 %v4944_v13, %v4986_v35 }
  0xb3   : > { %1979 = vst [vmem:[#allocation2 + $0xe0] sm:$0xff] %v8620_v61  ;;  %1980 = vst [vmem:[#allocation2 + $0xe8] sm:$0x3] %v8620_v61  ;;  %v1409_v56 = vadd.f32 %v5175_v4, %v1308_v31  ;;  %v5331_v4 = vld [vmem:[%s4869_s27 + $0xd0] sm:$0xff]  ;;  %v5334_v20 = vld [vmem:[%s4869_s27 + $0xd8] sm:$0xff]  ;;  %v1107_v31 = vadd.f32 %v1075_v16, %v1006_v47  ;;  %v1108_v0 = vadd.f32 %v1076_v17, %v1007_v48 }
  0xb4   : > { %8626 = vst [vmem:[#allocation33_spill] sm:$0xff] %v5288_v32  ;;  %8627 = vst [vmem:[#allocation34_spill] sm:$0xff] %v5294_v14  ;;  %v5308_v32 = vld [vmem:[%s4869_s27 + $0xb0] sm:$0xff]  ;;  %v674_v27 = vmul.f32 %v4944_v13, %v4999_v40  ;;  %v774_v35 = vmul.f32 %v4950_v19, %v5148_v46  ;;  %v705_v17 = vadd.f32 %v673_v42, %v572_v54  ;;  %v5359_v47 = vld [vmem:[%s4869_s27 + $0xf8] sm:$0xff] }
  0xb5   : > { %1981 = vst [vmem:[#allocation2 + $0xf0] sm:$0xff] %v8620_v61  ;;  %517 = vst [vmem:[#allocation2 + $0x109] sm:$0xff] %v5291_v12  ;;  %v1440_v16 = vpack.c.bf16 %v1410_v60, %v1409_v56  ;;  %v775_v40 = vmul.f32 %v4950_v19, %v5150_v52  ;;  %v875_v46 = vmul.f32 %v4961_v24, %v5163_v53  ;;  %v5362_v48 = vld [vmem:[#allocation2 + $0x199] sm:$0xff]  ;;  %v5367_v52 = vld [vmem:[#allocation2 + $0x1a1] sm:$0xff] }
  0xb6   : > { %518 = vst [vmem:[#allocation2 + $0x111] sm:$0xff] %v5294_v14  ;;  %8628 = vst [vmem:[#allocation35_spill] sm:$0xff] %v5308_v32  ;;  %v5327_v14 = vld [vmem:[%s4869_s27 + $0xc8] sm:$0xff]  ;;  %v706_v56 = vadd.f32 %v674_v27, %v573_v45  ;;  %v876_v54 = vmul.f32 %v4961_v24, %v5165_v22  ;;  %v5371_v42 = vld [vmem:[#allocation2 + $0x1a2] sm:$0xff] }
  0xb7   : > { %8629 = vst [vmem:[#allocation36_spill] sm:$0xff] %v5311_v30  ;;  %1982 = vst [vmem:[#allocation2 + $0xf8] sm:$0xff] %v8620_v61  ;;  %v5369_v60 = vld [vmem:[#allocation2 + $0x19a] sm:$0xff]  ;;  %4231 = vmatmul.mubr.bf16.vlgmr.msra.gmra.mxu0 %v1440_v16  ;;  %v1179_v16 = vmul.f32 %v4981_v33, %v5183_v2 }
  0xb8   : > { %1983 = vst [vmem:[#allocation2 + $0x100] sm:$0x3] %v8620_v61  ;;  %8630 = vst [vmem:[#allocation37_spill] sm:$0xff] %v5316_v55 }
  0xb9   : > { %519 = vst [vmem:[#allocation2 + $0x121] sm:$0xff] %v5308_v32  ;;  %520 = vst [vmem:[#allocation2 + $0x129] sm:$0xff] %v5311_v30  ;;  %v5347_v30 = vld [vmem:[%s4869_s27 + $0xe8] sm:$0xff]  ;;  %v5350_v32 = vld [vmem:[%s4869_s27 + $0xf0] sm:$0xff] }
  0xba   : > { %8631 = vst [vmem:[#allocation38_spill] sm:$0xff] %v5327_v14  ;;  %521 = vst [vmem:[#allocation2 + $0x139] sm:$0xff] %v5316_v55  ;;  %v5344_v55 = vld [vmem:[%s4869_s27 + $0xe0] sm:$0xff] }
  0xbb   : > { %8632 = vst [vmem:[#allocation39_spill] sm:$0xff] %v5331_v4  ;;  %8633 = vst [vmem:[#allocation40_spill] sm:$0xff] %v5334_v20 }
  0xbc   : > { %522 = vst [vmem:[#allocation2 + $0x141] sm:$0xff] %v5327_v14  ;;  %523 = vst [vmem:[#allocation2 + $0x151] sm:$0xff] %v5331_v4  ;;  %v1210_v4 = vadd.f32 %v1178_v28, %v1108_v0  ;;  %v1077_v0 = vmul.f32 %v4965_v26, %v5167_v18 }
  0xbd   : > { %524 = vst [vmem:[#allocation2 + $0x159] sm:$0xff] %v5334_v20  ;;  %8634 = vst [vmem:[#allocation41_spill] sm:$0xff] %v5344_v55  ;;  %v1209_v20 = vadd.f32 %v1177_v7, %v1107_v31  ;;  %v977_v7 = vmul.f32 %v4963_v25, %v5012_v44  ;;  %v807_v31 = vadd.f32 %v775_v40, %v706_v56  ;;  %v5400_v40 = vld [vmem:[#allocation2 + $0x112] sm:$0xff] }
  0xbe   : > { %8635 = vst [vmem:[#allocation42_spill] sm:$0xff] %v5347_v30  ;;  %8636 = vst [vmem:[#allocation43_spill] sm:$0xff] %v5350_v32  ;;  %v1311_v45 = vadd.f32 %v5049_v58, %v1210_v4 }
  0xbf   : > { %525 = vst [vmem:[#allocation2 + $0x169] sm:$0xff] %v5344_v55  ;;  %526 = vst [vmem:[#allocation2 + $0x171] sm:$0xff] %v5347_v30  ;;  %v806_v30 = vadd.f32 %v774_v35, %v705_v17  ;;  %v1310_v28 = vadd.f32 %v5045_v57, %v1209_v20  ;;  %v1078_v35 = vmul.f32 %v4965_v26, %v5181_v21  ;;  %v5394_v57 = vld [vmem:[#allocation2 + $0x10a] sm:$0xff] }
  0xc0   : > { %8637 = vst [vmem:[#allocation44_spill] sm:$0xff] %v5359_v47  ;;  %527 = vst [vmem:[#allocation2 + $0x181] sm:$0xff] %v5350_v32  ;;  %v976_v32 = vmul.f32 %v4963_v25, %v5009_v43  ;;  %v1180_v17 = vmul.f32 %v4981_v33, %v5185_v15  ;;  %v1412_v4 = vadd.f32 %v5301_v11, %v1311_v45  ;;  %v5404_v56 = vld [vmem:[#allocation2 + $0x128] sm:$0xff] }
  0xc1   : > { %8638 = vst [vmem:[#allocation45_spill] sm:$0xff] %v5362_v48  ;;  %528 = vst [vmem:[#allocation2 + $0x189] sm:$0xff] %v5359_v47  ;;  %v907_v27 = vadd.f32 %v875_v46, %v806_v30  ;;  %v1411_v58 = vadd.f32 %v5286_v59, %v1310_v28  ;;  %v908_v30 = vadd.f32 %v876_v54, %v807_v31  ;;  %v5402_v46 = vld [vmem:[#allocation2 + $0x120] sm:$0xff]  ;;  %v8642_v48 = vld [vmem:[#allocation17_spill] sm:$0xff] }
  0xc2   : > { %8639 = vst [vmem:[#allocation46_spill] sm:$0xff] %v5367_v52  ;;  %8640 = vst [vmem:[#allocation47_spill] sm:$0xff] %v5369_v60  ;;  %v5392_v60 = vld [vmem:[#allocation2 + $0x110] sm:$0xff]  ;;  %v1280_v20 = vmul.f32 %v4983_v34, %v5026_v49  ;;  %v5409_v47 = vmul.f32 %v4983_v34, %v8642_v48  ;;  %v5413_v59 = vmul.f32 %v4996_v39, %v5194_v10  ;;  %v5417_v54 = vld [vmem:[#allocation2 + $0x122] sm:$0xff] }
  0xc3   : > { %8641 = vst [vmem:[#allocation48_spill] sm:$0xff] %v5371_v42  ;;  %2002 = vst [vmem:[#allocation2 + $0x198] sm:$0xff] %v8620_v61  ;;  %v5390_v42 = vld [vmem:[#allocation2 + $0x108] sm:$0xff]  ;;  %v1008_v52 = vadd.f32 %v976_v32, %v907_v27  ;;  %v574_v11 = vmul.f32 %v4941_v9, %v5163_v53  ;;  %v5421_v45 = vld [vmem:[#allocation2 + $0x138] sm:$0xff]  ;;  %v1441_v32 = vpack.c.bf16 %v1412_v4, %v1411_v58 }
  0xc4   : > { %2003 = vst [vmem:[#allocation2 + $0x1a0] sm:$0xff] %v8620_v61  ;;  %2004 = vst [vmem:[#allocation2 + $0x1a8] sm:$0x3] %v8620_v61  ;;  %v5419_v28 = vld [vmem:[#allocation2 + $0x12a] sm:$0xff]  ;;  %v1009_v31 = vadd.f32 %v977_v7, %v908_v30  ;;  %v575_v27 = vmul.f32 %v4941_v9, %v5165_v22  ;;  %v675_v55 = vmul.f32 %v4944_v13, %v5009_v43  ;;  %v5429_v14 = vld [vmem:[#allocation2 + $0x140] sm:$0xff] }
  0xc5   : > { %1984 = vst [vmem:[#allocation2 + $0x108] sm:$0xff] %v8620_v61  ;;  %8643 = vst [vmem:[#allocation17_spill] sm:$0xff] %v5417_v54  ;;  %v5431_v53 = vld [vmem:[#allocation2 + $0x13a] sm:$0xff]  ;;  %v5433_v54 = vld [vmem:[#allocation2 + $0x142] sm:$0xff]  ;;  %v1109_v58 = vadd.f32 %v1077_v0, %v1008_v52  ;;  %v676_v7 = vmul.f32 %v4944_v13, %v5012_v44  ;;  %v776_v22 = vmul.f32 %v4950_v19, %v5167_v18  ;;  %4234 = vmatprep.mubr.bf16.mxu0 %v1441_v32 }
  0xc6   : > { %8644 = vst [vmem:[#allocation49_spill] sm:$0xff] %v5421_v45  ;;  %1985 = vst [vmem:[#allocation2 + $0x110] sm:$0xff] %v8620_v61  ;;  %v777_v43 = vmul.f32 %v4950_v19, %v5181_v21  ;;  %v5444_v4 = vld [vmem:[#allocation2 + $0x150] sm:$0xff]  ;;  %v5446_v30 = vld [vmem:[#allocation2 + $0x158] sm:$0xff]  ;;  %v1110_v44 = vadd.f32 %v1078_v35, %v1009_v31  ;;  %v707_v0 = vadd.f32 %v675_v55, %v574_v11 }
  0xc7   : > { %1986 = vst [vmem:[#allocation2 + $0x118] sm:$0x3] %v8620_v61  ;;  %8645 = vst [vmem:[#allocation50_spill] sm:$0xff] %v5429_v14  ;;  %v8651_v52 = vld [vmem:[#allocation28_spill] sm:$0xff]  ;;  %v877_v21 = vmul.f32 %v4961_v24, %v5183_v2  ;;  %v708_v14 = vadd.f32 %v676_v7, %v575_v27  ;;  %v878_v35 = vmul.f32 %v4961_v24, %v5185_v15  ;;  %v5470_v11 = vld [vmem:[#allocation2 + $0x172] sm:$0xff] }
  0xc8   : > { %8646 = vst [vmem:[#allocation51_spill] sm:$0xff] %v5431_v53  ;;  %8647 = vst [vmem:[#allocation52_spill] sm:$0xff] %v5433_v54  ;;  %v5448_v54 = vld [vmem:[#allocation2 + $0x152] sm:$0xff]  ;;  %v1382_v18 = vmul.f32 %v4996_v39, %v8651_v52  ;;  %v1211_v53 = vadd.f32 %v1179_v16, %v1109_v58  ;;  %v978_v32 = vmul.f32 %v4963_v25, %v5026_v49  ;;  %v5468_v55 = vld [vmem:[#allocation2 + $0x16a] sm:$0xff] }
  0xc9   : > { %1987 = vst [vmem:[#allocation2 + $0x120] sm:$0xff] %v8620_v61  ;;  %1988 = vst [vmem:[#allocation2 + $0x128] sm:$0xff] %v8620_v61  ;;  %v5472_v31 = vld [vmem:[#allocation2 + $0x180] sm:$0xff]  ;;  %v979_v16 = vmul.f32 %v4963_v25, %v8642_v48  ;;  %v1079_v27 = vmul.f32 %v4965_v26, %v5194_v10  ;;  %v5480_v58 = vld [vmem:[#allocation2 + $0x188] sm:$0xff] }
  0xca   : > { %1989 = vst [vmem:[#allocation2 + $0x130] sm:$0x3] %v8620_v61  ;;  %8648 = vst [vmem:[#allocation53_spill] sm:$0xff] %v5444_v4  ;;  %v5457_v4 = vld [vmem:[#allocation2 + $0x15a] sm:$0xff]  ;;  %v5482_v7 = vld [vmem:[#allocation2 + $0x182] sm:$0xff] }
  0xcb   : > { %8649 = vst [vmem:[#allocation54_spill] sm:$0xff] %v5446_v30  ;;  %8650 = vst [vmem:[#allocation55_spill] sm:$0xff] %v5448_v54  ;;  %v5459_v30 = vld [vmem:[#allocation2 + $0x168] sm:$0xff]  ;;  %v5461_v54 = vld [vmem:[#allocation2 + $0x170] sm:$0xff] }
  0xcc   : > { %1990 = vst [vmem:[#allocation2 + $0x138] sm:$0xff] %v8620_v61  ;;  %1991 = vst [vmem:[#allocation2 + $0x140] sm:$0xff] %v8620_v61 }
  0xcd   : > { %1992 = vst [vmem:[#allocation2 + $0x148] sm:$0x3] %v8620_v61  ;;  %8652 = vst [vmem:[#allocation28_spill] sm:$0xff] %v5457_v4  ;;  %v1383_v4 = vmul.f32 %v4996_v39, %v5210_v29 }
  0xce   : > { %8653 = vst [vmem:[#allocation56_spill] sm:$0xff] %v5459_v30  ;;  %8654 = vst [vmem:[#allocation57_spill] sm:$0xff] %v5461_v54  ;;  %v1212_v54 = vadd.f32 %v1180_v17, %v1110_v44  ;;  %v808_v30 = vadd.f32 %v776_v22, %v707_v0  ;;  %v1312_v17 = vadd.f32 %v1280_v20, %v1211_v53  ;;  %v8661_v20 = vld [vmem:[#allocation18_spill] sm:$0xff] }
  0xcf   : > { %1993 = vst [vmem:[#allocation2 + $0x150] sm:$0xff] %v8620_v61  ;;  %8655 = vst [vmem:[#allocation58_spill] sm:$0xff] %v5468_v55  ;;  %v5484_v55 = vld [vmem:[#allocation2 + $0x18a] sm:$0xff]  ;;  %v809_v22 = vadd.f32 %v777_v43, %v708_v14  ;;  %v1080_v44 = vmul.f32 %v4965_v26, %v8651_v52  ;;  %v1181_v0 = vmul.f32 %v4981_v33, %v5198_v50 }
  0xd0   : > { %8656 = vst [vmem:[#allocation59_spill] sm:$0xff] %v5470_v11  ;;  %8657 = vst [vmem:[#allocation60_spill] sm:$0xff] %v5472_v31  ;;  %v1282_v14 = vmul.f32 %v4983_v34, %v8661_v20  ;;  %v1413_v53 = vadd.f32 %v5413_v59, %v1312_v17  ;;  %v8662_v31 = vld [vmem:[#allocation19_spill] sm:$0xff]  ;;  %v678_v59 = vmul.f32 %v4944_v13, %v8642_v48  ;;  %v8663_v48 = vld [vmem:[#allocation29_spill] sm:$0xff] }
  0xd1   : > { %1994 = vst [vmem:[#allocation2 + $0x158] sm:$0xff] %v8620_v61  ;;  %1995 = vst [vmem:[#allocation2 + $0x160] sm:$0x3] %v8620_v61  ;;  %v910_v43 = vadd.f32 %v878_v35, %v809_v22  ;;  %v1283_v11 = vmul.f32 %v4983_v34, %v8662_v31  ;;  %v778_v35 = vmul.f32 %v4950_v19, %v5194_v10 }
  0xd2   : > { %8658 = vst [vmem:[#allocation61_spill] sm:$0xff] %v5480_v58  ;;  %8659 = vst [vmem:[#allocation62_spill] sm:$0xff] %v5482_v7  ;;  %v909_v7 = vadd.f32 %v877_v21, %v808_v30  ;;  %v1182_v58 = vmul.f32 %v4981_v33, %v5208_v23  ;;  %v677_v21 = vmul.f32 %v4944_v13, %v5026_v49 }
  0xd3   : > { %8660 = vst [vmem:[#allocation63_spill] sm:$0xff] %v5484_v55  ;;  %1996 = vst [vmem:[#allocation2 + $0x168] sm:$0xff] %v8620_v61  ;;  %v1313_v55 = vadd.f32 %v5409_v47, %v1212_v54  ;;  %v576_v47 = vmul.f32 %v4941_v9, %v5183_v2  ;;  %v577_v54 = vmul.f32 %v4941_v9, %v5185_v15 }
  0xd4   : > { %1997 = vst [vmem:[#allocation2 + $0x170] sm:$0xff] %v8620_v61  ;;  %1998 = vst [vmem:[#allocation2 + $0x178] sm:$0x3] %v8620_v61  ;;  %v1011_v30 = vadd.f32 %v979_v16, %v910_v43  ;;  %v879_v2 = vmul.f32 %v4961_v24, %v5198_v50  ;;  %v880_v49 = vmul.f32 %v4961_v24, %v5208_v23 }
  0xd5   : > { %2001 = vst [vmem:[#allocation2 + $0x190] sm:$0x3] %v8620_v61  ;;  %1999 = vst [vmem:[#allocation2 + $0x180] sm:$0xff] %v8620_v61  ;;  %v1414_v45 = vadd.f32 %v1382_v18, %v1313_v55  ;;  %v779_v18 = vmul.f32 %v4950_v19, %v8651_v52  ;;  %v709_v15 = vadd.f32 %v677_v21, %v576_v47 }
  0xd6   : > { %2000 = vst [vmem:[#allocation2 + $0x188] sm:$0xff] %v8620_v61  ;;  %v1010_v61 = vadd.f32 %v978_v32, %v909_v7  ;;  %v1112_v32 = vadd.f32 %v1080_v44, %v1011_v30  ;;  %v710_v55 = vadd.f32 %v678_v59, %v577_v54  ;;  %v1384_v7 = vmul.f32 %v4996_v39, %v8663_v48  ;;  %v8664_v59 = vld [vmem:[#allocation20_spill] sm:$0xff] }
  0xd7   : > { %v1442_v17 = vpack.c.bf16 %v1414_v45, %v1413_v53  ;;  %v980_v10 = vmul.f32 %v4963_v25, %v8661_v20  ;;  %v981_v45 = vmul.f32 %v4963_v25, %v8662_v31  ;;  %v1081_v44 = vmul.f32 %v4965_v26, %v5210_v29 }
  0xd8   : > { %v1111_v22 = vadd.f32 %v1079_v27, %v1010_v61  ;;  %v1214_v52 = vadd.f32 %v1182_v58, %v1112_v32  ;;  %v810_v27 = vadd.f32 %v778_v35, %v709_v15  ;;  %v811_v53 = vadd.f32 %v779_v18, %v710_v55 }
  0xd9   : > { %4235 = vmatmul.mubr.bf16.gmra.mxu0 %v1442_v17  ;;  %v1082_v61 = vmul.f32 %v4965_v26, %v8663_v48  ;;  %v1184_v47 = vmul.f32 %v4981_v33, %v5224_v62  ;;  %v1284_v58 = vmul.f32 %v4983_v34, %v8664_v59  ;;  %v8665_v17 = vld [vmem:[#allocation21_spill] sm:$0xff]  ;;  %v578_v32 = vmul.f32 %v4941_v9, %v5198_v50 }
  0xda   : > { %v1213_v16 = vadd.f32 %v1181_v0, %v1111_v22  ;;  %v1183_v0 = vmul.f32 %v4981_v33, %v5222_v36  ;;  %v1315_v54 = vadd.f32 %v1283_v11, %v1214_v52  ;;  %v911_v30 = vadd.f32 %v879_v2, %v810_v27 }
  0xdb   : > { %v912_v21 = vadd.f32 %v880_v49, %v811_v53  ;;  %v1285_v22 = vmul.f32 %v4983_v34, %v8665_v17  ;;  %v579_v11 = vmul.f32 %v4941_v9, %v5208_v23  ;;  %v679_v2 = vmul.f32 %v4944_v13, %v8661_v20 }
  0xdc   : > { %v1314_v43 = vadd.f32 %v1282_v14, %v1213_v16  ;;  %v8666_v14 = vld [vmem:[#allocation30_spill] sm:$0xff]  ;;  %v1416_v15 = vadd.f32 %v1384_v7, %v1315_v54  ;;  %v1012_v55 = vadd.f32 %v980_v10, %v911_v30  ;;  %v780_v49 = vmul.f32 %v4950_v19, %v5210_v29 }
  0xdd   : > { %v1385_v18 = vmul.f32 %v4996_v39, %v8666_v14  ;;  %v1013_v16 = vadd.f32 %v981_v45, %v912_v21  ;;  %v781_v52 = vmul.f32 %v4950_v19, %v8663_v48  ;;  %v1386_v10 = vmul.f32 %v4996_v39, %v5236_v3 }
  0xde   : > { %v1415_v35 = vadd.f32 %v1383_v4, %v1314_v43  ;;  %v680_v4 = vmul.f32 %v4944_v13, %v8662_v31  ;;  %v1113_v50 = vadd.f32 %v1081_v44, %v1012_v55  ;;  %v711_v45 = vadd.f32 %v679_v2, %v578_v32  ;;  %v8667_v32 = vld [vmem:[#allocation31_spill] sm:$0xff] }
  0xdf   : > { %v1114_v7 = vadd.f32 %v1082_v61, %v1013_v16  ;;  %v881_v20 = vmul.f32 %v4961_v24, %v5222_v36  ;;  %v882_v31 = vmul.f32 %v4961_v24, %v5224_v62  ;;  %v982_v48 = vmul.f32 %v4963_v25, %v8664_v59 }
  0xe0   : > { %v1443_v27 = vpack.c.bf16 %v1416_v15, %v1415_v35  ;;  %v712_v23 = vadd.f32 %v680_v4, %v579_v11  ;;  %v1215_v53 = vadd.f32 %v1183_v0, %v1113_v50  ;;  %v983_v44 = vmul.f32 %v4963_v25, %v8665_v17  ;;  %v8669_v11 = vld [vmem:[#allocation22_spill] sm:$0xff]  ;;  %v8670_v4 = vld [vmem:[#allocation23_spill] sm:$0xff] }
  0xe1   : > { %v1216_v29 = vadd.f32 %v1184_v47, %v1114_v7  ;;  %v812_v43 = vadd.f32 %v780_v49, %v711_v45  ;;  %v1083_v54 = vmul.f32 %v4965_v26, %v8666_v14  ;;  %v1084_v30 = vmul.f32 %v4965_v26, %v5236_v3  ;;  %v8668_v47 = vld [vmem:[#allocation32_spill] sm:$0xff] }
  0xe2   : > { %4238 = vmatprep.mubr.bf16.mxu0 %v1443_v27  ;;  %v813_v61 = vadd.f32 %v781_v52, %v712_v23  ;;  %v1316_v21 = vadd.f32 %v1284_v58, %v1215_v53  ;;  %v1185_v0 = vmul.f32 %v4981_v33, %v8667_v32  ;;  %v1186_v15 = vmul.f32 %v4981_v33, %v8668_v47 }
  0xe3   : > { %v1317_v35 = vadd.f32 %v1285_v22, %v1216_v29  ;;  %v913_v55 = vadd.f32 %v881_v20, %v812_v43  ;;  %v1286_v2 = vmul.f32 %v4983_v34, %v8669_v11  ;;  %v1287_v49 = vmul.f32 %v4983_v34, %v8670_v4 }
  0xe4   : > { %v914_v16 = vadd.f32 %v882_v31, %v813_v61  ;;  %v1417_v52 = vadd.f32 %v1385_v18, %v1316_v21  ;;  %v1387_v58 = vmul.f32 %v4996_v39, %v5245_v5  ;;  %v580_v22 = vmul.f32 %v4941_v9, %v5222_v36 }
  0xe5   : > { %v1418_v27 = vadd.f32 %v1386_v10, %v1317_v35  ;;  %v1014_v50 = vadd.f32 %v982_v48, %v913_v55  ;;  %v581_v45 = vmul.f32 %v4941_v9, %v5224_v62  ;;  %v681_v23 = vmul.f32 %v4944_v13, %v8664_v59 }
  0xe6   : > { %v1015_v7 = vadd.f32 %v983_v44, %v914_v16  ;;  %v682_v31 = vmul.f32 %v4944_v13, %v8665_v17  ;;  %v782_v18 = vmul.f32 %v4950_v19, %v8666_v14  ;;  %v783_v10 = vmul.f32 %v4950_v19, %v5236_v3 }
  0xe7   : > { %v1444_v20 = vpack.c.bf16 %v1418_v27, %v1417_v52  ;;  %v1115_v53 = vadd.f32 %v1083_v54, %v1014_v50  ;;  %v713_v29 = vadd.f32 %v681_v23, %v580_v22  ;;  %v883_v48 = vmul.f32 %v4961_v24, %v8667_v32  ;;  %v8671_v27 = vld [vmem:[#allocation24_spill] sm:$0xff]  ;;  %v8672_v50 = vld [vmem:[#allocation25_spill] sm:$0xff] }
  0xe8   : > { %v1116_v36 = vadd.f32 %v1084_v30, %v1015_v7  ;;  %v1388_v62 = vmul.f32 %v4996_v39, %v5247_v6  ;;  %v714_v59 = vadd.f32 %v682_v31, %v581_v45  ;;  %v884_v17 = vmul.f32 %v4961_v24, %v8668_v47 }
  0xe9   : > { %4239 = vmatmul.mubr.bf16.gmra.mxu0 %v1444_v20  ;;  %v984_v14 = vmul.f32 %v4963_v25, %v8669_v11  ;;  %v1217_v44 = vadd.f32 %v1185_v0, %v1115_v53  ;;  %v814_v3 = vadd.f32 %v782_v18, %v713_v29  ;;  %v985_v61 = vmul.f32 %v4963_v25, %v8670_v4 }
  0xea   : > { %v1218_v43 = vadd.f32 %v1186_v15, %v1116_v36  ;;  %v815_v54 = vadd.f32 %v783_v10, %v714_v59  ;;  %v1085_v30 = vmul.f32 %v4965_v26, %v5245_v5  ;;  %v1086_v21 = vmul.f32 %v4965_v26, %v5247_v6 }
  0xeb   : > { %v1187_v35 = vmul.f32 %v4981_v33, %v5249_v51  ;;  %v1318_v55 = vadd.f32 %v1286_v2, %v1217_v44  ;;  %v915_v52 = vadd.f32 %v883_v48, %v814_v3  ;;  %v1188_v0 = vmul.f32 %v4981_v33, %v5259_v63 }
  0xec   : > { %v1319_v16 = vadd.f32 %v1287_v49, %v1218_v43  ;;  %v916_v15 = vadd.f32 %v884_v17, %v815_v54  ;;  %v1288_v22 = vmul.f32 %v4983_v34, %v8671_v27  ;;  %v1289_v7 = vmul.f32 %v4983_v34, %v8672_v50 }
  0xed   : > { %v1389_v45 = vmul.f32 %v4996_v39, %v5261_v1  ;;  %v1419_v23 = vadd.f32 %v1387_v58, %v1318_v55  ;;  %v1016_v31 = vadd.f32 %v984_v14, %v915_v52  ;;  %v582_v2 = vmul.f32 %v4941_v9, %v8667_v32  ;;  %v8674_v55 = vld [vmem:[#allocation27_spill] sm:$0xff] }
  0xee   : > { %v1420_v20 = vadd.f32 %v1388_v62, %v1319_v16  ;;  %v1017_v49 = vadd.f32 %v985_v61, %v916_v15  ;;  %v583_v18 = vmul.f32 %v4941_v9, %v8668_v47  ;;  %v683_v10 = vmul.f32 %v4944_v13, %v8669_v11 }
  0xef   : > { %v684_v53 = vmul.f32 %v4944_v13, %v8670_v4  ;;  %v1117_v29 = vadd.f32 %v1085_v30, %v1016_v31  ;;  %v784_v58 = vmul.f32 %v4950_v19, %v5245_v5  ;;  %v785_v48 = vmul.f32 %v4950_v19, %v5247_v6 }
  0xf0   : > { %v1445_v36 = vpack.c.bf16 %v1420_v20, %v1419_v23  ;;  %v1118_v62 = vadd.f32 %v1086_v21, %v1017_v49  ;;  %v715_v32 = vadd.f32 %v683_v10, %v582_v2  ;;  %v885_v9 = vmul.f32 %v4961_v24, %v5249_v51  ;;  %v5668_v10 = vld [vmem:[#allocation6 + $0x3] ss:$0 sm:$0xff] }
  0xf1   : > { %v716_v59 = vadd.f32 %v684_v53, %v583_v18  ;;  %v1219_v47 = vadd.f32 %v1187_v35, %v1117_v29  ;;  %v1390_v11 = vmul.f32 %v4996_v39, %v5263_v41  ;;  %v886_v13 = vmul.f32 %v4961_v24, %v5259_v63  ;;  %v8673_v35 = vld [vmem:[#allocation26_spill] sm:$0xff]  ;;  %v8675_v29 = vld [vmem:[#allocation33_spill] sm:$0xff] }
  0xf2   : > { %4242 = vmatprep.mubr.bf16.mxu0 %v1445_v36  ;;  %v986_v5 = vmul.f32 %v4963_v25, %v8671_v27  ;;  %v1220_v4 = vadd.f32 %v1188_v0, %v1118_v62  ;;  %v816_v17 = vadd.f32 %v784_v58, %v715_v32  ;;  %v987_v6 = vmul.f32 %v4963_v25, %v8672_v50 }
  0xf3   : > { %v817_v19 = vadd.f32 %v785_v48, %v716_v59  ;;  %v1320_v14 = vadd.f32 %v1288_v22, %v1219_v47  ;;  %v1087_v44 = vmul.f32 %v4965_v26, %v5261_v1  ;;  %v1088_v43 = vmul.f32 %v4965_v26, %v5263_v41  ;;  %v5650_v22 = vld [vmem:[#allocation6] ss:$0 sm:$0xff]  ;;  %v5678_v48 = vld [vmem:[#allocation6 + $0x4] ss:$0 sm:$0xff] }
  0xf4   : > { %v1189_v3 = vmul.f32 %v4981_v33, %v5271_v8  ;;  %v1321_v24 = vadd.f32 %v1289_v7, %v1220_v4  ;;  %v917_v61 = vadd.f32 %v885_v9, %v816_v17  ;;  %v1190_v30 = vmul.f32 %v4981_v33, %v5273_v37  ;;  %v5684_v9 = vld [vmem:[#allocation6 + $0x5] ss:$0 sm:$0xff]  ;;  %v5690_v4 = vld [vmem:[#allocation6 + $0x6] ss:$0 sm:$0xff] }
  0xf5   : > { %v918_v54 = vadd.f32 %v886_v13, %v817_v19  ;;  %v1421_v21 = vadd.f32 %v1389_v45, %v1320_v14  ;;  %v1290_v25 = vmul.f32 %v4983_v34, %v8673_v35  ;;  %v1291_v16 = vmul.f32 %v4983_v34, %v8674_v55  ;;  %v5656_v45 = vld [vmem:[#allocation6 + $0x1] ss:$0 sm:$0xff] }
  0xf6   : > { %v1391_v52 = vmul.f32 %v4996_v39, %v5275_v38  ;;  %v1422_v26 = vadd.f32 %v1390_v11, %v1321_v24  ;;  %v1018_v0 = vadd.f32 %v986_v5, %v917_v61  ;;  %v584_v7 = vmul.f32 %v5650_v22, %v5249_v51  ;;  %v5662_v39 = vld [vmem:[#allocation6 + $0x2] ss:$0 sm:$0xff]  ;;  %v8676_v61 = vld [vmem:[#allocation34_spill] sm:$0xff] }
  0xf7   : > { %v1019_v15 = vadd.f32 %v987_v6, %v918_v54  ;;  %v585_v33 = vmul.f32 %v5650_v22, %v5259_v63  ;;  %v685_v23 = vmul.f32 %v5656_v45, %v8671_v27  ;;  %v686_v34 = vmul.f32 %v5656_v45, %v8672_v50 }
  0xf8   : > { %v786_v20 = vmul.f32 %v5662_v39, %v5261_v1  ;;  %v1446_v31 = vpack.c.bf16 %v1422_v26, %v1421_v21  ;;  %v1119_v2 = vadd.f32 %v1087_v44, %v1018_v0  ;;  %v787_v51 = vmul.f32 %v5662_v39, %v5263_v41  ;;  %v5674_v1 = vld [vmem:[#allocation6 + $0x8] ss:$0 sm:$0xff]  ;;  %v5696_v44 = vld [vmem:[#allocation6 + $0x7] ss:$0 sm:$0xff] }
  0xf9   : > { %v1120_v49 = vadd.f32 %v1088_v43, %v1019_v15  ;;  %v717_v63 = vadd.f32 %v685_v23, %v584_v7  ;;  %v718_v18 = vadd.f32 %v686_v34, %v585_v33  ;;  %v887_v27 = vmul.f32 %v5668_v10, %v5271_v8 }
  0xfa   : > { %v888_v50 = vmul.f32 %v5668_v10, %v5273_v37  ;;  %4243 = vmatmul.mubr.bf16.gmra.mxu0 %v1446_v31  ;;  %v1221_v53 = vadd.f32 %v1189_v3, %v1119_v2  ;;  %v1392_v58 = vmul.f32 %v5674_v1, %v8675_v29  ;;  %v988_v41 = vmul.f32 %v5678_v48, %v8673_v35 }
  0xfb   : > { %v1222_v36 = vadd.f32 %v1190_v30, %v1120_v49  ;;  %v818_v62 = vadd.f32 %v786_v20, %v717_v63  ;;  %v819_v32 = vadd.f32 %v787_v51, %v718_v18  ;;  %v989_v59 = vmul.f32 %v5678_v48, %v8674_v55 }
  0xfc   : > { %v1089_v47 = vmul.f32 %v5684_v9, %v5275_v38  ;;  %v1322_v11 = vadd.f32 %v1290_v25, %v1221_v53  ;;  %v1090_v5 = vmul.f32 %v5684_v9, %v8675_v29  ;;  %v1191_v17 = vmul.f32 %v5690_v4, %v5390_v42 }
  0xfd   : > { %v1323_v13 = vadd.f32 %v1291_v16, %v1222_v36  ;;  %v919_v19 = vadd.f32 %v887_v27, %v818_v62  ;;  %v920_v6 = vadd.f32 %v888_v50, %v819_v32  ;;  %v1192_v14 = vmul.f32 %v5690_v4, %v5392_v60  ;;  %v8677_v62 = vld [vmem:[#allocation35_spill] sm:$0xff] }
  0xfe   : > { %v1292_v43 = vmul.f32 %v5696_v44, %v5291_v12  ;;  %v1423_v3 = vadd.f32 %v1391_v52, %v1322_v11  ;;  %v1293_v54 = vmul.f32 %v5696_v44, %v8676_v61  ;;  %v1393_v30 = vmul.f32 %v5674_v1, %v5394_v57 }
  0xff   : > { %v1424_v24 = vadd.f32 %v1392_v58, %v1323_v13  ;;  %v1020_v21 = vadd.f32 %v988_v41, %v919_v19  ;;  %v1021_v25 = vadd.f32 %v989_v59, %v920_v6  ;;  %v586_v16 = vmul.f32 %v5650_v22, %v5271_v8  ;;  %v8678_v59 = vld [vmem:[#allocation36_spill] sm:$0xff] }
 0x100   : > { %v587_v26 = vmul.f32 %v5650_v22, %v5273_v37  ;;  %v687_v15 = vmul.f32 %v5656_v45, %v8673_v35  ;;  %v688_v52 = vmul.f32 %v5656_v45, %v8674_v55  ;;  %v788_v7 = vmul.f32 %v5662_v39, %v5275_v38 }
 0x101   : > { %v1447_v0 = vpack.c.bf16 %v1424_v24, %v1423_v3  ;;  %v1121_v33 = vadd.f32 %v1089_v47, %v1020_v21  ;;  %v1122_v23 = vadd.f32 %v1090_v5, %v1021_v25  ;;  %v1394_v34 = vmul.f32 %v5674_v1, %v5400_v40  ;;  %v8679_v5 = vld [vmem:[#allocation17_spill] sm:$0xff] }
 0x102   : > { %v789_v8 = vmul.f32 %v5662_v39, %v8675_v29  ;;  %v719_v37 = vadd.f32 %v687_v15, %v586_v16  ;;  %v720_v20 = vadd.f32 %v688_v52, %v587_v26  ;;  %v889_v35 = vmul.f32 %v5668_v10, %v5390_v42 }
 0x103   : > { %4246 = vmatprep.mubr.bf16.mxu0 %v1447_v0  ;;  %v890_v55 = vmul.f32 %v5668_v10, %v5392_v60  ;;  %v1223_v31 = vadd.f32 %v1191_v17, %v1121_v33  ;;  %v1224_v2 = vadd.f32 %v1192_v14, %v1122_v23  ;;  %v990_v38 = vmul.f32 %v5678_v48, %v5291_v12 }
 0x104   : > { %v991_v49 = vmul.f32 %v5678_v48, %v8676_v61  ;;  %v820_v51 = vadd.f32 %v788_v7, %v719_v37  ;;  %v821_v63 = vadd.f32 %v789_v8, %v720_v20  ;;  %v1091_v18 = vmul.f32 %v5684_v9, %v5394_v57 }
 0x105   : > { %v1092_v27 = vmul.f32 %v5684_v9, %v5400_v40  ;;  %v1324_v50 = vadd.f32 %v1292_v43, %v1223_v31  ;;  %v1325_v53 = vadd.f32 %v1293_v54, %v1224_v2  ;;  %v1193_v36 = vmul.f32 %v5690_v4, %v5402_v46 }
 0x106   : > { %v1194_v29 = vmul.f32 %v5690_v4, %v5404_v56  ;;  %v921_v58 = vadd.f32 %v889_v35, %v820_v51  ;;  %v922_v41 = vadd.f32 %v890_v55, %v821_v63  ;;  %v1294_v32 = vmul.f32 %v5696_v44, %v8677_v62  ;;  %v8681_v55 = vld [vmem:[#allocation50_spill] sm:$0xff] }
 0x107   : > { %v1295_v47 = vmul.f32 %v5696_v44, %v8678_v59  ;;  %v1425_v11 = vadd.f32 %v1393_v30, %v1324_v50  ;;  %v1426_v13 = vadd.f32 %v1394_v34, %v1325_v53  ;;  %v1395_v17 = vmul.f32 %v5674_v1, %v8679_v5  ;;  %v8680_v34 = vld [vmem:[#allocation49_spill] sm:$0xff]  ;;  %v8683_v51 = vld [vmem:[#allocation38_spill] sm:$0xff] }
 0x108   : > { %v588_v19 = vmul.f32 %v5650_v22, %v5390_v42  ;;  %v1022_v6 = vadd.f32 %v990_v38, %v921_v58  ;;  %v1023_v14 = vadd.f32 %v991_v49, %v922_v41  ;;  %v589_v43 = vmul.f32 %v5650_v22, %v5392_v60  ;;  %v8682_v38 = vld [vmem:[#allocation37_spill] sm:$0xff] }
 0x109   : > { %v689_v3 = vmul.f32 %v5656_v45, %v5291_v12  ;;  %v1448_v24 = vpack.c.bf16 %v1426_v13, %v1425_v11  ;;  %v690_v54 = vmul.f32 %v5656_v45, %v8676_v61  ;;  %v790_v30 = vmul.f32 %v5662_v39, %v5394_v57 }
 0x10a   : > { %v791_v21 = vmul.f32 %v5662_v39, %v5400_v40  ;;  %v1123_v25 = vadd.f32 %v1091_v18, %v1022_v6  ;;  %v1124_v42 = vadd.f32 %v1092_v27, %v1023_v14  ;;  %v891_v26 = vmul.f32 %v5668_v10, %v5402_v46  ;;  %v8684_v18 = vld [vmem:[#allocation51_spill] sm:$0xff] }
 0x10b   : > { %v721_v16 = vadd.f32 %v689_v3, %v588_v19  ;;  %4247 = vmatmul.mubr.bf16.gmra.mxu0 %v1448_v24  ;;  %v1396_v12 = vmul.f32 %v5674_v1, %v5419_v28  ;;  %v722_v60 = vadd.f32 %v690_v54, %v589_v43  ;;  %v892_v61 = vmul.f32 %v5668_v10, %v5404_v56 }
 0x10c   : > { %v992_v57 = vmul.f32 %v5678_v48, %v8677_v62  ;;  %v1225_v0 = vadd.f32 %v1193_v36, %v1123_v25  ;;  %v1226_v15 = vadd.f32 %v1194_v29, %v1124_v42  ;;  %v993_v52 = vmul.f32 %v5678_v48, %v8678_v59 }
 0x10d   : > { %v822_v40 = vadd.f32 %v790_v30, %v721_v16  ;;  %v823_v7 = vadd.f32 %v791_v21, %v722_v60  ;;  %v1093_v33 = vmul.f32 %v5684_v9, %v8679_v5  ;;  %v1094_v23 = vmul.f32 %v5684_v9, %v5419_v28  ;;  %v8686_v60 = vld [vmem:[#allocation53_spill] sm:$0xff] }
 0x10e   : > { %v1195_v8 = vmul.f32 %v5690_v4, %v8680_v34  ;;  %v1326_v37 = vadd.f32 %v1294_v32, %v1225_v0  ;;  %v1327_v20 = vadd.f32 %v1295_v47, %v1226_v15  ;;  %v1196_v31 = vmul.f32 %v5690_v4, %v8681_v55  ;;  %v8687_v0 = vld [vmem:[#allocation54_spill] sm:$0xff] }
 0x10f   : > { %v923_v35 = vadd.f32 %v891_v26, %v822_v40  ;;  %v924_v2 = vadd.f32 %v892_v61, %v823_v7  ;;  %v1296_v49 = vmul.f32 %v5696_v44, %v8682_v38  ;;  %v1297_v63 = vmul.f32 %v5696_v44, %v8683_v51  ;;  %v8688_v40 = vld [vmem:[#allocation39_spill] sm:$0xff]  ;;  %v8689_v7 = vld [vmem:[#allocation40_spill] sm:$0xff] }
 0x110   : > { %v1397_v27 = vmul.f32 %v5674_v1, %v8684_v18  ;;  %v1427_v50 = vadd.f32 %v1395_v17, %v1326_v37  ;;  %v1428_v53 = vadd.f32 %v1396_v12, %v1327_v20  ;;  %v590_v29 = vmul.f32 %v5650_v22, %v5402_v46 }
 0x111   : > { %v1024_v36 = vadd.f32 %v992_v57, %v923_v35  ;;  %v1025_v58 = vadd.f32 %v993_v52, %v924_v2  ;;  %v591_v41 = vmul.f32 %v5650_v22, %v5404_v56  ;;  %v691_v32 = vmul.f32 %v5656_v45, %v8677_v62  ;;  %v8685_v62 = vld [vmem:[#allocation52_spill] sm:$0xff] }
 0x112   : > { %v692_v47 = vmul.f32 %v5656_v45, %v8678_v59  ;;  %v1449_v11 = vpack.c.bf16 %v1428_v53, %v1427_v50  ;;  %v792_v17 = vmul.f32 %v5662_v39, %v8679_v5  ;;  %v793_v19 = vmul.f32 %v5662_v39, %v5419_v28 }
 0x113   : > { %v1125_v13 = vadd.f32 %v1093_v33, %v1024_v36  ;;  %v1126_v6 = vadd.f32 %v1094_v23, %v1025_v58  ;;  %v723_v46 = vadd.f32 %v691_v32, %v590_v29  ;;  %v893_v56 = vmul.f32 %v5668_v10, %v8680_v34  ;;  %v8690_v58 = vld [vmem:[#allocation55_spill] sm:$0xff] }
 0x114   : > { %v724_v14 = vadd.f32 %v692_v47, %v591_v41  ;;  %4250 = vmatprep.mubr.bf16.mxu0 %v1449_v11  ;;  %v1398_v3 = vmul.f32 %v5674_v1, %v8685_v62  ;;  %v894_v59 = vmul.f32 %v5668_v10, %v8681_v55  ;;  %v994_v5 = vmul.f32 %v5678_v48, %v8682_v38  ;;  %v8691_v41 = vld [vmem:[#allocation28_spill] sm:$0xff] }
 0x115   : > { %v1227_v43 = vadd.f32 %v1195_v8, %v1125_v13  ;;  %v1228_v24 = vadd.f32 %v1196_v31, %v1126_v6  ;;  %v824_v54 = vadd.f32 %v792_v17, %v723_v46  ;;  %v995_v30 = vmul.f32 %v5678_v48, %v8683_v51 }
 0x116   : > { %v825_v28 = vadd.f32 %v793_v19, %v724_v14  ;;  %v1095_v25 = vmul.f32 %v5684_v9, %v8684_v18  ;;  %v1096_v42 = vmul.f32 %v5684_v9, %v8685_v62  ;;  %v1197_v61 = vmul.f32 %v5690_v4, %v8686_v60 }
 0x117   : > { %v1328_v21 = vadd.f32 %v1296_v49, %v1227_v43  ;;  %v1329_v16 = vadd.f32 %v1297_v63, %v1228_v24  ;;  %v925_v26 = vadd.f32 %v893_v56, %v824_v54  ;;  %v1198_v15 = vmul.f32 %v5690_v4, %v8687_v0 }
 0x118   : > { %v926_v12 = vadd.f32 %v894_v59, %v825_v28  ;;  %v1298_v52 = vmul.f32 %v5696_v44, %v8688_v40  ;;  %v1299_v33 = vmul.f32 %v5696_v44, %v8689_v7  ;;  %v592_v20 = vmul.f32 %v5650_v22, %v8680_v34  ;;  %v8693_v59 = vld [vmem:[#allocation57_spill] sm:$0xff] }
 0x119   : > { %v1429_v57 = vadd.f32 %v1397_v27, %v1328_v21  ;;  %v1430_v23 = vadd.f32 %v1398_v3, %v1329_v16  ;;  %v1026_v8 = vadd.f32 %v994_v5, %v925_v26  ;;  %v593_v35 = vmul.f32 %v5650_v22, %v8681_v55  ;;  %v8694_v28 = vld [vmem:[#allocation41_spill] sm:$0xff]  ;;  %v8695_v21 = vld [vmem:[#allocation42_spill] sm:$0xff] }
 0x11a   : > { %v1027_v37 = vadd.f32 %v995_v30, %v926_v12  ;;  %v693_v31 = vmul.f32 %v5656_v45, %v8682_v38  ;;  %v694_v2 = vmul.f32 %v5656_v45, %v8683_v51  ;;  %v794_v49 = vmul.f32 %v5662_v39, %v8684_v18 }
 0x11b   : > { %v1450_v63 = vpack.c.bf16 %v1430_v23, %v1429_v57  ;;  %v1127_v27 = vadd.f32 %v1095_v25, %v1026_v8  ;;  %v795_v53 = vmul.f32 %v5662_v39, %v8685_v62  ;;  %v895_v55 = vmul.f32 %v5668_v10, %v8686_v60  ;;  %v8692_v62 = vld [vmem:[#allocation56_spill] sm:$0xff]  ;;  %v8696_v8 = vld [vmem:[#allocation58_spill] sm:$0xff] }
 0x11c   : > { %v1128_v50 = vadd.f32 %v1096_v42, %v1027_v37  ;;  %v725_v36 = vadd.f32 %v693_v31, %v592_v20  ;;  %v726_v34 = vadd.f32 %v694_v2, %v593_v35  ;;  %v896_v38 = vmul.f32 %v5668_v10, %v8687_v0  ;;  %v8697_v2 = vld [vmem:[#allocation59_spill] sm:$0xff] }
 0x11d   : > { %4251 = vmatmul.mubr.bf16.gmra.mxu0 %v1450_v63  ;;  %v1229_v29 = vadd.f32 %v1197_v61, %v1127_v27  ;;  %v1399_v18 = vmul.f32 %v5674_v1, %v8690_v58  ;;  %v1400_v32 = vmul.f32 %v5674_v1, %v8691_v41  ;;  %v996_v13 = vmul.f32 %v5678_v48, %v8688_v40 }
 0x11e   : > { %v1230_v51 = vadd.f32 %v1198_v15, %v1128_v50  ;;  %v826_v47 = vadd.f32 %v794_v49, %v725_v36  ;;  %v827_v11 = vadd.f32 %v795_v53, %v726_v34  ;;  %v997_v17 = vmul.f32 %v5678_v48, %v8689_v7 }
 0x11f   : > { %v1330_v19 = vadd.f32 %v1298_v52, %v1229_v29  ;;  %v1097_v46 = vmul.f32 %v5684_v9, %v8690_v58  ;;  %v1098_v14 = vmul.f32 %v5684_v9, %v8691_v41  ;;  %v1199_v3 = vmul.f32 %v5690_v4, %v8692_v62  ;;  %v8698_v29 = vld [vmem:[#allocation60_spill] sm:$0xff] }
 0x120   : > { %v1331_v6 = vadd.f32 %v1299_v33, %v1230_v51  ;;  %v927_v56 = vadd.f32 %v895_v55, %v826_v47  ;;  %v928_v43 = vadd.f32 %v896_v38, %v827_v11  ;;  %v1200_v5 = vmul.f32 %v5690_v4, %v8693_v59  ;;  %v8700_v47 = vld [vmem:[#allocation43_spill] sm:$0xff] }
 0x121   : > { %v1431_v24 = vadd.f32 %v1399_v18, %v1330_v19  ;;  %v1300_v30 = vmul.f32 %v5696_v44, %v8694_v28  ;;  %v1301_v25 = vmul.f32 %v5696_v44, %v8695_v21  ;;  %v594_v26 = vmul.f32 %v5650_v22, %v8686_v60  ;;  %v8701_v19 = vld [vmem:[#allocation44_spill] sm:$0xff] }
 0x122   : > { %v1432_v54 = vadd.f32 %v1400_v32, %v1331_v6  ;;  %v1028_v42 = vadd.f32 %v996_v13, %v927_v56  ;;  %v1029_v16 = vadd.f32 %v997_v17, %v928_v43  ;;  %v595_v12 = vmul.f32 %v5650_v22, %v8687_v0 }
 0x123   : > { %v695_v57 = vmul.f32 %v5656_v45, %v8688_v40  ;;  %v696_v15 = vmul.f32 %v5656_v45, %v8689_v7  ;;  %v796_v52 = vmul.f32 %v5662_v39, %v8690_v58  ;;  %v1401_v37 = vmul.f32 %v5674_v1, %v8696_v8 }
 0x124   : > { %v1451_v61 = vpack.c.bf16 %v1432_v54, %v1431_v24  ;;  %v1129_v33 = vadd.f32 %v1097_v46, %v1028_v42  ;;  %v1130_v23 = vadd.f32 %v1098_v14, %v1029_v16  ;;  %v797_v60 = vmul.f32 %v5662_v39, %v8691_v41  ;;  %v8699_v41 = vld [vmem:[#allocation61_spill] sm:$0xff] }
 0x125   : > { %v727_v0 = vadd.f32 %v695_v57, %v594_v26  ;;  %v728_v20 = vadd.f32 %v696_v15, %v595_v12  ;;  %v897_v40 = vmul.f32 %v5668_v10, %v8692_v62  ;;  %v898_v7 = vmul.f32 %v5668_v10, %v8693_v59 }
 0x126   : > { %4254 = vmatprep.mubr.bf16.mxu0 %v1451_v61  ;;  %v1231_v35 = vadd.f32 %v1199_v3, %v1129_v33  ;;  %v1232_v31 = vadd.f32 %v1200_v5, %v1130_v23  ;;  %v1402_v49 = vmul.f32 %v5674_v1, %v8697_v2  ;;  %v998_v63 = vmul.f32 %v5678_v48, %v8694_v28 }
 0x127   : > { %v828_v27 = vadd.f32 %v796_v52, %v727_v0  ;;  %v829_v50 = vadd.f32 %v797_v60, %v728_v20  ;;  %v999_v53 = vmul.f32 %v5678_v48, %v8695_v21  ;;  %v1099_v36 = vmul.f32 %v5684_v9, %v8696_v8 }
 0x128   : > { %v1332_v34 = vadd.f32 %v1300_v30, %v1231_v35  ;;  %v1333_v55 = vadd.f32 %v1301_v25, %v1232_v31  ;;  %v1100_v38 = vmul.f32 %v5684_v9, %v8697_v2  ;;  %v1201_v51 = vmul.f32 %v5690_v4, %v8698_v29 }
 0x129   : > { %v929_v58 = vadd.f32 %v897_v40, %v828_v27  ;;  %v930_v18 = vadd.f32 %v898_v7, %v829_v50  ;;  %v1202_v32 = vmul.f32 %v5690_v4, %v8699_v41  ;;  %v1302_v11 = vmul.f32 %v5696_v44, %v8700_v47  ;;  %v4435_v7 = vld [vmem:[#allocation2] sm:$0xff]  ;;  %v8705_v50 = vld [vmem:[#allocation46_spill] sm:$0xff] }
 0x12a   : > { %v1433_v13 = vadd.f32 %v1401_v37, %v1332_v34  ;;  %v1434_v17 = vadd.f32 %v1402_v49, %v1333_v55  ;;  %v1303_v6 = vmul.f32 %v5696_v44, %v8701_v19  ;;  %v596_v46 = vmul.f32 %v5650_v22, %v8692_v62  ;;  %v8706_v34 = vld [vmem:[#allocation47_spill] sm:$0xff] }
 0x12b   : > { %v1030_v14 = vadd.f32 %v998_v63, %v929_v58  ;;  %v1031_v56 = vadd.f32 %v999_v53, %v930_v18  ;;  %v597_v43 = vmul.f32 %v5650_v22, %v8693_v59  ;;  %v697_v3 = vmul.f32 %v5656_v45, %v8694_v28  ;;  %v8702_v22 = vld [vmem:[#allocation62_spill] sm:$0xff]  ;;  %v8703_v28 = vld [vmem:[#allocation63_spill] sm:$0xff] }
 0x12c   : > { %v1452_v5 = vpack.c.bf16 %v1434_v17, %v1433_v13  ;;  %v698_v24 = vmul.f32 %v5656_v45, %v8695_v21  ;;  %v798_v54 = vmul.f32 %v5662_v39, %v8696_v8  ;;  %v799_v30 = vmul.f32 %v5662_v39, %v8697_v2 }
 0x12d   : > { %v1131_v25 = vadd.f32 %v1099_v36, %v1030_v14  ;;  %v1132_v62 = vadd.f32 %v1100_v38, %v1031_v56  ;;  %v729_v42 = vadd.f32 %v697_v3, %v596_v46  ;;  %v899_v16 = vmul.f32 %v5668_v10, %v8698_v29  ;;  %v8707_v38 = vld [vmem:[#allocation48_spill] sm:$0xff] }
 0x12e   : > { %4255 = vmatmul.mubr.bf16.gmra.mxu0 %v1452_v5  ;;  %v1403_v59 = vmul.f32 %v5674_v1, %v8702_v22  ;;  %v1404_v26 = vmul.f32 %v5674_v1, %v8703_v28  ;;  %v730_v45 = vadd.f32 %v698_v24, %v597_v43  ;;  %v900_v21 = vmul.f32 %v5668_v10, %v8699_v41 }
 0x12f   : > { %v1233_v12 = vadd.f32 %v1201_v51, %v1131_v25  ;;  %v1234_v61 = vadd.f32 %v1202_v32, %v1132_v62  ;;  %v830_v39 = vadd.f32 %v798_v54, %v729_v42  ;;  %v1000_v57 = vmul.f32 %v5678_v48, %v8700_v47 }
 0x130   : > { %v831_v15 = vadd.f32 %v799_v30, %v730_v45  ;;  %v1001_v52 = vmul.f32 %v5678_v48, %v8701_v19  ;;  %v1101_v37 = vmul.f32 %v5684_v9, %v8702_v22  ;;  %v1102_v10 = vmul.f32 %v5684_v9, %v8703_v28  ;;  %v8704_v48 = vld [vmem:[#allocation45_spill] sm:$0xff] }
 0x131   : > { %v1334_v33 = vadd.f32 %v1302_v11, %v1233_v12  ;;  %v1335_v23 = vadd.f32 %v1303_v6, %v1234_v61  ;;  %v931_v8 = vadd.f32 %v899_v16, %v830_v39  ;;  %v1203_v35 = vmul.f32 %v4435_v7, %v5690_v4 }
 0x132   : > { %v932_v60 = vadd.f32 %v900_v21, %v831_v15  ;;  %v1304_v63 = vmul.f32 %v5696_v44, %v8704_v48  ;;  %v1305_v53 = vmul.f32 %v5696_v44, %v8705_v50  ;;  %v1405_v9 = vmul.f32 %v5674_v1, %v8706_v34 }
 0x133   : > { %v1435_v0 = vadd.f32 %v1403_v59, %v1334_v33  ;;  %v1436_v20 = vadd.f32 %v1404_v26, %v1335_v23  ;;  %v1032_v40 = vadd.f32 %v1000_v57, %v931_v8  ;;  %v1406_v29 = vmul.f32 %v5674_v1, %v8707_v38 }
 0x134   : > { %v1033_v31 = vadd.f32 %v1001_v52, %v932_v60 }
 0x135   : > { %v1453_v2 = vpack.c.bf16 %v1436_v20, %v1435_v0  ;;  %v1133_v49 = vadd.f32 %v1101_v37, %v1032_v40 }
 0x136   : > { %v1134_v27 = vadd.f32 %v1102_v10, %v1033_v31 }
 0x137   : > { %4258 = vmatprep.mubr.bf16.mxu0 %v1453_v2  ;;  %v1235_v36 = vadd.f32 %v1203_v35, %v1133_v49 }
 0x138   : > { %v1236_v55 = vadd.f32 %v1203_v35, %v1134_v27 }
 0x139   : > { %v1336_v4 = vadd.f32 %v1304_v63, %v1235_v36 }
 0x13a   : > { %v1337_v51 = vadd.f32 %v1305_v53, %v1236_v55 }
 0x13b   : > { %v1437_v58 = vadd.f32 %v1405_v9, %v1336_v4 }
 0x13c   : > { %v1438_v18 = vadd.f32 %v1406_v29, %v1337_v51 }
 0x13e   : > { %v1454_v41 = vpack.c.bf16 %v1438_v18, %v1437_v58 }
 0x140   : > { %4259 = vmatmul.mubr.bf16.gmra.mxu0 %v1454_v41 }
 0x177   : > { %v5919_v32 = vpop.f32.mrf.mxu0 }
 0x179   : > { %v5921_v47 = vpop.f32.mrf.mxu0 }
 0x17b   : > { %v5923_v44 = vpop.f32.mrf.mxu0 }
 0x17d   : > { %v5925_v11 = vpop.f32.mrf.mxu0 }
 0x17e   : > { %v1680_v13 = vadd.f32 %v5925_v11, %v5921_v47 }
 0x180   : > { %v1681_v1 = vadd.f32 %v5919_v32, %v1680_v13 }
 0x182   : > { %v1682_v6 = vadd.f32 %v5923_v44, %v1681_v1 }
 0x199   : > { %v5929_v17 = vpop.f32.mrf.mxu0 }
 0x19b   : > { %v5932_v19 = vpop.f32.mrf.mxu0 }
 0x19c   : > { %v1683_v14 = vadd.f32 %v1682_v6, %v5932_v19 }
 0x19d   : > { %v5935_v46 = vpop.f32.mrf.mxu0 }
 0x19f   : > { %v5938_v56 = vpop.f32.mrf.mxu0 }
 0x1a0   : > { %v1684_v43 = vadd.f32 %v1683_v14, %v5938_v56 }
 0x1a2   : > { %v1685_v5 = vadd.f32 %v5929_v17, %v1684_v43 }
 0x1a4   : > { %v1686_v54 = vadd.f32 %v5935_v46, %v1685_v5 }
 0x1a9   : > { %v5941_v3 = vpop.f32.mrf.mxu0 }
 0x1ab   : > { %v5944_v24 = vpop.f32.mrf.mxu0 }
 0x1ac   : > { %v1687_v25 = vadd.f32 %v1686_v54, %v5944_v24 }
 0x1ad   : > { %v5947_v30 = vpop.f32.mrf.mxu0 }
 0x1af   : > { %v5950_v62 = vpop.f32.mrf.mxu0 }
 0x1b0   : > { %v1688_v42 = vadd.f32 %v1687_v25, %v5950_v62 }
 0x1b2   : > { %v1689_v22 = vadd.f32 %v5941_v3, %v1688_v42 }
 0x1b4   : > { %v1690_v28 = vadd.f32 %v5947_v30, %v1689_v22 }
 0x1ba   : > { %v5953_v16 = vpop.f32.mrf.mxu0 }
 0x1bc   : > { %v5956_v59 = vpop.f32.mrf.mxu0 }
 0x1bd   : > { %v1691_v45 = vadd.f32 %v1690_v28, %v5956_v59 }
 0x1be   : > { %v5959_v26 = vpop.f32.mrf.mxu0 }
 0x1c0   : > { %v5962_v21 = vpop.f32.mrf.mxu0 }
 0x1c1   : > { %v1692_v12 = vadd.f32 %v1691_v45, %v5962_v21 }
 0x1c3   : > { %v1693_v61 = vadd.f32 %v5953_v16, %v1692_v12 }
 0x1c5   : > { %v1694_v15 = vadd.f32 %v5959_v26, %v1693_v61 }
 0x1cb   : > { %v5966_v39 = vpop.f32.mrf.mxu0 }
 0x1cd   : > { %v5968_v57 = vpop.f32.mrf.mxu0 }
 0x1ce   : > { %v1695_v33 = vadd.f32 %v1694_v15, %v5968_v57 }
 0x1cf   : > { %v5971_v52 = vpop.f32.mrf.mxu0 }
 0x1d1   : > { %v5974_v23 = vpop.f32.mrf.mxu0 }
 0x1d2   : > { %v1696_v8 = vadd.f32 %v1695_v33, %v5974_v23 }
 0x1d4   : > { %v1697_v37 = vadd.f32 %v5966_v39, %v1696_v8 }
 0x1d6   : > { %v1698_v0 = vadd.f32 %v5971_v52, %v1697_v37 }
 0x1dd   : > { %v5978_v60 = vpop.f32.mrf.mxu0 }
 0x1df   : > { %v5980_v10 = vpop.f32.mrf.mxu0 }
 0x1e0   : > { %v1699_v40 = vadd.f32 %v1698_v0, %v5980_v10 }
 0x1e1   : > { %v5983_v20 = vpop.f32.mrf.mxu0 }
 0x1e3   : > { %v5986_v7 = vpop.f32.mrf.mxu0 }
 0x1e4   : > { %v1700_v35 = vadd.f32 %v1699_v40, %v5986_v7 }
 0x1e6   : > { %v1701_v31 = vadd.f32 %v5978_v60, %v1700_v35 }
 0x1e8   : > { %v1702_v49 = vadd.f32 %v5983_v20, %v1701_v31 }
 0x1ee   : > { %v5990_v2 = vpop.f32.mrf.mxu0 }
 0x1f0   : > { %v5993_v48 = vpop.f32.mrf.mxu0 }
 0x1f1   : > { %v1703_v27 = vadd.f32 %v1702_v49, %v5993_v48 }
 0x1f2   : > { %v5995_v63 = vpop.f32.mrf.mxu0 }
 0x1f4   : > { %v5998_v50 = vpop.f32.mrf.mxu0 }
 0x1f5   : > { %v1704_v53 = vadd.f32 %v1703_v27, %v5998_v50 }
 0x1f7   : > { %v1705_v36 = vadd.f32 %v5990_v2, %v1704_v53 }
 0x1f9   : > { %v1706_v34 = vadd.f32 %v5995_v63, %v1705_v36 }
 0x200   : > { %v6003_v9 = vpop.f32.mrf.mxu0 }
 0x202   : > { %v6005_v55 = vpop.f32.mrf.mxu0 }
 0x203   : > { %v1707_v38 = vadd.f32 %v1706_v34, %v6005_v55 }
 0x204   : > { %v6008_v29 = vpop.f32.mrf.mxu0 }
 0x206   : > { %v6010_v4 = vpop.f32.mrf.mxu0 }
 0x207   : > { %v1708_v51 = vadd.f32 %v1707_v38, %v6010_v4 }
 0x209   : > { %v1709_v58 = vadd.f32 %v6003_v9, %v1708_v51 }
 0x20b   : > { %v1710_v18 = vadd.f32 %v6008_v29, %v1709_v58 }
 0x20d   : > { %v1711_v41 = vrot.slane %v1710_v18, 4 }
 0x20f   : > { %v1712_v13 = vadd.f32 %v1711_v41, %v1710_v18 }
 0x211   : > { %v1713_v1 = vrot.slane %v1712_v13, 2 }
 0x213   : > { %v1714_v6 = vadd.f32 %v1713_v1, %v1712_v13 }
 0x215   : > { %v1715_v14 = vrot.slane %v1714_v6, 1 }
 0x217   : > { %v1716_v43 = vadd.f32 %v1715_v14, %v1714_v6  ;;  %v4412_v6 = vld [vmem:[#allocation11 + $0x38] sm:$0xff]   ;;  %v4413_v14 = vld [vmem:[#allocation11 + $0x30] sm:$0xff]  }
 0x218   : > { %4262 = vmatprep.subr.bf16.mxu1 %v4412_v6 }
 0x219   : > { %v6015_v5 = vmul.f32 0.00390625, %v1716_v43  ;;  %4263 = vmatpush3.bf16.msra.mxu1 %v4412_v6 }
 0x21a   : > { %4264 = vmatprep.subr.bf16.mxu1 %v4413_v14 }
 0x21b   : > { %v6019_v54 = vsub.f32 %v5921_v47, %v6015_v5  ;;  %v6023_v25 = vsub.f32 %v5925_v11, %v6015_v5  ;;  %v6027_v42 = vsub.f32 %v5919_v32, %v6015_v5  ;;  %v6035_v45 = vsub.f32 %v5923_v44, %v6015_v5 }
 0x21c   : > { %v6039_v47 = vsub.f32 %v5932_v19, %v6015_v5  ;;  %v6045_v32 = vsub.f32 %v5938_v56, %v6015_v5  ;;  %v6051_v44 = vsub.f32 %v5929_v17, %v6015_v5  ;;  %v6057_v8 = vsub.f32 %v5935_v46, %v6015_v5 }
 0x21d   : > { %v1751_v22 = vmul.f32 %v6019_v54, %v6019_v54  ;;  %v1752_v28 = vmul.f32 %v6023_v25, %v6023_v25  ;;  %v1753_v11 = vmul.f32 %v6027_v42, %v6027_v42  ;;  %v1754_v61 = vmul.f32 %v6035_v45, %v6035_v45  ;;  %4265 = vmatpush3.bf16.msra.mxu1 %v4413_v14 }
 0x21e   : > { %v1755_v19 = vmul.f32 %v6039_v47, %v6039_v47  ;;  %v1756_v56 = vmul.f32 %v6045_v32, %v6045_v32  ;;  %v6063_v0 = vsub.f32 %v5944_v24, %v6015_v5  ;;  %v1757_v17 = vmul.f32 %v6051_v44, %v6051_v44 }
 0x21f   : > { %v1783_v12 = vadd.f32 %v1752_v28, %v1751_v22  ;;  %v6069_v35 = vsub.f32 %v5950_v62, %v6015_v5  ;;  %v1758_v46 = vmul.f32 %v6057_v8, %v6057_v8  ;;  %v6075_v49 = vsub.f32 %v5941_v3, %v6015_v5 }
 0x220   : > { %v1759_v24 = vmul.f32 %v6063_v0, %v6063_v0  ;;  %v6081_v53 = vsub.f32 %v5947_v30, %v6015_v5  ;;  %v6087_v34 = vsub.f32 %v5956_v59, %v6015_v5  ;;  %v6093_v51 = vsub.f32 %v5962_v21, %v6015_v5 }
 0x221   : > { %v1784_v15 = vadd.f32 %v1783_v12, %v1753_v11  ;;  %v1760_v62 = vmul.f32 %v6069_v35, %v6069_v35  ;;  %v1761_v3 = vmul.f32 %v6075_v49, %v6075_v49  ;;  %v6099_v18 = vsub.f32 %v5953_v16, %v6015_v5  ;;  %v4414_v12 = vld [vmem:[#allocation11 + $0x28] sm:$0xff]  }
 0x222   : > { %v1762_v30 = vmul.f32 %v6081_v53, %v6081_v53  ;;  %v1763_v59 = vmul.f32 %v6087_v34, %v6087_v34  ;;  %v6105_v13 = vsub.f32 %v5959_v26, %v6015_v5  ;;  %v1764_v21 = vmul.f32 %v6093_v51, %v6093_v51  ;;  %4266 = vmatprep.subr.bf16.mxu1 %v4414_v12 }
 0x223   : > { %v1785_v33 = vadd.f32 %v1784_v15, %v1754_v61  ;;  %v6111_v43 = vsub.f32 %v5968_v57, %v6015_v5  ;;  %v1765_v16 = vmul.f32 %v6099_v18, %v6099_v18  ;;  %v6117_v26 = vsub.f32 %v5974_v23, %v6015_v5  ;;  %4267 = vmatpush3.bf16.msra.mxu1 %v4414_v12 }
 0x224   : > { %v1766_v28 = vmul.f32 %v6105_v13, %v6105_v13  ;;  %v6123_v57 = vsub.f32 %v5966_v39, %v6015_v5  ;;  %v6177_v6 = vsub.f32 %v5995_v63, %v6015_v5 }
 0x225   : > { %v1786_v37 = vadd.f32 %v1785_v33, %v1755_v19  ;;  %v1767_v61 = vmul.f32 %v6111_v43, %v6111_v43  ;;  %v6129_v19 = vsub.f32 %v5971_v52, %v6015_v5  ;;  %v1768_v23 = vmul.f32 %v6117_v26, %v6117_v26 }
 0x226   : > { %v1769_v39 = vmul.f32 %v6123_v57, %v6123_v57  ;;  %v1778_v63 = vmul.f32 %v6177_v6, %v6177_v6 }
 0x227   : > { %v1787_v40 = vadd.f32 %v1786_v37, %v1756_v56  ;;  %v4415_v56 = vld [vmem:[#allocation11 + $0x20] sm:$0xff]   ;;  %v6135_v37 = vsub.f32 %v5980_v10, %v6015_v5  ;;  %v1770_v52 = vmul.f32 %v6129_v19, %v6129_v19 }
 0x228   : > { %4268 = vmatprep.subr.bf16.mxu1 %v4415_v56 }
 0x229   : > { %v1788_v31 = vadd.f32 %v1787_v40, %v1757_v17  ;;  %v6141_v40 = vsub.f32 %v5986_v7, %v6015_v5  ;;  %v1771_v10 = vmul.f32 %v6135_v37, %v6135_v37  ;;  %4269 = vmatpush3.bf16.msra.mxu1 %v4415_v56 }
 0x22b   : > { %v1789_v27 = vadd.f32 %v1788_v31, %v1758_v46  ;;  %v4416_v31 = vld [vmem:[#allocation11 + $0x18] sm:$0xff]   ;;  %v1772_v7 = vmul.f32 %v6141_v40, %v6141_v40 }
 0x22c   : > { %4270 = vmatprep.subr.bf16.mxu1 %v4416_v31 }
 0x22d   : > { %v1790_v36 = vadd.f32 %v1789_v27, %v1759_v24  ;;  %v6147_v24 = vsub.f32 %v5978_v60, %v6015_v5  ;;  %4271 = vmatpush3.bf16.msra.mxu1 %v4416_v31 }
 0x22f   : > { %v1791_v38 = vadd.f32 %v1790_v36, %v1760_v62  ;;  %v6153_v62 = vsub.f32 %v5983_v20, %v6015_v5  ;;  %v1773_v60 = vmul.f32 %v6147_v24, %v6147_v24 }
 0x231   : > { %v1792_v58 = vadd.f32 %v1791_v38, %v1761_v3  ;;  %v4417_v3 = vld [vmem:[#allocation11 + $0x10] sm:$0xff]   ;;  %v6159_v38 = vsub.f32 %v5993_v48, %v6015_v5  ;;  %v1774_v20 = vmul.f32 %v6153_v62, %v6153_v62 }
 0x232   : > { %4272 = vmatprep.subr.bf16.mxu1 %v4417_v3 }
 0x233   : > { %v1793_v41 = vadd.f32 %v1792_v58, %v1762_v30  ;;  %v6165_v58 = vsub.f32 %v5998_v50, %v6015_v5  ;;  %v1775_v48 = vmul.f32 %v6159_v38, %v6159_v38  ;;  %4273 = vmatpush3.bf16.msra.mxu1 %v4417_v3 }
 0x235   : > { %v1794_v1 = vadd.f32 %v1793_v41, %v1763_v59  ;;  %v4418_v41 = vld [vmem:[#allocation11 + $0x8] sm:$0xff]   ;;  %v1776_v50 = vmul.f32 %v6165_v58, %v6165_v58 }
 0x236   : > { %4274 = vmatprep.subr.bf16.mxu1 %v4418_v41 }
 0x237   : > { %v1795_v22 = vadd.f32 %v1794_v1, %v1764_v21  ;;  %v6171_v21 = vsub.f32 %v5990_v2, %v6015_v5  ;;  %4275 = vmatpush3.bf16.msra.mxu1 %v4418_v41 }
 0x239   : > { %v1796_v11 = vadd.f32 %v1795_v22, %v1765_v16  ;;  %v4419_v16 = vld [vmem:[#allocation11] sm:$0xff]   ;;  %v1747_v22 = vsub.f32 %v6005_v55, %v6015_v5  ;;  %v1777_v2 = vmul.f32 %v6171_v21, %v6171_v21  ;;  %v1750_v55 = vsub.f32 %v6008_v29, %v6015_v5 }
 0x23a   : > { %4276 = vmatprep.subr.bf16.mxu1 %v4419_v16 }
 0x23b   : > { %v1797_v15 = vadd.f32 %v1796_v11, %v1766_v28  ;;  %v1748_v11 = vsub.f32 %v6010_v4, %v6015_v5  ;;  %4277 = vmatpush3.bf16.msra.mxu1 %v4419_v16 }
 0x23d   : > { %v1798_v33 = vadd.f32 %v1797_v15, %v1767_v61  ;;  %v1749_v61 = vsub.f32 %v6003_v9, %v6015_v5  ;;  %v1779_v15 = vmul.f32 %v1747_v22, %v1747_v22 }
 0x23f   : > { %v1799_v17 = vadd.f32 %v1798_v33, %v1768_v23  ;;  %v1780_v33 = vmul.f32 %v1748_v11, %v1748_v11 }
 0x241   : > { %v1800_v46 = vadd.f32 %v1799_v17, %v1769_v39  ;;  %v1781_v39 = vmul.f32 %v1749_v61, %v1749_v61 }
 0x243   : > { %v1801_v27 = vadd.f32 %v1800_v46, %v1770_v52  ;;  %v1782_v52 = vmul.f32 %v1750_v55, %v1750_v55 }
 0x245   : > { %v1802_v36 = vadd.f32 %v1801_v27, %v1771_v10 }
 0x247   : > { %v1803_v30 = vadd.f32 %v1802_v36, %v1772_v7 }
 0x249   : > { %v1804_v59 = vadd.f32 %v1803_v30, %v1773_v60 }
 0x24b   : > { %v1805_v1 = vadd.f32 %v1804_v59, %v1774_v20 }
 0x24d   : > { %v1806_v14 = vadd.f32 %v1805_v1, %v1775_v48 }
 0x24f   : > { %v1807_v28 = vadd.f32 %v1806_v14, %v1776_v50 }
 0x251   : > { %v1808_v12 = vadd.f32 %v1807_v28, %v1777_v2 }
 0x253   : > { %v1809_v23 = vadd.f32 %v1808_v12, %v1778_v63 }
 0x255   : > { %v1810_v56 = vadd.f32 %v1809_v23, %v1779_v15 }
 0x257   : > { %v1811_v17 = vadd.f32 %v1810_v56, %v1780_v33 }
 0x259   : > { %v1812_v4 = vadd.f32 %v1811_v17, %v1781_v39 }
 0x25b   : > { %v1813_v46 = vadd.f32 %v1812_v4, %v1782_v52 }
 0x25d   : > { %v1814_v31 = vrot.slane %v1813_v46, 4 }
 0x25f   : > { %v1815_v10 = vadd.f32 %v1814_v31, %v1813_v46 }
 0x261   : > { %v1816_v27 = vrot.slane %v1815_v10, 2 }
 0x263   : > { %v1817_v7 = vadd.f32 %v1816_v27, %v1815_v10 }
 0x265   : > { %v1818_v36 = vrot.slane %v1817_v7, 1 }
 0x267   : > { %v1819_v3 = vadd.f32 %v1818_v36, %v1817_v7 }
 0x269   : > { %v1820_v9 = vmul.f32 0.00390625, %v1819_v3 }
 0x26b   : > { %v1821_v60 = vadd.f32 1e-05, %v1820_v9 }
 0x26d   : > { %4420 = vrsqrt.f32 %v1821_v60 }
 0x27a   : > { %v4421_v30 = vpop.eup %4420 }
 0x27b   : > { %v1851_v20 = vmul.f32 %v4421_v30, %v1747_v22  ;;  %v1852_v59 = vmul.f32 %v4421_v30, %v1748_v11  ;;  %v1853_v29 = vmul.f32 %v4421_v30, %v1749_v61  ;;  %v1854_v5 = vmul.f32 %v4421_v30, %v1750_v55 }
 0x27c   : > { %v1823_v22 = vmul.f32 %v4421_v30, %v6019_v54  ;;  %v6207_v11 = vmul.f32 %v4421_v30, %v6023_v25  ;;  %v6210_v63 = vmul.f32 %v4421_v30, %v6027_v42  ;;  %v6213_v12 = vmul.f32 %v4421_v30, %v6035_v45 }
 0x27d   : > { %vm1883_vm0 = vcmp.ge.f32.partialorder %v1851_v20, 0.0  ;;  %vm1884_vm1 = vcmp.ge.f32.partialorder %v1852_v59, 0.0  ;;  %vm1885_vm2 = vcmp.ge.f32.partialorder %v1853_v29, 0.0  ;;  %vm1886_vm3 = vcmp.ge.f32.partialorder %v1854_v5, 0.0 }
 0x27e   : > { %v1915_v41 = vmul.f32 0.01, %v1851_v20  ;;  %v1916_v48 = vmul.f32 0.01, %v1852_v59  ;;  %v1917_v1 = vmul.f32 0.01, %v1853_v29  ;;  %v6216_v61 = vmul.f32 %v4421_v30, %v6039_v47 }
 0x27f   : > { %v1918_v50 = vmul.f32 0.01, %v1854_v5  ;;  %v6219_v15 = vmul.f32 %v4421_v30, %v6045_v32  ;;  %v6222_v23 = vmul.f32 %v4421_v30, %v6051_v44  ;;  %v6225_v54 = vmul.f32 %v4421_v30, %v6057_v8 }
 0x280   : > { %v6193_v14 = vsel %vm1883_vm0, %v1851_v20, %v1915_v41  ;;  %v6195_v16 = vsel %vm1884_vm1, %v1852_v59, %v1916_v48  ;;  %v6197_v2 = vsel %vm1885_vm2, %v1853_v29, %v1917_v1  ;;  %v6228_v25 = vmul.f32 %v4421_v30, %v6063_v0 }
 0x281   : > { %8708 = vst [vmem:[#allocation18_spill] sm:$0xff] %v6197_v2  ;;  %v6199_v28 = vsel %vm1886_vm3, %v1854_v5, %v1918_v50  ;;  %2033 = vst [vmem:[#allocation2 + $0x169] sm:$0xff] %v6193_v14  ;;  %v6231_v42 = vmul.f32 %v4421_v30, %v6069_v35  ;;  %v6234_v45 = vmul.f32 %v4421_v30, %v6075_v49  ;;  %vm1855_vm4 = vcmp.ge.f32.partialorder %v1823_v22, 0.0 }
 0x282   : > { %8709 = vst [vmem:[#allocation19_spill] sm:$0xff] %v6199_v28  ;;  %2034 = vst [vmem:[#allocation2 + $0x171] sm:$0xff] %v6195_v16  ;;  %v6237_v47 = vmul.f32 %v4421_v30, %v6081_v53  ;;  %v6240_v32 = vmul.f32 %v4421_v30, %v6087_v34  ;;  %v6243_v44 = vmul.f32 %v4421_v30, %v6093_v51  ;;  %vm1856_vm5 = vcmp.ge.f32.partialorder %v6207_v11, 0.0 }
 0x283   : > { %2035 = vst [vmem:[#allocation2 + $0x181] sm:$0xff] %v6197_v2  ;;  %2036 = vst [vmem:[#allocation2 + $0x189] sm:$0xff] %v6199_v28  ;;  %v6246_v8 = vmul.f32 %v4421_v30, %v6099_v18  ;;  %v6249_v0 = vmul.f32 %v4421_v30, %v6105_v13  ;;  %v6252_v35 = vmul.f32 %v4421_v30, %v6111_v43  ;;  %vm1857_vm6 = vcmp.ge.f32.partialorder %v6210_v63, 0.0 }
 0x284   : > { %v6255_v49 = vmul.f32 %v4421_v30, %v6117_v26  ;;  %v6258_v53 = vmul.f32 %v4421_v30, %v6123_v57  ;;  %v6261_v34 = vmul.f32 %v4421_v30, %v6129_v19  ;;  %v6264_v51 = vmul.f32 %v4421_v30, %v6135_v37 }
 0x285   : > { %v6267_v18 = vmul.f32 %v4421_v30, %v6141_v40  ;;  %v6270_v13 = vmul.f32 %v4421_v30, %v6147_v24  ;;  %v6273_v43 = vmul.f32 %v4421_v30, %v6153_v62  ;;  %v6276_v26 = vmul.f32 %v4421_v30, %v6159_v38 }
 0x286   : > { %v6279_v57 = vmul.f32 %v4421_v30, %v6165_v58  ;;  %v6282_v19 = vmul.f32 %v4421_v30, %v6171_v21  ;;  %v6285_v37 = vmul.f32 %v4421_v30, %v6177_v6  ;;  %vm1858_vm7 = vcmp.ge.f32.partialorder %v6213_v12, 0.0 }
 0x287   : > { %vm1859_vm8 = vcmp.ge.f32.partialorder %v6216_v61, 0.0  ;;  %vm1860_vm9 = vcmp.ge.f32.partialorder %v6219_v15, 0.0  ;;  %vm1865_vm14 = vcmp.ge.f32.partialorder %v6234_v45, 0.0  ;;  %vm1866_vm15 = vcmp.ge.f32.partialorder %v6237_v47, 0.0 }
 0x288   : > { %vm1867_vm0 = vcmp.ge.f32.partialorder %v6240_v32, 0.0  ;;  %v1887_v40 = vmul.f32 0.01, %v1823_v22  ;;  %vm1872_vm11 = vcmp.ge.f32.partialorder %v6255_v49, 0.0  ;;  %v1888_v24 = vmul.f32 0.01, %v6207_v11 }
 0x289   : > { %v1889_v62 = vmul.f32 0.01, %v6210_v63  ;;  %v1890_v38 = vmul.f32 0.01, %v6213_v12  ;;  %vm1877_vm3 = vcmp.ge.f32.partialorder %v6270_v13, 0.0  ;;  %vm1878_vm10 = vcmp.ge.f32.partialorder %v6273_v43, 0.0 }
 0x28a   : > { %v1891_v58 = vmul.f32 0.01, %v6216_v61  ;;  %v1892_v21 = vmul.f32 0.01, %v6219_v15  ;;  %v1893_v6 = vmul.f32 0.01, %v6222_v23  ;;  %v6317_v55 = vsel %vm1855_vm4, %v1823_v22, %v1887_v40 }
 0x28b   : > { %8710 = vst [vmem:[#allocation29_spill] sm:$0xff] %v6317_v55  ;;  %vm1879_vm13 = vcmp.ge.f32.partialorder %v6276_v26, 0.0  ;;  %vm1880_vm12 = vcmp.ge.f32.partialorder %v6279_v57, 0.0  ;;  %vm1881_vm1 = vcmp.ge.f32.partialorder %v6282_v19, 0.0  ;;  %vm1882_vm2 = vcmp.ge.f32.partialorder %v6285_v37, 0.0  ;;  %2005 = vst [vmem:[#allocation2 + $0x19] sm:$0xff] %v6317_v55 }
 0x28c   : > { %v1894_v33 = vmul.f32 0.01, %v6225_v54  ;;  %v1895_v56 = vmul.f32 0.01, %v6228_v25  ;;  %v1896_v39 = vmul.f32 0.01, %v6231_v42  ;;  %v6329_v17 = vsel %vm1856_vm5, %v6207_v11, %v1888_v24 }
 0x28d   : > { %8711 = vst [vmem:[#allocation20_spill] sm:$0xff] %v6329_v17  ;;  %v1897_v52 = vmul.f32 0.01, %v6234_v45  ;;  %v1898_v4 = vmul.f32 0.01, %v6237_v47  ;;  %v6338_v31 = vsel %vm1857_vm6, %v6210_v63, %v1889_v62  ;;  %2006 = vst [vmem:[#allocation2 + $0x21] sm:$0xff] %v6329_v17  ;;  %v6347_v36 = vsel %vm1858_vm7, %v6213_v12, %v1890_v38 }
 0x28e   : > { %v1899_v46 = vmul.f32 0.01, %v6240_v32  ;;  %8712 = vst [vmem:[#allocation21_spill] sm:$0xff] %v6338_v31  ;;  %v1900_v10 = vmul.f32 0.01, %v6243_v44  ;;  %8713 = vst [vmem:[#allocation30_spill] sm:$0xff] %v6347_v36  ;;  %v6356_v30 = vsel %vm1859_vm8, %v6216_v61, %v1891_v58  ;;  %v6365_v5 = vsel %vm1860_vm9, %v6219_v15, %v1892_v21 }
 0x28f   : > { %v1901_v27 = vmul.f32 0.01, %v6246_v8  ;;  %v1902_v7 = vmul.f32 0.01, %v6249_v0  ;;  %2007 = vst [vmem:[#allocation2 + $0x31] sm:$0xff] %v6338_v31  ;;  %8714 = vst [vmem:[#allocation31_spill] sm:$0xff] %v6356_v30 }
 0x290   : > { %v1903_v3 = vmul.f32 0.01, %v6252_v35  ;;  %v1904_v9 = vmul.f32 0.01, %v6255_v49  ;;  %v1905_v60 = vmul.f32 0.01, %v6258_v53 }
 0x291   : > { %2008 = vst [vmem:[#allocation2 + $0x39] sm:$0xff] %v6347_v36  ;;  %v1906_v20 = vmul.f32 0.01, %v6261_v34  ;;  %v1907_v59 = vmul.f32 0.01, %v6264_v51  ;;  %8715 = vst [vmem:[#allocation32_spill] sm:$0xff] %v6365_v5 }
 0x292   : > { %v1908_v29 = vmul.f32 0.01, %v6267_v18  ;;  %2009 = vst [vmem:[#allocation2 + $0x49] sm:$0xff] %v6356_v30  ;;  %v1909_v41 = vmul.f32 0.01, %v6270_v13  ;;  %vm8716_vm4 = vcmp.ge.f32.partialorder %v6222_v23, 0.0 }
 0x293   : > { %v1910_v48 = vmul.f32 0.01, %v6273_v43  ;;  %v1911_v1 = vmul.f32 0.01, %v6276_v26  ;;  %v6374_v50 = vsel %vm8716_vm4, %v6222_v23, %v1893_v6  ;;  %2010 = vst [vmem:[#allocation2 + $0x51] sm:$0xff] %v6365_v5  ;;  %vm8718_vm5 = vcmp.ge.f32.partialorder %v6225_v54, 0.0 }
 0x294   : > { %8717 = vst [vmem:[#allocation22_spill] sm:$0xff] %v6374_v50  ;;  %v1912_v22 = vmul.f32 0.01, %v6279_v57  ;;  %v1913_v11 = vmul.f32 0.01, %v6282_v19  ;;  %v6383_v12 = vsel %vm8718_vm5, %v6225_v54, %v1894_v33  ;;  %2011 = vst [vmem:[#allocation2 + $0x61] sm:$0xff] %v6374_v50  ;;  %v6399_v23 = vsel %vm1865_vm14, %v6234_v45, %v1897_v52 }
 0x295   : > { %v1914_v63 = vmul.f32 0.01, %v6285_v37  ;;  %8719 = vst [vmem:[#allocation23_spill] sm:$0xff] %v6383_v12  ;;  %vm8720_vm6 = vcmp.ge.f32.partialorder %v6228_v25, 0.0  ;;  %vm8722_vm7 = vcmp.ge.f32.partialorder %v6231_v42, 0.0  ;;  %8724 = vst [vmem:[#allocation26_spill] sm:$0xff] %v6399_v23  ;;  %v6404_v54 = vsel %vm1866_vm15, %v6237_v47, %v1898_v4 }
 0x296   : > { %v6389_v61 = vsel %vm8720_vm6, %v6228_v25, %v1895_v56  ;;  %v6394_v15 = vsel %vm8722_vm7, %v6231_v42, %v1896_v39  ;;  %8725 = vst [vmem:[#allocation27_spill] sm:$0xff] %v6404_v54  ;;  %2012 = vst [vmem:[#allocation2 + $0x69] sm:$0xff] %v6383_v12  ;;  %v6410_v25 = vsel %vm1867_vm0, %v6240_v32, %v1899_v46  ;;  %vm8727_vm8 = vcmp.ge.f32.partialorder %v6243_v44, 0.0  ;;  %v6512_v40 = vld [vmem:[#allocation9 + $0x3] ss:$0 sm:$0xff]  ;;  %v2068_v6 = vld [vmem:[#allocation2 + $0x170] sm:$0xff] }
 0x297   : > { %8721 = vst [vmem:[#allocation24_spill] sm:$0xff] %v6389_v61  ;;  %8723 = vst [vmem:[#allocation25_spill] sm:$0xff] %v6394_v15  ;;  %v6415_v42 = vsel %vm8727_vm8, %v6243_v44, %v1900_v10  ;;  %vm8729_vm9 = vcmp.ge.f32.partialorder %v6246_v8, 0.0  ;;  %vm8731_vm14 = vcmp.ge.f32.partialorder %v6249_v0, 0.0  ;;  %vm8733_vm15 = vcmp.ge.f32.partialorder %v6252_v35, 0.0  ;;  %v2067_v46 = vld [vmem:[#allocation2 + $0x168] sm:$0xff] }
 0x298   : > { %8726 = vst [vmem:[#allocation33_spill] sm:$0xff] %v6410_v25  ;;  %8728 = vst [vmem:[#allocation34_spill] sm:$0xff] %v6415_v42  ;;  %v6420_v45 = vsel %vm8729_vm9, %v6246_v8, %v1901_v27  ;;  %v6425_v47 = vsel %vm8731_vm14, %v6249_v0, %v1902_v7  ;;  %v6434_v32 = vsel %vm8733_vm15, %v6252_v35, %v1903_v3  ;;  %vm8736_vm0 = vcmp.ge.f32.partialorder %v6258_v53, 0.0  ;;  %v6520_v21 = vld [vmem:[#allocation9 + $0x2] ss:$0 sm:$0xff] }
 0x299   : > { %8730 = vst [vmem:[#allocation35_spill] sm:$0xff] %v6420_v45  ;;  %8732 = vst [vmem:[#allocation36_spill] sm:$0xff] %v6425_v47  ;;  %v6439_v44 = vsel %vm1872_vm11, %v6255_v49, %v1904_v9  ;;  %v6444_v8 = vsel %vm8736_vm0, %v6258_v53, %v1905_v60  ;;  %vm8738_vm4 = vcmp.ge.f32.partialorder %v6261_v34, 0.0  ;;  %vm8740_vm11 = vcmp.ge.f32.partialorder %v6264_v51, 0.0  ;;  %v6532_v3 = vld [vmem:[#allocation9 + $0x4] ss:$0 sm:$0xff] }
 0x29a   : > { %2013 = vst [vmem:[#allocation2 + $0x79] sm:$0xff] %v6389_v61  ;;  %2014 = vst [vmem:[#allocation2 + $0x81] sm:$0xff] %v6394_v15  ;;  %v6449_v0 = vsel %vm8738_vm4, %v6261_v34, %v1906_v20  ;;  %v6458_v35 = vsel %vm8740_vm11, %v6264_v51, %v1907_v59  ;;  %vm8742_vm5 = vcmp.ge.f32.partialorder %v6267_v18, 0.0  ;;  %v6468_v53 = vsel %vm1877_vm3, %v6270_v13, %v1909_v41 }
 0x29b   : > { %2015 = vst [vmem:[#allocation2 + $0x91] sm:$0xff] %v6399_v23  ;;  %2016 = vst [vmem:[#allocation2 + $0x99] sm:$0xff] %v6404_v54  ;;  %v6463_v49 = vsel %vm8742_vm5, %v6267_v18, %v1908_v29  ;;  %v6473_v34 = vsel %vm1878_vm10, %v6273_v43, %v1910_v48  ;;  %v1943_v51 = vsel %vm1879_vm13, %v6276_v26, %v1911_v1  ;;  %v6504_v26 = vld [vmem:[#allocation9 + $0x1] ss:$0 sm:$0xff] }
 0x29c   : > { %8734 = vst [vmem:[#allocation17_spill] sm:$0xff] %v6434_v32  ;;  %8735 = vst [vmem:[#allocation49_spill] sm:$0xff] %v6439_v44  ;;  %v6485_v18 = vsel %vm1880_vm12, %v6279_v57, %v1912_v22  ;;  %v6490_v13 = vsel %vm1881_vm1, %v6282_v19, %v1913_v11  ;;  %v6495_v43 = vsel %vm1882_vm2, %v6285_v37, %v1914_v63  ;;  %v6506_v57 = vld [vmem:[#allocation9] ss:$0 sm:$0xff] }
 0x29d   : > { %8737 = vst [vmem:[#allocation50_spill] sm:$0xff] %v6444_v8  ;;  %8739 = vst [vmem:[#allocation37_spill] sm:$0xff] %v6449_v0  ;;  %v2199_v58 = vmul.f32 %v6504_v26, %v6468_v53  ;;  %v2201_v39 = vmul.f32 %v6504_v26, %v1943_v51  ;;  %v2203_v52 = vmul.f32 %v6504_v26, %v6490_v13 }
 0x29e   : > { %2017 = vst [vmem:[#allocation2 + $0xa9] sm:$0xff] %v6410_v25  ;;  %2018 = vst [vmem:[#allocation2 + $0xb1] sm:$0xff] %v6415_v42  ;;  %v2105_v29 = vmul.f32 %v6506_v57, %v2068_v6  ;;  %v2405_v63 = vmul.f32 %v6512_v40, %v2067_v46 }
 0x29f   : > { %2019 = vst [vmem:[#allocation2 + $0xc1] sm:$0xff] %v6420_v45  ;;  %2020 = vst [vmem:[#allocation2 + $0xc9] sm:$0xff] %v6425_v47 }
 0x2a0   : > { %8741 = vst [vmem:[#allocation38_spill] sm:$0xff] %v6458_v35  ;;  %8743 = vst [vmem:[#allocation51_spill] sm:$0xff] %v6463_v49 }
 0x2a1   : > { %8744 = vst [vmem:[#allocation52_spill] sm:$0xff] %v6473_v34  ;;  %2021 = vst [vmem:[#allocation2 + $0xd9] sm:$0xff] %v6434_v32 }
 0x2a2   : > { %2022 = vst [vmem:[#allocation2 + $0xe1] sm:$0xff] %v6439_v44  ;;  %2023 = vst [vmem:[#allocation2 + $0xf1] sm:$0xff] %v6444_v8  ;;  %v6652_v31 = vld [vmem:[#allocation2 + $0x98] sm:$0xff] }
 0x2a3   : > { %2024 = vst [vmem:[#allocation2 + $0xf9] sm:$0xff] %v6449_v0  ;;  %8745 = vst [vmem:[#allocation53_spill] sm:$0xff] %v6485_v18 }
 0x2a4   : > { %8746 = vst [vmem:[#allocation54_spill] sm:$0xff] %v6490_v13  ;;  %8747 = vst [vmem:[#allocation39_spill] sm:$0xff] %v6495_v43 }
 0x2a5   : > { %2025 = vst [vmem:[#allocation2 + $0x109] sm:$0xff] %v6458_v35  ;;  %2026 = vst [vmem:[#allocation2 + $0x111] sm:$0xff] %v6463_v49  ;;  %v6654_v17 = vld [vmem:[#allocation2 + $0xa8] sm:$0xff] }
 0x2a6   : > { %2027 = vst [vmem:[#allocation2 + $0x121] sm:$0xff] %v6468_v53  ;;  %2028 = vst [vmem:[#allocation2 + $0x129] sm:$0xff] %v6473_v34  ;;  %v6671_v55 = vld [vmem:[#allocation2 + $0xc8] sm:$0xff] }
 0x2a7   : > { %2029 = vst [vmem:[#allocation2 + $0x139] sm:$0xff] %v1943_v51  ;;  %2030 = vst [vmem:[#allocation2 + $0x141] sm:$0xff] %v6485_v18 }
 0x2a8   : > { %2031 = vst [vmem:[#allocation2 + $0x151] sm:$0xff] %v6490_v13  ;;  %2032 = vst [vmem:[#allocation2 + $0x159] sm:$0xff] %v6495_v43 }
 0x2a9   : > { %8748 = vst [vmem:[#allocation40_spill] sm:$0xff] %v6504_v26  ;;  %8749 = vst [vmem:[#allocation55_spill] sm:$0xff] %v6506_v57 }
 0x2aa   : > { %8753 = vst [vmem:[#allocation41_spill] sm:$0xff] %v6532_v3  ;;  %8778 = vst [vmem:[#allocation75_spill] sm:$0xff] %v6652_v31 }
 0x2ab   : > { %8779 = vst [vmem:[#allocation76_spill] sm:$0xff] %v6654_v17  ;;  %8782 = vst [vmem:[#allocation79_spill] sm:$0xff] %v6671_v55 }
 0x2ad   : > { %v6508_v19 = vld [vmem:[#allocation2 + $0x120] sm:$0xff] }
 0x2ae   : > { %v6510_v37 = vld [vmem:[#allocation2 + $0x122] sm:$0xff]  ;;  %v2063_v24 = vld [vmem:[#allocation2 + $0x138] sm:$0xff]  ;;  %v2098_v38 = vmul.f32 %v6506_v57, %v6508_v19 }
 0x2af   : > { %8750 = vst [vmem:[#allocation28_spill] sm:$0xff] %v6510_v37  ;;  %v6514_v62 = vld [vmem:[#allocation2 + $0x150] sm:$0xff]  ;;  %v2100_v33 = vmul.f32 %v6506_v57, %v2063_v24  ;;  %v6528_v4 = vld [vmem:[#allocation2 + $0x13a] sm:$0xff]  ;;  %v2300_v7 = vmul.f32 %v6520_v21, %v6510_v37  ;;  %v2401_v48 = vmul.f32 %v6512_v40, %v2063_v24  ;;  %v2504_v24 = vmul.f32 %v6532_v3, %v6490_v13  ;;  %v6567_v37 = vld [vmem:[#allocation2 + $0x188] sm:$0xff] }
 0x2b0   : > { %8751 = vst [vmem:[#allocation56_spill] sm:$0xff] %v6514_v62  ;;  %v2102_v56 = vmul.f32 %v6506_v57, %v6514_v62  ;;  %8752 = vst [vmem:[#allocation57_spill] sm:$0xff] %v6528_v4  ;;  %v2231_v10 = vadd.f32 %v2199_v58, %v2098_v38  ;;  %v2267_v27 = vld [vmem:[#allocation2 + $0x152] sm:$0xff]  ;;  %v2302_v20 = vmul.f32 %v6520_v21, %v6528_v4  ;;  %v6542_v38 = vld [vmem:[#allocation9 + $0x5] ss:$0 sm:$0xff] }
 0x2b1   : > { %v2233_v9 = vadd.f32 %v2201_v39, %v2100_v33  ;;  %v2304_v59 = vmul.f32 %v6520_v21, %v2267_v27  ;;  %v2403_v11 = vmul.f32 %v6512_v40, %v6514_v62  ;;  %8754 = vst [vmem:[#allocation42_spill] sm:$0xff] %v6542_v38  ;;  %v2206_v58 = vmul.f32 %v6504_v26, %v6195_v16  ;;  %v6547_v39 = vld [vmem:[#allocation2 + $0x172] sm:$0xff]  ;;  %v6633_v62 = vld [vmem:[#allocation2 + $0x80] sm:$0xff] }
 0x2b2   : > { %v2235_v60 = vadd.f32 %v2203_v52, %v2102_v56  ;;  %v2332_v41 = vadd.f32 %v2300_v7, %v2231_v10  ;;  %v2502_v56 = vmul.f32 %v6532_v3, %v1943_v51  ;;  %8755 = vst [vmem:[#allocation58_spill] sm:$0xff] %v6547_v39  ;;  %v2506_v7 = vmul.f32 %v6532_v3, %v6193_v14  ;;  %v6650_v13 = vld [vmem:[#allocation2 + $0x90] sm:$0xff] }
 0x2b3   : > { %v2334_v1 = vadd.f32 %v2302_v20, %v2233_v9  ;;  %v6553_v9 = vld [vmem:[#allocation9 + $0x6] ss:$0 sm:$0xff]  ;;  %v2238_v20 = vadd.f32 %v2206_v58, %v2105_v29  ;;  %v2605_v51 = vmul.f32 %v6542_v38, %v2267_v27  ;;  %8760 = vst [vmem:[#allocation44_spill] sm:$0xff] %v6567_v37  ;;  %v6631_v38 = vld [vmem:[#allocation2 + $0x78] sm:$0xff] }
 0x2b4   : > { %v2336_v22 = vadd.f32 %v2304_v59, %v2235_v60  ;;  %v2433_v33 = vadd.f32 %v2401_v48, %v2332_v41  ;;  %8756 = vst [vmem:[#allocation59_spill] sm:$0xff] %v6553_v9  ;;  %v2104_v60 = vmul.f32 %v6506_v57, %v2067_v46  ;;  %v2706_v29 = vmul.f32 %v6553_v9, %v2067_v46 }
 0x2b5   : > { %v2435_v52 = vadd.f32 %v2403_v11, %v2334_v1  ;;  %v6561_v1 = vld [vmem:[#allocation9 + $0x7] ss:$0 sm:$0xff]  ;;  %v2307_v11 = vmul.f32 %v6520_v21, %v6547_v39  ;;  %v6584_v46 = vmul.f32 %v6532_v3, %v6195_v16  ;;  %v6629_v39 = vld [vmem:[#allocation2 + $0x68] sm:$0xff] }
 0x2b6   : > { %v2437_v10 = vadd.f32 %v2405_v63, %v2336_v22  ;;  %v6556_v59 = vadd.f32 %v2502_v56, %v2433_v33  ;;  %8759 = vst [vmem:[#allocation43_spill] sm:$0xff] %v6561_v1  ;;  %v2205_v22 = vmul.f32 %v6504_v26, %v6193_v14  ;;  %v2269_v63 = vld [vmem:[#allocation2 + $0x16a] sm:$0xff] }
 0x2b7   : > { %v2536_v41 = vadd.f32 %v2504_v24, %v2435_v52  ;;  %v2339_v33 = vadd.f32 %v2307_v11, %v2238_v20  ;;  %v6570_v56 = vld [vmem:[#allocation2 + $0xf0] sm:$0xff]  ;;  %v2059_v52 = vld [vmem:[#allocation2 + $0x108] sm:$0xff]  ;;  %v2306_v24 = vmul.f32 %v6520_v21, %v2269_v63  ;;  %8764 = vst [vmem:[#allocation46_spill] sm:$0xff] %v6584_v46  ;;  %v6601_v63 = vld [vmem:[#allocation2 + $0x140] sm:$0xff]  ;;  %v2086_v46 = vmul.f32 %v6506_v57, %v6650_v13 }
 0x2b8   : > { %8757 = vst [vmem:[#allocation60_spill] sm:$0xff] %v6556_v59  ;;  %v6558_v48 = vadd.f32 %v2506_v7, %v2437_v10  ;;  %v2237_v58 = vadd.f32 %v2205_v22, %v2104_v60  ;;  %8761 = vst [vmem:[#allocation62_spill] sm:$0xff] %v6570_v56  ;;  %v2807_v10 = vmul.f32 %v6561_v1, %v6193_v14  ;;  %v6586_v60 = vld [vmem:[#allocation2 + $0x180] sm:$0xff]  ;;  %v6599_v11 = vld [vmem:[#allocation2 + $0x50] sm:$0xff] }
 0x2b9   : > { %v2637_v4 = vadd.f32 %v2605_v51, %v2536_v41  ;;  %v2408_v7 = vmul.f32 %v6512_v40, %v6567_v37  ;;  %v6580_v41 = vmul.f32 %v6512_v40, %v2068_v6  ;;  %8765 = vst [vmem:[#allocation47_spill] sm:$0xff] %v6586_v60  ;;  %v6594_v51 = vld [vmem:[#allocation2 + $0xd8] sm:$0xff]  ;;  %v2094_v22 = vmul.f32 %v6506_v57, %v6570_v56 }
 0x2ba   : > { %8758 = vst [vmem:[#allocation61_spill] sm:$0xff] %v6558_v48  ;;  %v6577_v48 = vld [vmem:[#allocation2 + $0x158] sm:$0xff]  ;;  %v6590_v20 = vadd.f32 %v2306_v24, %v2237_v58  ;;  %8769 = vst [vmem:[#allocation66_spill] sm:$0xff] %v6594_v51  ;;  %v2096_v6 = vmul.f32 %v6506_v57, %v2059_v52  ;;  %v2195_v58 = vmul.f32 %v6504_v26, %v6444_v8 }
 0x2bb   : > { %v2738_v27 = vadd.f32 %v2706_v29, %v2637_v4  ;;  %8762 = vst [vmem:[#allocation63_spill] sm:$0xff] %v6577_v48  ;;  %8763 = vst [vmem:[#allocation45_spill] sm:$0xff] %v6580_v41  ;;  %v6592_v14 = vadd.f32 %v2408_v7, %v2339_v33  ;;  %v2103_v16 = vmul.f32 %v6506_v57, %v6577_v48 }
 0x2bc   : > { %8767 = vst [vmem:[#allocation64_spill] sm:$0xff] %v6590_v20  ;;  %8770 = vst [vmem:[#allocation67_spill] sm:$0xff] %v6599_v11  ;;  %v6607_v29 = vmul.f32 %v6504_v26, %v6434_v32  ;;  %v2197_v33 = vmul.f32 %v6504_v26, %v6458_v35  ;;  %v6617_v24 = vmul.f32 %v6504_v26, %v6485_v18 }
 0x2bd   : > { %v6588_v4 = vadd.f32 %v2807_v10, %v2738_v27  ;;  %8768 = vst [vmem:[#allocation65_spill] sm:$0xff] %v6592_v14  ;;  %8771 = vst [vmem:[#allocation68_spill] sm:$0xff] %v6601_v63  ;;  %v2268_v27 = vld [vmem:[#allocation2 + $0x15a] sm:$0xff]  ;;  %v2204_v7 = vmul.f32 %v6504_v26, %v6495_v43  ;;  %v6627_v59 = vmul.f32 %v6532_v3, %v6468_v53 }
 0x2be   : > { %v6613_v10 = vld [vmem:[#allocation2 + $0x60] sm:$0xff]  ;;  %v6637_v30 = vmul.f32 %v6506_v57, %v6594_v51  ;;  %v6640_v36 = vmul.f32 %v6512_v40, %v2059_v52  ;;  %v6644_v1 = vmul.f32 %v6532_v3, %v6197_v2  ;;  %v6648_v53 = vmul.f32 %v6532_v3, %v6199_v28 }
 0x2bf   : > { %8766 = vst [vmem:[#allocation48_spill] sm:$0xff] %v6588_v4  ;;  %8772 = vst [vmem:[#allocation69_spill] sm:$0xff] %v6613_v10  ;;  %v6623_v4 = vmul.f32 %v6512_v40, %v6586_v60  ;;  %v6658_v37 = vmul.f32 %v6506_v57, %v6601_v63  ;;  %v6660_v52 = vadd.f32 %v2195_v58, %v2094_v22  ;;  %v6667_v60 = vld [vmem:[#allocation2 + $0xb0] sm:$0xff]  ;;  %v6669_v28 = vld [vmem:[#allocation2 + $0xc0] sm:$0xff] }
 0x2c0   : > { %8774 = vst [vmem:[#allocation71_spill] sm:$0xff] %v6627_v59  ;;  %8775 = vst [vmem:[#allocation72_spill] sm:$0xff] %v6640_v36  ;;  %v6662_v9 = vadd.f32 %v2197_v33, %v2096_v6  ;;  %v6665_v2 = vmul.f32 %v6520_v21, %v2268_v27  ;;  %v6677_v14 = vmul.f32 %v6512_v40, %v6508_v19  ;;  %v6681_v22 = vld [vmem:[#allocation2 + $0xf8] sm:$0xff]  ;;  %v6683_v6 = vld [vmem:[#allocation2 + $0x110] sm:$0xff] }
 0x2c1   : > { %8773 = vst [vmem:[#allocation70_spill] sm:$0xff] %v6623_v4  ;;  %8776 = vst [vmem:[#allocation73_spill] sm:$0xff] %v6644_v1  ;;  %v6679_v1 = vld [vmem:[#allocation2 + $0xe0] sm:$0xff]  ;;  %v2081_v58 = vmul.f32 %v6506_v57, %v6599_v11  ;;  %v2082_v33 = vmul.f32 %v6506_v57, %v6613_v10  ;;  %v6689_v27 = vld [vmem:[#allocation2 + $0x128] sm:$0xff]  ;;  %v2084_v19 = vmul.f32 %v6506_v57, %v6631_v38 }
 0x2c2   : > { %8777 = vst [vmem:[#allocation74_spill] sm:$0xff] %v6648_v53  ;;  %8780 = vst [vmem:[#allocation77_spill] sm:$0xff] %v6667_v60  ;;  %v6673_v53 = vadd.f32 %v2204_v7, %v2103_v16  ;;  %v2083_v16 = vmul.f32 %v6506_v57, %v6629_v39  ;;  %v2085_v7 = vmul.f32 %v6506_v57, %v6633_v62  ;;  %v6753_v51 = vld [vmem:[#allocation2 + $0x7a] sm:$0xff] }
 0x2c3   : > { %8781 = vst [vmem:[#allocation78_spill] sm:$0xff] %v6669_v28  ;;  %8783 = vst [vmem:[#allocation80_spill] sm:$0xff] %v6677_v14  ;;  %v2087_v11 = vmul.f32 %v6506_v57, %v6652_v31  ;;  %v2088_v10 = vmul.f32 %v6506_v57, %v6654_v17  ;;  %v2089_v59 = vmul.f32 %v6506_v57, %v6667_v60 }
 0x2c4   : > { %8784 = vst [vmem:[#allocation81_spill] sm:$0xff] %v6679_v1  ;;  %8785 = vst [vmem:[#allocation82_spill] sm:$0xff] %v6681_v22  ;;  %v2090_v43 = vmul.f32 %v6506_v57, %v6669_v28  ;;  %v2091_v18 = vmul.f32 %v6506_v57, %v6671_v55  ;;  %v2093_v35 = vmul.f32 %v6506_v57, %v6679_v1  ;;  %v6757_v55 = vld [vmem:[#allocation2 + $0x92] sm:$0xff] }
 0x2c5   : > { %8786 = vst [vmem:[#allocation83_spill] sm:$0xff] %v6683_v6  ;;  %8787 = vst [vmem:[#allocation84_spill] sm:$0xff] %v6689_v27  ;;  %v2095_v8 = vmul.f32 %v6506_v57, %v6681_v22  ;;  %v2097_v32 = vmul.f32 %v6506_v57, %v6683_v6  ;;  %v2099_v3 = vmul.f32 %v6506_v57, %v6689_v27  ;;  %v6749_v22 = vld [vmem:[#allocation2 + $0x62] sm:$0xff] }
 0x2c6   : > { %v2182_v4 = vmul.f32 %v6504_v26, %v6365_v5  ;;  %v2183_v20 = vmul.f32 %v6504_v26, %v6374_v50  ;;  %v2184_v41 = vmul.f32 %v6504_v26, %v6383_v12  ;;  %v2185_v14 = vmul.f32 %v6504_v26, %v6389_v61  ;;  %8789 = vst [vmem:[#allocation86_spill] sm:$0xff] %v6749_v22 }
 0x2c7   : > { %v2186_v36 = vmul.f32 %v6504_v26, %v6394_v15  ;;  %v2187_v48 = vmul.f32 %v6504_v26, %v6399_v23  ;;  %v2188_v57 = vmul.f32 %v6504_v26, %v6404_v54  ;;  %v2189_v5 = vmul.f32 %v6504_v26, %v6410_v25  ;;  %8791 = vst [vmem:[#allocation88_spill] sm:$0xff] %v6753_v51 }
 0x2c8   : > { %v2190_v50 = vmul.f32 %v6504_v26, %v6415_v42  ;;  %v2191_v12 = vmul.f32 %v6504_v26, %v6420_v45  ;;  %v2192_v61 = vmul.f32 %v6504_v26, %v6425_v47  ;;  %v2194_v15 = vmul.f32 %v6504_v26, %v6439_v44  ;;  %v6747_v45 = vld [vmem:[#allocation2 + $0x52] sm:$0xff]  ;;  %v6751_v47 = vld [vmem:[#allocation2 + $0x6a] sm:$0xff]  ;;  %8793 = vst [vmem:[#allocation90_spill] sm:$0xff] %v6757_v55 }
 0x2c9   : > { %v2196_v23 = vmul.f32 %v6504_v26, %v6449_v0  ;;  %v2198_v54 = vmul.f32 %v6504_v26, %v6463_v49  ;;  %v2200_v25 = vmul.f32 %v6504_v26, %v6473_v34  ;;  %v2214_v63 = vadd.f32 %v2182_v4, %v2081_v58  ;;  %8788 = vst [vmem:[#allocation85_spill] sm:$0xff] %v6747_v45  ;;  %v6755_v49 = vld [vmem:[#allocation2 + $0x82] sm:$0xff]  ;;  %v6761_v58 = vld [vmem:[#allocation2 + $0x9a] sm:$0xff] }
 0x2ca   : > { %v2215_v42 = vadd.f32 %v2183_v20, %v2082_v33  ;;  %v2216_v27 = vadd.f32 %v2184_v41, %v2083_v16  ;;  %v2217_v6 = vadd.f32 %v2185_v14, %v2084_v19  ;;  %8790 = vst [vmem:[#allocation87_spill] sm:$0xff] %v6751_v47  ;;  %v2218_v44 = vadd.f32 %v2186_v36, %v2085_v7  ;;  %v6763_v33 = vld [vmem:[#allocation2 + $0xaa] sm:$0xff]  ;;  %v6765_v36 = vld [vmem:[#allocation2 + $0xb2] sm:$0xff] }
 0x2cb   : > { %v2219_v56 = vadd.f32 %v2187_v48, %v2086_v46  ;;  %v2220_v1 = vadd.f32 %v2188_v57, %v2087_v11  ;;  %v2221_v0 = vadd.f32 %v2189_v5, %v2088_v10  ;;  %8792 = vst [vmem:[#allocation89_spill] sm:$0xff] %v6755_v49  ;;  %v2222_v4 = vadd.f32 %v2190_v50, %v2089_v59  ;;  %v6767_v57 = vld [vmem:[#allocation2 + $0x142] sm:$0xff]  ;;  %v6771_v50 = vld [vmem:[#allocation2 + $0xca] sm:$0xff] }
 0x2cc   : > { %v2223_v20 = vadd.f32 %v2191_v12, %v2090_v43  ;;  %v2224_v41 = vadd.f32 %v2192_v61, %v2091_v18  ;;  %v2225_v14 = vadd.f32 %v6607_v29, %v6637_v30  ;;  %8794 = vst [vmem:[#allocation91_spill] sm:$0xff] %v6761_v58  ;;  %8795 = vst [vmem:[#allocation92_spill] sm:$0xff] %v6763_v33  ;;  %v6769_v10 = vld [vmem:[#allocation2 + $0xc2] sm:$0xff]  ;;  %v6773_v12 = vld [vmem:[#allocation2 + $0xda] sm:$0xff] }
 0x2cd   : > { %8796 = vst [vmem:[#allocation93_spill] sm:$0xff] %v6765_v36  ;;  %8797 = vst [vmem:[#allocation94_spill] sm:$0xff] %v6767_v57  ;;  %v2226_v5 = vadd.f32 %v2194_v15, %v2093_v35  ;;  %v2228_v48 = vadd.f32 %v2196_v23, %v2095_v8  ;;  %v2230_v46 = vadd.f32 %v2198_v54, %v2097_v32  ;;  %v6777_v61 = vld [vmem:[#allocation2 + $0xe2] sm:$0xff]  ;;  %v6779_v18 = vld [vmem:[#allocation2 + $0xf2] sm:$0xff] }
 0x2ce   : > { %v2232_v11 = vadd.f32 %v2200_v25, %v2099_v3  ;;  %8798 = vst [vmem:[#allocation95_spill] sm:$0xff] %v6769_v10  ;;  %8799 = vst [vmem:[#allocation96_spill] sm:$0xff] %v6771_v50  ;;  %v2234_v30 = vadd.f32 %v6617_v24, %v6658_v37  ;;  %v6781_v43 = vld [vmem:[#allocation2 + $0xfa] sm:$0xff]  ;;  %v2283_v15 = vmul.f32 %v6520_v21, %v6747_v45  ;;  %v6789_v25 = vld [vmem:[#allocation2 + $0x10a] sm:$0xff] }
 0x2cf   : > { %8800 = vst [vmem:[#allocation97_spill] sm:$0xff] %v6773_v12  ;;  %8801 = vst [vmem:[#allocation98_spill] sm:$0xff] %v6777_v61  ;;  %v2284_v23 = vmul.f32 %v6520_v21, %v6749_v22  ;;  %v2285_v54 = vmul.f32 %v6520_v21, %v6751_v47  ;;  %v6791_v32 = vld [vmem:[#allocation2 + $0x112] sm:$0xff]  ;;  %v6793_v8 = vld [vmem:[#allocation2 + $0x12a] sm:$0xff]  ;;  %v2286_v35 = vmul.f32 %v6520_v21, %v6753_v51 }
 0x2d0   : > { %8802 = vst [vmem:[#allocation99_spill] sm:$0xff] %v6779_v18  ;;  %8803 = vst [vmem:[#allocation100_spill] sm:$0xff] %v6781_v43  ;;  %v2287_v37 = vmul.f32 %v6520_v21, %v6755_v49  ;;  %v2288_v3 = vmul.f32 %v6520_v21, %v6757_v55  ;;  %v2289_v59 = vmul.f32 %v6520_v21, %v6761_v58 }
 0x2d1   : > { %8804 = vst [vmem:[#allocation101_spill] sm:$0xff] %v6789_v25  ;;  %8805 = vst [vmem:[#allocation102_spill] sm:$0xff] %v6791_v32  ;;  %v2290_v29 = vmul.f32 %v6520_v21, %v6763_v33  ;;  %v2291_v24 = vmul.f32 %v6520_v21, %v6765_v36  ;;  %v2292_v16 = vmul.f32 %v6520_v21, %v6769_v10 }
 0x2d2   : > { %8806 = vst [vmem:[#allocation103_spill] sm:$0xff] %v6793_v8  ;;  %v2293_v19 = vmul.f32 %v6520_v21, %v6771_v50  ;;  %v2294_v7 = vmul.f32 %v6520_v21, %v6773_v12  ;;  %v2295_v55 = vmul.f32 %v6520_v21, %v6777_v61  ;;  %v2296_v58 = vmul.f32 %v6520_v21, %v6779_v18 }
 0x2d3   : > { %v2297_v33 = vmul.f32 %v6520_v21, %v6781_v43  ;;  %v2298_v36 = vmul.f32 %v6520_v21, %v6789_v25  ;;  %v2299_v10 = vmul.f32 %v6520_v21, %v6791_v32  ;;  %v2301_v50 = vmul.f32 %v6520_v21, %v6793_v8 }
 0x2d4   : > { %v2303_v12 = vmul.f32 %v6520_v21, %v6767_v57  ;;  %v2315_v49 = vadd.f32 %v2283_v15, %v2214_v63  ;;  %v2316_v61 = vadd.f32 %v2284_v23, %v2215_v42  ;;  %v2317_v51 = vadd.f32 %v2285_v54, %v2216_v27  ;;  %v8809_v27 = vld [vmem:[#allocation77_spill] sm:$0xff]  ;;  %v8818_v15 = vld [vmem:[#allocation68_spill] sm:$0xff]  ;;  %v8819_v54 = vld [vmem:[#allocation63_spill] sm:$0xff] }
 0x2d5   : > { %v2318_v47 = vadd.f32 %v2286_v35, %v2217_v6  ;;  %v2319_v18 = vadd.f32 %v2287_v37, %v2218_v44  ;;  %v2320_v22 = vadd.f32 %v2288_v3, %v2219_v56  ;;  %v2321_v45 = vadd.f32 %v2289_v59, %v2220_v1  ;;  %v8807_v56 = vld [vmem:[#allocation75_spill] sm:$0xff] }
 0x2d6   : > { %v2322_v43 = vadd.f32 %v2290_v29, %v2221_v0  ;;  %v2323_v26 = vadd.f32 %v2291_v24, %v2222_v4  ;;  %v2324_v34 = vadd.f32 %v2292_v16, %v2223_v20  ;;  %v2325_v25 = vadd.f32 %v2293_v19, %v2224_v41  ;;  %v8811_v20 = vld [vmem:[#allocation79_spill] sm:$0xff] }
 0x2d7   : > { %v2326_v28 = vadd.f32 %v2294_v7, %v2225_v14  ;;  %v2327_v60 = vadd.f32 %v2295_v55, %v2226_v5  ;;  %v2328_v32 = vadd.f32 %v2296_v58, %v6660_v52  ;;  %v2329_v17 = vadd.f32 %v2297_v33, %v2228_v48  ;;  %v8808_v52 = vld [vmem:[#allocation76_spill] sm:$0xff]  ;;  %v8812_v14 = vld [vmem:[#allocation66_spill] sm:$0xff]  ;;  %v8813_v33 = vld [vmem:[#allocation81_spill] sm:$0xff] }
 0x2d8   : > { %v2330_v8 = vadd.f32 %v2298_v36, %v6662_v9  ;;  %v2331_v31 = vadd.f32 %v2299_v10, %v2230_v46  ;;  %v2333_v57 = vadd.f32 %v2301_v50, %v2232_v11  ;;  %v2335_v63 = vadd.f32 %v2303_v12, %v2234_v30  ;;  %v8814_v5 = vld [vmem:[#allocation62_spill] sm:$0xff]  ;;  %v8816_v10 = vld [vmem:[#allocation83_spill] sm:$0xff]  ;;  %v8817_v12 = vld [vmem:[#allocation84_spill] sm:$0xff] }
 0x2d9   : > { %v2337_v42 = vadd.f32 %v6665_v2, %v6673_v53  ;;  %v2384_v44 = vmul.f32 %v6512_v40, %v6629_v39  ;;  %v2385_v0 = vmul.f32 %v6512_v40, %v6631_v38  ;;  %v2386_v55 = vmul.f32 %v6512_v40, %v6633_v62  ;;  %v8810_v53 = vld [vmem:[#allocation78_spill] sm:$0xff] }
 0x2da   : > { %v2387_v1 = vmul.f32 %v6512_v40, %v6650_v13  ;;  %v2388_v9 = vmul.f32 %v6512_v40, %v8807_v56  ;;  %v2389_v6 = vmul.f32 %v6512_v40, %v8808_v52  ;;  %v2390_v2 = vmul.f32 %v6512_v40, %v8809_v27  ;;  %v8815_v46 = vld [vmem:[#allocation82_spill] sm:$0xff] }
 0x2db   : > { %v2391_v4 = vmul.f32 %v6512_v40, %v8810_v53  ;;  %v2392_v41 = vmul.f32 %v6512_v40, %v8811_v20  ;;  %v2393_v58 = vmul.f32 %v6512_v40, %v8812_v14  ;;  %v2394_v36 = vmul.f32 %v6512_v40, %v8813_v33 }
 0x2dc   : > { %v2395_v48 = vmul.f32 %v6512_v40, %v8814_v5  ;;  %v2396_v11 = vmul.f32 %v6512_v40, %v8815_v46  ;;  %v2398_v50 = vmul.f32 %v6512_v40, %v8816_v10  ;;  %v2400_v30 = vmul.f32 %v6512_v40, %v8817_v12  ;;  %v8820_v12 = vld [vmem:[#allocation72_spill] sm:$0xff] }
 0x2dd   : > { %v2402_v23 = vmul.f32 %v6512_v40, %v8818_v15  ;;  %v2404_v35 = vmul.f32 %v6512_v40, %v8819_v54  ;;  %v2416_v37 = vadd.f32 %v2384_v44, %v2315_v49  ;;  %v2417_v3 = vadd.f32 %v2385_v0, %v2316_v61  ;;  %v8821_v15 = vld [vmem:[#allocation80_spill] sm:$0xff]  ;;  %v8822_v61 = vld [vmem:[#allocation45_spill] sm:$0xff]  ;;  %v8833_v0 = vld [vmem:[#allocation35_spill] sm:$0xff] }
 0x2de   : > { %v2418_v59 = vadd.f32 %v2386_v55, %v2317_v51  ;;  %v2419_v29 = vadd.f32 %v2387_v1, %v2318_v47  ;;  %v2420_v24 = vadd.f32 %v2388_v9, %v2319_v18  ;;  %v2421_v16 = vadd.f32 %v2389_v6, %v2320_v22  ;;  %v8823_v47 = vld [vmem:[#allocation64_spill] sm:$0xff]  ;;  %v8824_v18 = vld [vmem:[#allocation70_spill] sm:$0xff]  ;;  %v8835_v6 = vld [vmem:[#allocation17_spill] sm:$0xff] }
 0x2df   : > { %v2422_v19 = vadd.f32 %v2390_v2, %v2321_v45  ;;  %v2423_v7 = vadd.f32 %v2391_v4, %v2322_v43  ;;  %v2424_v14 = vadd.f32 %v2392_v41, %v2323_v26  ;;  %v2425_v5 = vadd.f32 %v2393_v58, %v2324_v34  ;;  %v8825_v45 = vld [vmem:[#allocation23_spill] sm:$0xff]  ;;  %v8826_v43 = vld [vmem:[#allocation41_spill] sm:$0xff]  ;;  %v8827_v34 = vld [vmem:[#allocation24_spill] sm:$0xff] }
 0x2e0   : > { %v2426_v10 = vadd.f32 %v2394_v36, %v2325_v25  ;;  %v2427_v46 = vadd.f32 %v2395_v48, %v2326_v28  ;;  %v2428_v33 = vadd.f32 %v2396_v11, %v2327_v60  ;;  %v2429_v20 = vadd.f32 %v8820_v12, %v2328_v32  ;;  %v8828_v60 = vld [vmem:[#allocation25_spill] sm:$0xff]  ;;  %v8834_v1 = vld [vmem:[#allocation36_spill] sm:$0xff]  ;;  %v8837_v58 = vld [vmem:[#allocation50_spill] sm:$0xff] }
 0x2e1   : > { %v2430_v53 = vadd.f32 %v2398_v50, %v2329_v17  ;;  %v2431_v27 = vadd.f32 %v8821_v15, %v2330_v8  ;;  %v2432_v52 = vadd.f32 %v2400_v30, %v2331_v31  ;;  %v2434_v54 = vadd.f32 %v2402_v23, %v2333_v57  ;;  %v8829_v17 = vld [vmem:[#allocation26_spill] sm:$0xff]  ;;  %v8830_v31 = vld [vmem:[#allocation27_spill] sm:$0xff]  ;;  %v8831_v8 = vld [vmem:[#allocation33_spill] sm:$0xff] }
 0x2e2   : > { %v2436_v49 = vadd.f32 %v2404_v35, %v2335_v63  ;;  %v2438_v51 = vadd.f32 %v8822_v61, %v2337_v42  ;;  %v2439_v22 = vadd.f32 %v8824_v18, %v8823_v47  ;;  %v2485_v26 = vmul.f32 %v8826_v43, %v8825_v45  ;;  %v8832_v42 = vld [vmem:[#allocation34_spill] sm:$0xff]  ;;  %v8836_v4 = vld [vmem:[#allocation49_spill] sm:$0xff]  ;;  %v8840_v30 = vld [vmem:[#allocation51_spill] sm:$0xff] }
 0x2e3   : > { %v2486_v28 = vmul.f32 %v8826_v43, %v8827_v34  ;;  %v2487_v25 = vmul.f32 %v8826_v43, %v8828_v60  ;;  %v2488_v32 = vmul.f32 %v8826_v43, %v8829_v17  ;;  %v2489_v57 = vmul.f32 %v8826_v43, %v8830_v31  ;;  %v8838_v48 = vld [vmem:[#allocation37_spill] sm:$0xff]  ;;  %v8839_v50 = vld [vmem:[#allocation38_spill] sm:$0xff]  ;;  %v8841_v35 = vld [vmem:[#allocation52_spill] sm:$0xff] }
 0x2e4   : > { %v2490_v63 = vmul.f32 %v8826_v43, %v8831_v8  ;;  %v2491_v44 = vmul.f32 %v8826_v43, %v8832_v42  ;;  %v2492_v55 = vmul.f32 %v8826_v43, %v8833_v0  ;;  %v2493_v9 = vmul.f32 %v8826_v43, %v8834_v1  ;;  %v8842_v61 = vld [vmem:[#allocation53_spill] sm:$0xff]  ;;  %v8843_v18 = vld [vmem:[#allocation39_spill] sm:$0xff] }
 0x2e5   : > { %v2494_v2 = vmul.f32 %v8826_v43, %v8835_v6  ;;  %v2495_v41 = vmul.f32 %v8826_v43, %v8836_v4  ;;  %v2496_v36 = vmul.f32 %v8826_v43, %v8837_v58  ;;  %v2497_v11 = vmul.f32 %v8826_v43, %v8838_v48  ;;  %v6965_v48 = vld [vmem:[#allocation2 + $0x38] sm:$0xff] }
 0x2e6   : > { %v2498_v12 = vmul.f32 %v8826_v43, %v8839_v50  ;;  %v2499_v23 = vmul.f32 %v8826_v43, %v8840_v30  ;;  %v2501_v15 = vmul.f32 %v8826_v43, %v8841_v35  ;;  %v2503_v47 = vmul.f32 %v8826_v43, %v8842_v61  ;;  %v8869_v61 = vld [vmem:[#allocation29_spill] sm:$0xff] }
 0x2e7   : > { %v2505_v45 = vmul.f32 %v8826_v43, %v8843_v18  ;;  %v6906_v34 = vadd.f32 %v2485_v26, %v2416_v37  ;;  %v6908_v60 = vadd.f32 %v2486_v28, %v2417_v3  ;;  %v6910_v17 = vadd.f32 %v2487_v25, %v2418_v59 }
 0x2e8   : > { %v6912_v31 = vadd.f32 %v2488_v32, %v2419_v29  ;;  %v6914_v8 = vadd.f32 %v2489_v57, %v2420_v24  ;;  %v6916_v42 = vadd.f32 %v2490_v63, %v2421_v16  ;;  %v6918_v0 = vadd.f32 %v2491_v44, %v2422_v19  ;;  %v8855_v16 = vld [vmem:[#allocation71_spill] sm:$0xff]  ;;  %v2139_v32 = vld [vmem:[#allocation2 + $0x9] sm:$0xff] }
 0x2e9   : > { %v6920_v1 = vadd.f32 %v2492_v55, %v2423_v7  ;;  %v6922_v6 = vadd.f32 %v2493_v9, %v2424_v14  ;;  %v6924_v4 = vadd.f32 %v2494_v2, %v2425_v5  ;;  %v6926_v37 = vadd.f32 %v2495_v41, %v2426_v10  ;;  %v8860_v5 = vld [vmem:[#allocation46_spill] sm:$0xff]  ;;  %v8868_v57 = vld [vmem:[#allocation40_spill] sm:$0xff]  ;;  %v2040_v2 = vld [vmem:[#allocation2 + $0x20] sm:$0xff] }
 0x2ea   : > { %8844 = vst [vmem:[#allocation75_spill] sm:$0xff] %v6914_v8  ;;  %8845 = vst [vmem:[#allocation66_spill] sm:$0xff] %v6916_v42  ;;  %v6928_v3 = vadd.f32 %v2496_v36, %v2427_v46  ;;  %v6930_v59 = vadd.f32 %v2497_v11, %v2428_v33  ;;  %v6932_v29 = vadd.f32 %v2498_v12, %v2429_v20  ;;  %v8861_v46 = vld [vmem:[#allocation73_spill] sm:$0xff]  ;;  %v8864_v20 = vld [vmem:[#allocation74_spill] sm:$0xff] }
 0x2eb   : > { %8846 = vst [vmem:[#allocation62_spill] sm:$0xff] %v6918_v0  ;;  %8847 = vst [vmem:[#allocation68_spill] sm:$0xff] %v6920_v1  ;;  %v6934_v24 = vadd.f32 %v2499_v23, %v2430_v53  ;;  %v6937_v26 = vadd.f32 %v8855_v16, %v2431_v27  ;;  %v6939_v19 = vadd.f32 %v2501_v15, %v2432_v52  ;;  %v8863_v33 = vld [vmem:[#allocation65_spill] sm:$0xff]  ;;  %v2138_v53 = vld [vmem:[#allocation2 + $0x1] sm:$0xff] }
 0x2ec   : > { %8848 = vst [vmem:[#allocation63_spill] sm:$0xff] %v6922_v6  ;;  %8849 = vst [vmem:[#allocation72_spill] sm:$0xff] %v6924_v4  ;;  %v6941_v7 = vadd.f32 %v2503_v47, %v2434_v54  ;;  %v6943_v14 = vadd.f32 %v2505_v45, %v2436_v49  ;;  %v6946_v10 = vadd.f32 %v8860_v5, %v2438_v51  ;;  %v6955_v27 = vld [vmem:[#allocation2] sm:$0xff]  ;;  %v2240_v44 = vld [vmem:[#allocation2 + $0xa] sm:$0xff] }
 0x2ed   : > { %8850 = vst [vmem:[#allocation80_spill] sm:$0xff] %v6926_v37  ;;  %8851 = vst [vmem:[#allocation45_spill] sm:$0xff] %v6928_v3  ;;  %v6949_v28 = vadd.f32 %v8861_v46, %v2439_v22  ;;  %v6953_v25 = vadd.f32 %v8864_v20, %v8863_v33  ;;  %v8867_v52 = vld [vmem:[#allocation55_spill] sm:$0xff]  ;;  %v2175_v49 = vmul.f32 %v8868_v57, %v2138_v53  ;;  %v2039_v55 = vld [vmem:[#allocation2 + $0x18] sm:$0xff] }
 0x2ee   : > { %8852 = vst [vmem:[#allocation64_spill] sm:$0xff] %v6930_v59  ;;  %8853 = vst [vmem:[#allocation70_spill] sm:$0xff] %v6932_v29  ;;  %v2074_v54 = vmul.f32 %v6955_v27, %v8867_v52  ;;  %v2176_v63 = vmul.f32 %v8868_v57, %v2139_v32  ;;  %v2239_v51 = vld [vmem:[#allocation2 + $0x2] sm:$0xff]  ;;  %v6962_v41 = vld [vmem:[#allocation2 + $0x30] sm:$0xff]  ;;  %v2277_v36 = vmul.f32 %v6520_v21, %v2240_v44 }
 0x2ef   : > { %8854 = vst [vmem:[#allocation23_spill] sm:$0xff] %v6934_v24  ;;  %8856 = vst [vmem:[#allocation41_spill] sm:$0xff] %v6937_v26  ;;  %v2276_v9 = vmul.f32 %v6520_v21, %v2239_v51  ;;  %v6967_v11 = vld [vmem:[#allocation2 + $0x48] sm:$0xff]  ;;  %v2076_v50 = vmul.f32 %v8867_v52, %v2039_v55  ;;  %v2077_v12 = vmul.f32 %v8867_v52, %v2040_v2  ;;  %v8870_v45 = vld [vmem:[#allocation47_spill] sm:$0xff] }
 0x2f0   : > { %8857 = vst [vmem:[#allocation24_spill] sm:$0xff] %v6939_v19  ;;  %8858 = vst [vmem:[#allocation25_spill] sm:$0xff] %v6941_v7  ;;  %v2207_v22 = vadd.f32 %v2175_v49, %v2074_v54  ;;  %v2208_v58 = vadd.f32 %v2176_v63, %v2074_v54  ;;  %v2078_v30 = vmul.f32 %v8867_v52, %v6962_v41  ;;  %v8871_v16 = vld [vmem:[#allocation59_spill] sm:$0xff]  ;;  %v8872_v46 = vld [vmem:[#allocation44_spill] sm:$0xff] }
 0x2f1   : > { %8859 = vst [vmem:[#allocation26_spill] sm:$0xff] %v6943_v14  ;;  %8862 = vst [vmem:[#allocation27_spill] sm:$0xff] %v6949_v28  ;;  %v2079_v35 = vmul.f32 %v8867_v52, %v6965_v48  ;;  %v2080_v15 = vmul.f32 %v8867_v52, %v6967_v11  ;;  %v2177_v47 = vmul.f32 %v8868_v57, %v8869_v61  ;;  %v8873_v20 = vld [vmem:[#allocation20_spill] sm:$0xff]  ;;  %v8874_v32 = vld [vmem:[#allocation21_spill] sm:$0xff] }
 0x2f2   : > { %8865 = vst [vmem:[#allocation33_spill] sm:$0xff] %v6953_v25  ;;  %8866 = vst [vmem:[#allocation34_spill] sm:$0xff] %v6955_v27  ;;  %v2308_v23 = vadd.f32 %v2276_v9, %v2207_v22  ;;  %v2309_v18 = vadd.f32 %v2277_v36, %v2208_v58  ;;  %v2708_v5 = vmul.f32 %v8871_v16, %v8870_v45  ;;  %v2241_v49 = vld [vmem:[#allocation2 + $0x1a] sm:$0xff]  ;;  %v2242_v45 = vld [vmem:[#allocation2 + $0x22] sm:$0xff] }
 0x2f3   : > { %v2709_v33 = vmul.f32 %v8871_v16, %v8872_v46  ;;  %v2178_v53 = vmul.f32 %v8868_v57, %v8873_v20  ;;  %v2179_v54 = vmul.f32 %v8868_v57, %v8874_v32  ;;  %v8875_v63 = vld [vmem:[#allocation54_spill] sm:$0xff]  ;;  %v8876_v51 = vld [vmem:[#allocation43_spill] sm:$0xff]  ;;  %v2209_v36 = vadd.f32 %v2177_v47, %v2076_v50  ;;  %v7003_v26 = vld [vmem:[#allocation2 + $0x4a] sm:$0xff] }
 0x2f4   : > { %v6989_v52 = vmul.f32 %v8876_v51, %v8875_v63  ;;  %v8877_v44 = vld [vmem:[#allocation30_spill] sm:$0xff]  ;;  %v8878_v9 = vld [vmem:[#allocation31_spill] sm:$0xff]  ;;  %v8881_v24 = vld [vmem:[#allocation56_spill] sm:$0xff]  ;;  %v2278_v47 = vmul.f32 %v6520_v21, %v2241_v49  ;;  %v2380_v1 = vmul.f32 %v6512_v40, %v6965_v48 }
 0x2f5   : > { %v2180_v22 = vmul.f32 %v8868_v57, %v8877_v44  ;;  %v2181_v58 = vmul.f32 %v8868_v57, %v8878_v9  ;;  %v6995_v46 = vld [vmem:[#allocation2 + $0x32] sm:$0xff]  ;;  %v8880_v27 = vld [vmem:[#allocation19_spill] sm:$0xff]  ;;  %v2210_v7 = vadd.f32 %v2178_v53, %v2077_v12  ;;  %v2211_v19 = vadd.f32 %v2179_v54, %v2078_v30  ;;  %v7008_v59 = vld [vmem:[#allocation2 + $0x16a] sm:$0xff] }
 0x2f6   : > { %v8879_v25 = vld [vmem:[#allocation18_spill] sm:$0xff]  ;;  %v2810_v14 = vmul.f32 %v8876_v51, %v8880_v27  ;;  %v2704_v29 = vmul.f32 %v8871_v16, %v8881_v24  ;;  %8882 = vst [vmem:[#allocation35_spill] sm:$0xff] %v7008_v59  ;;  %v2280_v27 = vmul.f32 %v6520_v21, %v6995_v46  ;;  %v2377_v12 = vmul.f32 %v6512_v40, %v2039_v55 }
 0x2f7   : > { %v2809_v28 = vmul.f32 %v8876_v51, %v8879_v25  ;;  %v7001_v63 = vld [vmem:[#allocation2 + $0x3a] sm:$0xff]  ;;  %v2212_v57 = vadd.f32 %v2180_v22, %v2079_v35  ;;  %v2213_v50 = vadd.f32 %v2181_v58, %v2080_v15  ;;  %v2279_v25 = vmul.f32 %v6520_v21, %v2242_v45  ;;  %v8883_v15 = vld [vmem:[#allocation57_spill] sm:$0xff] }
 0x2f8   : > { %v2378_v30 = vmul.f32 %v6512_v40, %v2040_v2  ;;  %v2281_v53 = vmul.f32 %v6520_v21, %v7001_v63  ;;  %v2282_v24 = vmul.f32 %v6520_v21, %v7003_v26  ;;  %v2310_v35 = vadd.f32 %v2278_v47, %v2209_v36  ;;  %v8884_v54 = vld [vmem:[#allocation42_spill] sm:$0xff]  ;;  %v8886_v21 = vld [vmem:[#allocation60_spill] sm:$0xff] }
 0x2f9   : > { %v2603_v22 = vmul.f32 %v8884_v54, %v8883_v15  ;;  %v2311_v58 = vadd.f32 %v2279_v25, %v2210_v7  ;;  %v2312_v3 = vadd.f32 %v2280_v27, %v2211_v19  ;;  %v2607_v37 = vmul.f32 %v8884_v54, %v7008_v59  ;;  %v8885_v4 = vld [vmem:[#allocation58_spill] sm:$0xff]  ;;  %v8887_v15 = vld [vmem:[#allocation61_spill] sm:$0xff] }
 0x2fa   : > { %v2608_v55 = vmul.f32 %v8884_v54, %v8885_v4  ;;  %v2313_v6 = vadd.f32 %v2281_v53, %v2212_v57  ;;  %v2379_v2 = vmul.f32 %v6512_v40, %v6962_v41  ;;  %v2409_v47 = vadd.f32 %v2377_v12, %v2308_v23  ;;  %v8888_v4 = vld [vmem:[#allocation67_spill] sm:$0xff]  ;;  %v8889_v53 = vld [vmem:[#allocation69_spill] sm:$0xff] }
 0x2fb   : > { %v2635_v36 = vadd.f32 %v2603_v22, %v8886_v21  ;;  %v2410_v0 = vadd.f32 %v2378_v30, %v2309_v18  ;;  %v2639_v7 = vadd.f32 %v2607_v37, %v8887_v15  ;;  %v2314_v25 = vadd.f32 %v2282_v24, %v2213_v50 }
 0x2fc   : > { %v2640_v19 = vadd.f32 %v2608_v55, %v6946_v10  ;;  %v2381_v27 = vmul.f32 %v6512_v40, %v6967_v11  ;;  %v2382_v57 = vmul.f32 %v6512_v40, %v8888_v4  ;;  %v2383_v59 = vmul.f32 %v6512_v40, %v8889_v53 }
 0x2fd   : > { %v2411_v42 = vadd.f32 %v2379_v2, %v2310_v35  ;;  %v2412_v8 = vadd.f32 %v2380_v1, %v2311_v58  ;;  %v2478_v23 = vmul.f32 %v8826_v43, %v8869_v61  ;;  %v2479_v37 = vmul.f32 %v8826_v43, %v8873_v20  ;;  %v8890_v61 = vld [vmem:[#allocation32_spill] sm:$0xff] }
 0x2fe   : > { %v2413_v18 = vadd.f32 %v2381_v27, %v2312_v3  ;;  %v2414_v10 = vadd.f32 %v2382_v57, %v2313_v6  ;;  %v2480_v50 = vmul.f32 %v8826_v43, %v8874_v32  ;;  %v2736_v12 = vadd.f32 %v2704_v29, %v2635_v36  ;;  %v8891_v3 = vld [vmem:[#allocation22_spill] sm:$0xff]  ;;  %v8899_v57 = vld [vmem:[#allocation89_spill] sm:$0xff] }
 0x2ff   : > { %v2510_v30 = vadd.f32 %v2478_v23, %v2409_v47  ;;  %v2511_v24 = vadd.f32 %v2479_v37, %v2410_v0  ;;  %v2740_v22 = vadd.f32 %v2708_v5, %v2639_v7  ;;  %v2741_v55 = vadd.f32 %v2709_v33, %v2640_v19  ;;  %v8897_v7 = vld [vmem:[#allocation87_spill] sm:$0xff]  ;;  %v2744_v37 = vld [vmem:[#allocation2 + $0x31] sm:$0xff] }
 0x300   : > { %v2415_v21 = vadd.f32 %v2383_v59, %v2314_v25  ;;  %v2481_v40 = vmul.f32 %v8826_v43, %v8877_v44  ;;  %v2482_v1 = vmul.f32 %v8826_v43, %v8878_v9  ;;  %v2483_v20 = vmul.f32 %v8826_v43, %v8890_v61  ;;  %v8898_v25 = vld [vmem:[#allocation88_spill] sm:$0xff] }
 0x301   : > { %v2484_v6 = vmul.f32 %v8826_v43, %v8891_v3  ;;  %v2512_v35 = vadd.f32 %v2480_v50, %v2411_v42  ;;  %v2579_v29 = vmul.f32 %v8884_v54, %v2241_v49  ;;  %v2580_v0 = vmul.f32 %v8884_v54, %v2242_v45  ;;  %v8895_v45 = vld [vmem:[#allocation85_spill] sm:$0xff] }
 0x302   : > { %v2513_v5 = vadd.f32 %v2481_v40, %v2412_v8  ;;  %v2514_v33 = vadd.f32 %v2482_v1, %v2413_v18  ;;  %v2581_v59 = vmul.f32 %v8884_v54, %v6995_v46  ;;  %v7057_v32 = vadd.f32 %v6989_v52, %v2736_v12  ;;  %v2745_v18 = vld [vmem:[#allocation2 + $0x39] sm:$0xff] }
 0x303   : > { %v2611_v44 = vadd.f32 %v2579_v29, %v2510_v30  ;;  %v2612_v9 = vadd.f32 %v2580_v0, %v2511_v24  ;;  %v7059_v58 = vadd.f32 %v2809_v28, %v2740_v22  ;;  %v7061_v2 = vadd.f32 %v2810_v14, %v2741_v55  ;;  %v8896_v14 = vld [vmem:[#allocation86_spill] sm:$0xff]  ;;  %v8901_v30 = vld [vmem:[#allocation91_spill] sm:$0xff]  ;;  %v8902_v22 = vld [vmem:[#allocation92_spill] sm:$0xff] }
 0x304   : > { %8892 = vst [vmem:[#allocation36_spill] sm:$0xff] %v7057_v32  ;;  %v2515_v43 = vadd.f32 %v2483_v20, %v2414_v10  ;;  %v2516_v42 = vadd.f32 %v2484_v6, %v2415_v21  ;;  %v2582_v49 = vmul.f32 %v8884_v54, %v7001_v63  ;;  %v2583_v8 = vmul.f32 %v8884_v54, %v7003_v26  ;;  %v8900_v10 = vld [vmem:[#allocation90_spill] sm:$0xff]  ;;  %v8903_v21 = vld [vmem:[#allocation93_spill] sm:$0xff]  ;;  %v8904_v1 = vld [vmem:[#allocation95_spill] sm:$0xff] }
 0x305   : > { %8893 = vst [vmem:[#allocation17_spill] sm:$0xff] %v7059_v58  ;;  %8894 = vst [vmem:[#allocation49_spill] sm:$0xff] %v7061_v2  ;;  %v2584_v36 = vmul.f32 %v8884_v54, %v8895_v45  ;;  %v2613_v47 = vadd.f32 %v2581_v59, %v2512_v35  ;;  %v2680_v52 = vmul.f32 %v8871_v16, %v6962_v41  ;;  %v2746_v20 = vld [vmem:[#allocation2 + $0x49] sm:$0xff]  ;;  %v7105_v29 = vld [vmem:[#allocation9 + $0x8] ss:$0 sm:$0xff] }
 0x306   : > { %v2681_v28 = vmul.f32 %v8871_v16, %v6965_v48  ;;  %v2585_v15 = vmul.f32 %v8884_v54, %v8896_v14  ;;  %v2586_v19 = vmul.f32 %v8884_v54, %v8897_v7  ;;  %v2587_v27 = vmul.f32 %v8884_v54, %v8898_v25  ;;  %v8905_v0 = vld [vmem:[#allocation96_spill] sm:$0xff] }
 0x307   : > { %v2588_v23 = vmul.f32 %v8884_v54, %v8899_v57  ;;  %v7083_v41 = vmul.f32 %v8884_v54, %v8900_v10  ;;  %v2682_v48 = vmul.f32 %v8871_v16, %v6967_v11  ;;  %v2712_v50 = vadd.f32 %v2680_v52, %v2611_v44  ;;  %v8906_v44 = vld [vmem:[#allocation97_spill] sm:$0xff]  ;;  %v8907_v52 = vld [vmem:[#allocation98_spill] sm:$0xff]  ;;  %v8909_v58 = vld [vmem:[#allocation100_spill] sm:$0xff] }
 0x308   : > { %v2713_v12 = vadd.f32 %v2681_v28, %v2612_v9  ;;  %v7089_v24 = vmul.f32 %v8884_v54, %v8901_v30  ;;  %v7093_v55 = vmul.f32 %v8884_v54, %v8902_v22  ;;  %v7097_v40 = vmul.f32 %v8884_v54, %v8903_v21 }
 0x309   : > { %v7101_v61 = vmul.f32 %v8884_v54, %v8904_v1  ;;  %v2614_v11 = vadd.f32 %v2582_v49, %v2513_v5  ;;  %v2714_v3 = vadd.f32 %v2682_v48, %v2613_v47  ;;  %v2781_v6 = vmul.f32 %v8876_v51, %v2744_v37  ;;  %v8908_v48 = vld [vmem:[#allocation99_spill] sm:$0xff] }
 0x30a   : > { %v2782_v35 = vmul.f32 %v8876_v51, %v2745_v18  ;;  %v7109_v59 = vmul.f32 %v8884_v54, %v8905_v0  ;;  %v7113_v9 = vmul.f32 %v8884_v54, %v8906_v44  ;;  %v7117_v28 = vmul.f32 %v8884_v54, %v8907_v52 }
 0x30b   : > { %v2615_v5 = vadd.f32 %v2583_v8, %v2514_v33  ;;  %v2683_v49 = vmul.f32 %v8871_v16, %v8888_v4  ;;  %v2783_v47 = vmul.f32 %v8876_v51, %v2746_v20  ;;  %v2813_v37 = vadd.f32 %v2781_v6, %v2712_v50  ;;  %v2747_v33 = vld [vmem:[#allocation2 + $0x51] sm:$0xff] }
 0x30c   : > { %v2814_v18 = vadd.f32 %v2782_v35, %v2713_v12  ;;  %v7124_v2 = vmul.f32 %v8884_v54, %v8908_v48  ;;  %v7128_v32 = vmul.f32 %v8884_v54, %v8909_v58  ;;  %v2616_v44 = vadd.f32 %v2584_v36, %v2515_v43  ;;  %v8910_v12 = vld [vmem:[#allocation101_spill] sm:$0xff]  ;;  %v2748_v35 = vld [vmem:[#allocation2 + $0x61] sm:$0xff] }
 0x30d   : > { %v2684_v52 = vmul.f32 %v8871_v16, %v8889_v53  ;;  %v2715_v8 = vadd.f32 %v2683_v49, %v2614_v11  ;;  %v2815_v0 = vadd.f32 %v2783_v47, %v2714_v3  ;;  %v2882_v4 = vmul.f32 %v7105_v29, %v6995_v46  ;;  %v8912_v47 = vld [vmem:[#allocation28_spill] sm:$0xff] }
 0x30e   : > { %v2883_v50 = vmul.f32 %v7105_v29, %v7001_v63  ;;  %v7138_v20 = vmul.f32 %v8884_v54, %v8910_v12  ;;  %v2617_v6 = vadd.f32 %v2585_v15, %v2516_v42  ;;  %v2685_v43 = vmul.f32 %v8871_v16, %v6629_v39  ;;  %v8911_v63 = vld [vmem:[#allocation102_spill] sm:$0xff] }
 0x30f   : > { %v2716_v36 = vadd.f32 %v2684_v52, %v2615_v5  ;;  %v2784_v53 = vmul.f32 %v8876_v51, %v2747_v33  ;;  %v2884_v11 = vmul.f32 %v7105_v29, %v7003_v26  ;;  %v7145_v3 = vadd.f32 %v2882_v4, %v2813_v37  ;;  %v2749_v52 = vld [vmem:[#allocation2 + $0x69] sm:$0xff]  ;;  %v2750_v26 = vld [vmem:[#allocation2 + $0x79] sm:$0xff] }
 0x310   : > { %v7147_v46 = vadd.f32 %v2883_v50, %v2814_v18  ;;  %v7151_v49 = vmul.f32 %v8884_v54, %v8911_v63  ;;  %v7155_v42 = vmul.f32 %v8884_v54, %v8912_v47  ;;  %v2618_v39 = vadd.f32 %v2586_v19, %v6906_v34  ;;  %v8913_v4 = vld [vmem:[#allocation103_spill] sm:$0xff] }
 0x311   : > { %v2686_v15 = vmul.f32 %v8871_v16, %v6631_v38  ;;  %v2717_v5 = vadd.f32 %v2685_v43, %v2616_v44  ;;  %v2785_v37 = vmul.f32 %v8876_v51, %v2748_v35  ;;  %v2816_v18 = vadd.f32 %v2784_v53, %v2715_v8  ;;  %v2751_v63 = vld [vmem:[#allocation2 + $0x81] sm:$0xff] }
 0x312   : > { %v7161_v33 = vadd.f32 %v2884_v11, %v2815_v0  ;;  %v7165_v50 = vmul.f32 %v8884_v54, %v8913_v4  ;;  %v2619_v47 = vadd.f32 %v2587_v27, %v6908_v60  ;;  %v2687_v34 = vmul.f32 %v8871_v16, %v6633_v62  ;;  %v2752_v62 = vld [vmem:[#allocation2 + $0x91] sm:$0xff]  ;;  %v2753_v11 = vld [vmem:[#allocation2 + $0x99] sm:$0xff] }
 0x313   : > { %v2718_v19 = vadd.f32 %v2686_v15, %v2617_v6  ;;  %v2786_v38 = vmul.f32 %v8876_v51, %v2749_v52  ;;  %v2817_v44 = vadd.f32 %v2785_v37, %v2716_v36  ;;  %v2885_v43 = vmul.f32 %v7105_v29, %v8895_v45  ;;  %v8915_v37 = vld [vmem:[#allocation76_spill] sm:$0xff] }
 0x314   : > { %v2948_v0 = vadd.f32 %v7147_v46, %v7145_v3  ;;  %v2620_v8 = vadd.f32 %v2588_v23, %v6910_v17  ;;  %v2688_v54 = vmul.f32 %v8871_v16, %v6650_v13  ;;  %v2719_v60 = vadd.f32 %v2687_v34, %v2618_v39 }
 0x315   : > { %v2787_v27 = vmul.f32 %v8876_v51, %v2750_v26  ;;  %v2818_v6 = vadd.f32 %v2786_v38, %v2717_v5  ;;  %v2886_v35 = vmul.f32 %v7105_v29, %v8896_v14  ;;  %v7181_v36 = vadd.f32 %v2885_v43, %v2816_v18  ;;  %v8914_v5 = vld [vmem:[#allocation75_spill] sm:$0xff]  ;;  %v2754_v18 = vld [vmem:[#allocation2 + $0xa9] sm:$0xff] }
 0x316   : > { %v2949_v45 = vadd.f32 %v2948_v0, %v7161_v33  ;;  %v2621_v53 = vadd.f32 %v7083_v41, %v6912_v31  ;;  %v2689_v17 = vmul.f32 %v8871_v16, %v8807_v56  ;;  %v2720_v23 = vadd.f32 %v2688_v54, %v2619_v47 }
 0x317   : > { %v2788_v13 = vmul.f32 %v8876_v51, %v2751_v63  ;;  %v2819_v39 = vadd.f32 %v2787_v27, %v2718_v19  ;;  %v2887_v15 = vmul.f32 %v7105_v29, %v8897_v7  ;;  %v7191_v52 = vadd.f32 %v2886_v35, %v2817_v44  ;;  %v8916_v19 = vld [vmem:[#allocation66_spill] sm:$0xff]  ;;  %v8917_v44 = vld [vmem:[#allocation77_spill] sm:$0xff] }
 0x318   : > { %v2950_v14 = vadd.f32 %v2949_v45, %v7181_v36  ;;  %v2622_v26 = vadd.f32 %v7089_v24, %v8914_v5  ;;  %v2690_v31 = vmul.f32 %v8871_v16, %v8915_v37  ;;  %v2721_v41 = vadd.f32 %v2689_v17, %v2620_v8  ;;  %v2755_v8 = vld [vmem:[#allocation2 + $0xb1] sm:$0xff] }
 0x319   : > { %v2789_v56 = vmul.f32 %v8876_v51, %v2752_v62  ;;  %v2820_v63 = vadd.f32 %v2788_v13, %v2719_v60  ;;  %v2888_v47 = vmul.f32 %v7105_v29, %v8898_v25  ;;  %v7201_v34 = vadd.f32 %v2887_v15, %v2818_v6  ;;  %v8918_v62 = vld [vmem:[#allocation62_spill] sm:$0xff]  ;;  %v2756_v13 = vld [vmem:[#allocation2 + $0xc1] sm:$0xff] }
 0x31a   : > { %v2951_v7 = vadd.f32 %v2950_v14, %v7191_v52  ;;  %v2623_v38 = vadd.f32 %v7093_v55, %v8916_v19  ;;  %v2691_v24 = vmul.f32 %v8871_v16, %v8917_v44  ;;  %v2722_v43 = vadd.f32 %v2690_v31, %v2621_v53  ;;  %v8919_v35 = vld [vmem:[#allocation78_spill] sm:$0xff]  ;;  %v8920_v15 = vld [vmem:[#allocation68_spill] sm:$0xff] }
 0x31b   : > { %v2790_v0 = vmul.f32 %v8876_v51, %v2753_v11  ;;  %v2821_v54 = vadd.f32 %v2789_v56, %v2720_v23  ;;  %v2889_v60 = vmul.f32 %v7105_v29, %v8899_v57  ;;  %v7211_v27 = vadd.f32 %v2888_v47, %v2819_v39  ;;  %v2657_v17 = vld [vmem:[#allocation2 + $0xd8] sm:$0xff]  ;;  %v2757_v31 = vld [vmem:[#allocation2 + $0xc9] sm:$0xff] }
 0x31c   : > { %v2952_v25 = vadd.f32 %v2951_v7, %v7201_v34  ;;  %v2624_v6 = vadd.f32 %v7097_v40, %v8918_v62  ;;  %v2692_v55 = vmul.f32 %v8871_v16, %v8919_v35  ;;  %v2723_v45 = vadd.f32 %v2691_v24, %v2622_v26  ;;  %v8921_v40 = vld [vmem:[#allocation79_spill] sm:$0xff] }
 0x31d   : > { %v2791_v53 = vmul.f32 %v8876_v51, %v2754_v18  ;;  %v2822_v11 = vadd.f32 %v2790_v0, %v2721_v41  ;;  %v2890_v23 = vmul.f32 %v7105_v29, %v8900_v10  ;;  %v7221_v57 = vadd.f32 %v2889_v60, %v2820_v63  ;;  %v8922_v63 = vld [vmem:[#allocation63_spill] sm:$0xff]  ;;  %v8924_v60 = vld [vmem:[#allocation81_spill] sm:$0xff] }
 0x31e   : > { %v2953_v39 = vadd.f32 %v2952_v25, %v7211_v27  ;;  %v2625_v14 = vadd.f32 %v7101_v61, %v8920_v15  ;;  %v2693_v5 = vmul.f32 %v8871_v16, %v8921_v40  ;;  %v2724_v37 = vadd.f32 %v2692_v55, %v2623_v38  ;;  %v2659_v38 = vld [vmem:[#allocation2 + $0xf0] sm:$0xff]  ;;  %v2758_v44 = vld [vmem:[#allocation2 + $0xd9] sm:$0xff] }
 0x31f   : > { %v2792_v26 = vmul.f32 %v8876_v51, %v2755_v8  ;;  %v2823_v56 = vadd.f32 %v2791_v53, %v2722_v43  ;;  %v2891_v41 = vmul.f32 %v7105_v29, %v8901_v30  ;;  %v7231_v18 = vadd.f32 %v2890_v23, %v2821_v54  ;;  %v8923_v8 = vld [vmem:[#allocation72_spill] sm:$0xff] }
 0x320   : > { %v2954_v10 = vadd.f32 %v2953_v39, %v7221_v57  ;;  %v2626_v47 = vadd.f32 %v7109_v59, %v8922_v63  ;;  %v2694_v61 = vmul.f32 %v8871_v16, %v2657_v17  ;;  %v2725_v7 = vadd.f32 %v2693_v5, %v2624_v6  ;;  %v2759_v6 = vld [vmem:[#allocation2 + $0xe1] sm:$0xff]  ;;  %v2760_v39 = vld [vmem:[#allocation2 + $0xf1] sm:$0xff] }
 0x321   : > { %v2793_v19 = vmul.f32 %v8876_v51, %v2756_v13  ;;  %v2824_v24 = vadd.f32 %v2792_v26, %v2723_v45  ;;  %v2892_v43 = vmul.f32 %v7105_v29, %v8902_v22  ;;  %v7240_v0 = vadd.f32 %v2891_v41, %v2822_v11  ;;  %v8925_v53 = vld [vmem:[#allocation80_spill] sm:$0xff]  ;;  %v8926_v5 = vld [vmem:[#allocation45_spill] sm:$0xff]  ;;  %v8927_v26 = vld [vmem:[#allocation82_spill] sm:$0xff] }
 0x322   : > { %v2955_v30 = vadd.f32 %v2954_v10, %v7231_v18  ;;  %v2627_v54 = vadd.f32 %v7113_v9, %v8923_v8  ;;  %v2695_v59 = vmul.f32 %v8871_v16, %v8924_v60  ;;  %v2726_v25 = vadd.f32 %v2694_v61, %v2625_v14  ;;  %v2661_v23 = vld [vmem:[#allocation2 + $0x108] sm:$0xff]  ;;  %v2761_v41 = vld [vmem:[#allocation2 + $0xf9] sm:$0xff]  ;;  %v8930_v8 = vld [vmem:[#allocation97_spill] sm:$0xff] }
 0x323   : > { %v2794_v62 = vmul.f32 %v8876_v51, %v2757_v31  ;;  %v2825_v35 = vadd.f32 %v2793_v19, %v2724_v37  ;;  %v2893_v55 = vmul.f32 %v7105_v29, %v8903_v21  ;;  %v7250_v45 = vadd.f32 %v2892_v43, %v2823_v56  ;;  %v8928_v63 = vld [vmem:[#allocation96_spill] sm:$0xff] }
 0x324   : > { %v2956_v22 = vadd.f32 %v2955_v30, %v7240_v0  ;;  %v2628_v17 = vadd.f32 %v7117_v28, %v8925_v53  ;;  %v2696_v9 = vmul.f32 %v8871_v16, %v2659_v38  ;;  %v2727_v13 = vadd.f32 %v2695_v59, %v2626_v47  ;;  %v7274_v38 = vld [vmem:[#allocation9 + $0x6] ss:$0 sm:$0xff]  ;;  %v2762_v43 = vld [vmem:[#allocation2 + $0x109] sm:$0xff] }
 0x325   : > { %v2795_v11 = vmul.f32 %v8876_v51, %v2758_v44  ;;  %v2826_v15 = vadd.f32 %v2794_v62, %v2725_v7  ;;  %v2894_v14 = vmul.f32 %v7105_v29, %v8904_v1  ;;  %v7259_v40 = vadd.f32 %v2893_v55, %v2824_v24  ;;  %v8929_v7 = vld [vmem:[#allocation64_spill] sm:$0xff]  ;;  %v2663_v24 = vld [vmem:[#allocation2 + $0x120] sm:$0xff] }
 0x326   : > { %v2957_v21 = vadd.f32 %v2956_v22, %v7250_v45  ;;  %v2629_v37 = vadd.f32 %v7124_v2, %v8926_v5  ;;  %v2697_v28 = vmul.f32 %v8871_v16, %v8927_v26  ;;  %v2728_v31 = vadd.f32 %v2696_v9, %v2627_v54  ;;  %v8932_v62 = vld [vmem:[#allocation83_spill] sm:$0xff]  ;;  %v2763_v22 = vld [vmem:[#allocation2 + $0x111] sm:$0xff] }
 0x327   : > { %v2796_v56 = vmul.f32 %v8876_v51, %v2759_v6  ;;  %v2827_v10 = vadd.f32 %v2795_v11, %v2726_v25  ;;  %v2895_v47 = vmul.f32 %v7105_v29, %v8928_v63  ;;  %v7269_v61 = vadd.f32 %v2894_v14, %v2825_v35  ;;  %v8931_v25 = vld [vmem:[#allocation70_spill] sm:$0xff]  ;;  %v7287_v55 = vld [vmem:[#allocation9 + $0x7] ss:$0 sm:$0xff] }
 0x328   : > { %v2958_v1 = vadd.f32 %v2957_v21, %v7259_v40  ;;  %v2630_v19 = vadd.f32 %v7128_v32, %v8929_v7  ;;  %v2698_v2 = vmul.f32 %v7274_v38, %v2661_v23  ;;  %v2729_v16 = vadd.f32 %v2697_v28, %v2628_v17  ;;  %v8933_v17 = vld [vmem:[#allocation98_spill] sm:$0xff]  ;;  %v8934_v23 = vld [vmem:[#allocation23_spill] sm:$0xff] }
 0x329   : > { %v2797_v44 = vmul.f32 %v8876_v51, %v2760_v39  ;;  %v2828_v30 = vadd.f32 %v2796_v56, %v2727_v13  ;;  %v2896_v54 = vmul.f32 %v7105_v29, %v8930_v8  ;;  %v7280_v60 = vadd.f32 %v2895_v47, %v2826_v15  ;;  %v2764_v21 = vld [vmem:[#allocation2 + $0x121] sm:$0xff]  ;;  %v2766_v8 = vld [vmem:[#allocation2 + $0x139] sm:$0xff] }
 0x32a   : > { %v2959_v59 = vadd.f32 %v2958_v1, %v7269_v61  ;;  %v2631_v32 = vadd.f32 %v7138_v20, %v8931_v25  ;;  %v2699_v6 = vmul.f32 %v7274_v38, %v8932_v62  ;;  %v2730_v35 = vadd.f32 %v2698_v2, %v2629_v37  ;;  %v2666_v47 = vld [vmem:[#allocation2 + $0x140] sm:$0xff]  ;;  %v2765_v1 = vld [vmem:[#allocation2 + $0x129] sm:$0xff]  ;;  %v8938_v62 = vld [vmem:[#allocation94_spill] sm:$0xff] }
 0x32b   : > { %v2798_v51 = vmul.f32 %v7287_v55, %v2761_v41  ;;  %v2829_v53 = vadd.f32 %v2797_v44, %v2728_v31  ;;  %v2897_v9 = vmul.f32 %v7105_v29, %v8933_v17  ;;  %v7292_v13 = vadd.f32 %v2896_v54, %v2827_v10  ;;  %v8935_v31 = vld [vmem:[#allocation41_spill] sm:$0xff]  ;;  %v8936_v41 = vld [vmem:[#allocation84_spill] sm:$0xff] }
 0x32c   : > { %v2960_v11 = vadd.f32 %v2959_v59, %v7280_v60  ;;  %v2632_v20 = vadd.f32 %v7151_v49, %v8934_v23  ;;  %v2700_v39 = vmul.f32 %v7274_v38, %v2663_v24  ;;  %v2731_v15 = vadd.f32 %v2699_v6, %v2630_v19  ;;  %v2767_v17 = vld [vmem:[#allocation2 + $0x141] sm:$0xff] }
 0x32d   : > { %v2799_v14 = vmul.f32 %v7287_v55, %v2762_v43  ;;  %v2830_v5 = vadd.f32 %v2798_v51, %v2729_v16  ;;  %v2898_v37 = vmul.f32 %v7105_v29, %v8908_v48  ;;  %v7301_v26 = vadd.f32 %v2897_v9, %v2828_v30  ;;  %v8937_v16 = vld [vmem:[#allocation24_spill] sm:$0xff] }
 0x32e   : > { %v2961_v28 = vadd.f32 %v2960_v11, %v7292_v13  ;;  %v2633_v56 = vadd.f32 %v7155_v42, %v8935_v31  ;;  %v2701_v49 = vmul.f32 %v7274_v38, %v8936_v41  ;;  %v2732_v10 = vadd.f32 %v2700_v39, %v2631_v32  ;;  %v4439_v42 = vld [vmem:[#allocation2 + $0x138] sm:$0xff]  ;;  %v4440_v32 = vld [vmem:[#allocation9 + $0x5] ss:$0 sm:$0xff]  ;;  %v8940_v39 = vld [vmem:[#allocation25_spill] sm:$0xff] }
 0x32f   : > { %v2800_v63 = vmul.f32 %v7287_v55, %v2763_v22  ;;  %v2831_v7 = vadd.f32 %v2799_v14, %v2730_v35  ;;  %v2899_v19 = vmul.f32 %v7105_v29, %v8909_v58  ;;  %v7311_v48 = vadd.f32 %v2898_v37, %v2829_v53  ;;  %v2865_v22 = vld [vmem:[#allocation2 + $0x122] sm:$0xff]  ;;  %v2668_v53 = vld [vmem:[#allocation2 + $0x158] sm:$0xff] }
 0x330   : > { %v2962_v2 = vadd.f32 %v2961_v28, %v7301_v26  ;;  %v2634_v44 = vadd.f32 %v7165_v50, %v8937_v16  ;;  %v2702_v24 = vmul.f32 %v4439_v42, %v7274_v38  ;;  %v2733_v43 = vadd.f32 %v2701_v49, %v2632_v20  ;;  %v8939_v11 = vld [vmem:[#allocation102_spill] sm:$0xff] }
 0x331   : > { %v2801_v30 = vmul.f32 %v7287_v55, %v2764_v21  ;;  %v2832_v54 = vadd.f32 %v2800_v63, %v2731_v15  ;;  %v2900_v59 = vmul.f32 %v7105_v29, %v8910_v12  ;;  %v7320_v25 = vadd.f32 %v2899_v19, %v2830_v5  ;;  %v2867_v63 = vld [vmem:[#allocation2 + $0x13a] sm:$0xff] }
 0x332   : > { %v2963_v58 = vadd.f32 %v2962_v2, %v7311_v48  ;;  %v2604_v6 = vmul.f32 %v4440_v32, %v8938_v62  ;;  %v2703_v50 = vmul.f32 %v7274_v38, %v2666_v47  ;;  %v2734_v35 = vadd.f32 %v2702_v24, %v2633_v56  ;;  %v4441_v56 = vld [vmem:[#allocation2 + $0x15a] sm:$0xff]  ;;  %v2670_v47 = vld [vmem:[#allocation2 + $0x170] sm:$0xff] }
 0x333   : > { %v2802_v51 = vmul.f32 %v7287_v55, %v2765_v1  ;;  %v2833_v9 = vadd.f32 %v2801_v30, %v2732_v10  ;;  %v2901_v23 = vmul.f32 %v7105_v29, %v8939_v11  ;;  %v7328_v12 = vadd.f32 %v2900_v59, %v2831_v7  ;;  %v8941_v16 = vld [vmem:[#allocation26_spill] sm:$0xff]  ;;  %v2572_v30 = vld [vmem:[#allocation2 + $0x182] sm:$0xff] }
 0x334   : > { %v2964_v20 = vadd.f32 %v2963_v58, %v7320_v25  ;;  %v2636_v15 = vadd.f32 %v2604_v6, %v8940_v39  ;;  %v2735_v14 = vadd.f32 %v2703_v50, %v2634_v44  ;;  %v2803_v21 = vmul.f32 %v7287_v55, %v2766_v8  ;;  %v2769_v24 = vld [vmem:[#allocation2 + $0x159] sm:$0xff]  ;;  %v2573_v6 = vld [vmem:[#allocation2 + $0x18a] sm:$0xff] }
 0x335   : > { %v2834_v5 = vadd.f32 %v2802_v51, %v2733_v43  ;;  %v2902_v37 = vmul.f32 %v7105_v29, %v2865_v22  ;;  %v7334_v28 = vadd.f32 %v2901_v23, %v2832_v54  ;;  %v2606_v41 = vmul.f32 %v4441_v56, %v4440_v32  ;;  %v2868_v43 = vld [vmem:[#allocation2 + $0x142] sm:$0xff]  ;;  %v2870_v11 = vld [vmem:[#allocation2 + $0x15a] sm:$0xff] }
 0x336   : > { %v2965_v31 = vadd.f32 %v2964_v20, %v7328_v12  ;;  %v2705_v49 = vmul.f32 %v7274_v38, %v2668_v53  ;;  %v2804_v10 = vmul.f32 %v7287_v55, %v2767_v17  ;;  %v2835_v1 = vadd.f32 %v2803_v21, %v2734_v35  ;;  %v2774_v56 = vld [vmem:[#allocation2 + $0x199] sm:$0xff] }
 0x337   : > { %v2903_v7 = vmul.f32 %v7105_v29, %v8913_v4  ;;  %v7341_v19 = vadd.f32 %v2902_v37, %v2833_v9  ;;  %v2638_v44 = vadd.f32 %v2606_v41, %v8941_v16  ;;  %v2904_v54 = vmul.f32 %v7105_v29, %v2867_v63  ;;  %v2869_v4 = vld [vmem:[#allocation2 + $0x152] sm:$0xff]  ;;  %v8943_v37 = vld [vmem:[#allocation27_spill] sm:$0xff] }
 0x338   : > { %v2966_v2 = vadd.f32 %v2965_v31, %v7334_v28  ;;  %v2737_v42 = vadd.f32 %v2705_v49, %v2636_v15  ;;  %v2836_v8 = vadd.f32 %v2804_v10, %v2735_v14  ;;  %v2707_v62 = vmul.f32 %v7274_v38, %v2670_v47  ;;  %v2771_v9 = vld [vmem:[#allocation2 + $0x171] sm:$0xff]  ;;  %v8944_v10 = vld [vmem:[#allocation36_spill] sm:$0xff] }
 0x339   : > { %v7346_v59 = vadd.f32 %v2903_v7, %v2834_v5  ;;  %v2806_v50 = vmul.f32 %v7287_v55, %v2769_v24  ;;  %v2905_v35 = vmul.f32 %v7105_v29, %v2868_v43  ;;  %v7352_v51 = vadd.f32 %v2904_v54, %v2835_v1  ;;  %v8942_v14 = vld [vmem:[#allocation34_spill] sm:$0xff]  ;;  %v8945_v1 = vld [vmem:[#allocation33_spill] sm:$0xff]  ;;  %v2775_v16 = vld [vmem:[#allocation2 + $0x1a1] sm:$0xff] }
 0x33a   : > { %v2967_v58 = vadd.f32 %v2966_v2, %v7341_v19  ;;  %v2609_v53 = vmul.f32 %v4440_v32, %v2572_v30  ;;  %v2739_v17 = vadd.f32 %v2707_v62, %v2638_v44  ;;  %v2906_v20 = vmul.f32 %v7105_v29, %v2869_v4  ;;  %v2872_v2 = vld [vmem:[#allocation2 + $0x172] sm:$0xff]  ;;  %v8947_v62 = vld [vmem:[#allocation48_spill] sm:$0xff] }
 0x33b   : > { %v2838_v23 = vadd.f32 %v2806_v50, %v2737_v42  ;;  %v7356_v39 = vadd.f32 %v2905_v35, %v2836_v8  ;;  %v2710_v21 = vmul.f32 %v7274_v38, %v8942_v14  ;;  %v2610_v5 = vmul.f32 %v4440_v32, %v2573_v6  ;;  %v8946_v42 = vld [vmem:[#allocation35_spill] sm:$0xff]  ;;  %v8948_v14 = vld [vmem:[#allocation17_spill] sm:$0xff] }
 0x33c   : > { %v2968_v22 = vadd.f32 %v2967_v58, %v7346_v59  ;;  %v2641_v31 = vadd.f32 %v2609_v53, %v8943_v37  ;;  %v2808_v41 = vmul.f32 %v7287_v55, %v2771_v9  ;;  %v2907_v49 = vmul.f32 %v7105_v29, %v2870_v11  ;;  %v2875_v8 = vld [vmem:[#allocation2 + $0x19a] sm:$0xff]  ;;  %v2876_v11 = vld [vmem:[#allocation2 + $0x1a2] sm:$0xff] }
 0x33d   : > { %v2938_v63 = vadd.f32 %v2906_v20, %v8944_v10  ;;  %v2642_v7 = vadd.f32 %v2610_v5, %v8945_v1  ;;  %v2908_v38 = vmul.f32 %v7105_v29, %v8946_v42  ;;  %v2811_v43 = vmul.f32 %v7287_v55, %v2774_v56 }
 0x33e   : > { %v2969_v15 = vadd.f32 %v2968_v22, %v7352_v51  ;;  %v2840_v44 = vadd.f32 %v2808_v41, %v2739_v17  ;;  %v2939_v32 = vadd.f32 %v2907_v49, %v2838_v23  ;;  %v2742_v54 = vadd.f32 %v2710_v21, %v2641_v31  ;;  %v8949_v41 = vld [vmem:[#allocation49_spill] sm:$0xff] }
 0x33f   : > { %v2909_v58 = vmul.f32 %v7105_v29, %v2872_v2  ;;  %v2940_v4 = vadd.f32 %v2908_v38, %v8947_v62  ;;  %v2812_v35 = vmul.f32 %v7287_v55, %v2775_v16  ;;  %v2910_v22 = vmul.f32 %v7105_v29, %v2572_v30 }
 0x340   : > { %v2970_v47 = vadd.f32 %v2969_v15, %v7356_v39  ;;  %v2743_v53 = vadd.f32 %v2710_v21, %v2642_v7  ;;  %v2912_v23 = vmul.f32 %v7105_v29, %v2875_v8  ;;  %v2911_v20 = vmul.f32 %v7105_v29, %v2573_v6 }
 0x341   : > { %v2941_v17 = vadd.f32 %v2909_v58, %v2840_v44  ;;  %v2843_v15 = vadd.f32 %v2811_v43, %v2742_v54  ;;  %v2942_v5 = vadd.f32 %v2910_v22, %v8948_v14  ;;  %v2913_v31 = vmul.f32 %v7105_v29, %v2876_v11 }
 0x342   : > { %v2971_v24 = vadd.f32 %v2970_v47, %v2938_v63  ;;  %v2844_v56 = vadd.f32 %v2812_v35, %v2743_v53  ;;  %v2943_v49 = vadd.f32 %v2911_v20, %v8949_v41 }
 0x343   : > { %v2944_v10 = vadd.f32 %v2912_v23, %v2843_v15 }
 0x344   : > { %v2972_v50 = vadd.f32 %v2971_v24, %v2939_v32  ;;  %v2945_v21 = vadd.f32 %v2913_v31, %v2844_v56 }
 0x346   : > { %v2973_v9 = vadd.f32 %v2972_v50, %v2940_v4 }
 0x348   : > { %v2974_v37 = vadd.f32 %v2973_v9, %v2941_v17 }
 0x34a   : > { %v2975_v55 = vadd.f32 %v2974_v37, %v2942_v5 }
 0x34c   : > { %v2976_v30 = vadd.f32 %v2975_v55, %v2943_v49 }
 0x34e   : > { %v2977_v47 = vadd.f32 %v2976_v30, %v2944_v10 }
 0x350   : > { %v2978_v1 = vadd.f32 %v2977_v47, %v2945_v21 }
 0x352   : > { %v2979_v7 = vrot.slane %v2978_v1, 4 }
 0x354   : > { %v2980_v2 = vadd.f32 %v2979_v7, %v2978_v1 }
 0x356   : > { %v2981_v16 = vrot.slane %v2980_v2, 2 }
 0x358   : > { %v2982_v44 = vadd.f32 %v2981_v16, %v2980_v2 }
 0x35a   : > { %v2983_v6 = vrot.slane %v2982_v44, 1 }
 0x35c   : > { %v2984_v42 = vadd.f32 %v2983_v6, %v2982_v44 }
 0x35e   : > { %v2985_v38 = vmul.f32 0.00390625, %v2984_v42 }
 0x360   : > { %v7380_v24 = vsub.f32 %v7231_v18, %v2985_v38  ;;  %v7383_v29 = vsub.f32 %v7240_v0, %v2985_v38  ;;  %v7386_v43 = vsub.f32 %v7250_v45, %v2985_v38  ;;  %v7389_v8 = vsub.f32 %v7259_v40, %v2985_v38 }
 0x361   : > { %v7392_v54 = vsub.f32 %v7269_v61, %v2985_v38  ;;  %v7395_v58 = vsub.f32 %v7280_v60, %v2985_v38  ;;  %v7398_v62 = vsub.f32 %v7292_v13, %v2985_v38  ;;  %v7401_v18 = vsub.f32 %v7301_v26, %v2985_v38 }
 0x362   : > { %v7404_v0 = vsub.f32 %v7311_v48, %v2985_v38  ;;  %v7407_v45 = vsub.f32 %v7320_v25, %v2985_v38  ;;  %v7410_v40 = vsub.f32 %v7328_v12, %v2985_v38  ;;  %v7413_v61 = vsub.f32 %v7334_v28, %v2985_v38 }
 0x363   : > { %v7416_v60 = vsub.f32 %v7341_v19, %v2985_v38  ;;  %v7419_v13 = vsub.f32 %v7346_v59, %v2985_v38  ;;  %v7422_v26 = vsub.f32 %v7352_v51, %v2985_v38  ;;  %v7425_v48 = vsub.f32 %v7356_v39, %v2985_v38 }
 0x364   : > { %v7427_v25 = vsub.f32 %v2938_v63, %v2985_v38  ;;  %v7429_v50 = vsub.f32 %v2939_v32, %v2985_v38  ;;  %v7431_v12 = vsub.f32 %v2940_v4, %v2985_v38  ;;  %v7433_v28 = vsub.f32 %v2941_v17, %v2985_v38 }
 0x365   : > { %v7435_v35 = vsub.f32 %v2942_v5, %v2985_v38  ;;  %v7437_v19 = vsub.f32 %v2943_v49, %v2985_v38  ;;  %v7439_v59 = vsub.f32 %v2944_v10, %v2985_v38  ;;  %v7441_v22 = vsub.f32 %v2945_v21, %v2985_v38 }
 0x366   : > { %v7444_v51 = vsub.f32 %v7145_v3, %v2985_v38  ;;  %v7447_v39 = vsub.f32 %v7147_v46, %v2985_v38  ;;  %v7450_v63 = vsub.f32 %v7161_v33, %v2985_v38  ;;  %v7457_v53 = vsub.f32 %v7181_v36, %v2985_v38 }
 0x367   : > { %v7460_v17 = vsub.f32 %v7191_v52, %v2985_v38  ;;  %v7465_v9 = vsub.f32 %v7201_v34, %v2985_v38  ;;  %v7470_v23 = vsub.f32 %v7211_v27, %v2985_v38  ;;  %v7475_v52 = vsub.f32 %v7221_v57, %v2985_v38 }
 0x368   : > { %v3018_v32 = vmul.f32 %v7444_v51, %v7444_v51  ;;  %v3019_v4 = vmul.f32 %v7447_v39, %v7447_v39  ;;  %v3020_v3 = vmul.f32 %v7450_v63, %v7450_v63  ;;  %v3021_v33 = vmul.f32 %v7457_v53, %v7457_v53 }
 0x369   : > { %v3022_v36 = vmul.f32 %v7460_v17, %v7460_v17  ;;  %v3023_v15 = vmul.f32 %v7465_v9, %v7465_v9  ;;  %v3024_v34 = vmul.f32 %v7470_v23, %v7470_v23  ;;  %v3025_v37 = vmul.f32 %v7475_v52, %v7475_v52 }
 0x36a   : > { %v3050_v46 = vadd.f32 %v3019_v4, %v3018_v32  ;;  %v3026_v31 = vmul.f32 %v7380_v24, %v7380_v24  ;;  %v3027_v57 = vmul.f32 %v7383_v29, %v7383_v29  ;;  %v3028_v49 = vmul.f32 %v7386_v43, %v7386_v43 }
 0x36b   : > { %v3029_v10 = vmul.f32 %v7389_v8, %v7389_v8  ;;  %v3030_v21 = vmul.f32 %v7392_v54, %v7392_v54  ;;  %v3031_v1 = vmul.f32 %v7395_v58, %v7395_v58  ;;  %v3032_v2 = vmul.f32 %v7398_v62, %v7398_v62 }
 0x36c   : > { %v3051_v11 = vadd.f32 %v3050_v46, %v3020_v3  ;;  %v3033_v44 = vmul.f32 %v7401_v18, %v7401_v18  ;;  %v3034_v42 = vmul.f32 %v7404_v0, %v7404_v0  ;;  %v3035_v32 = vmul.f32 %v7407_v45, %v7407_v45 }
 0x36d   : > { %v3036_v3 = vmul.f32 %v7410_v40, %v7410_v40 }
 0x36e   : > { %v3052_v20 = vadd.f32 %v3051_v11, %v3021_v33  ;;  %v3037_v33 = vmul.f32 %v7413_v61, %v7413_v61 }
 0x370   : > { %v3053_v14 = vadd.f32 %v3052_v20, %v3022_v36  ;;  %v3038_v36 = vmul.f32 %v7416_v60, %v7416_v60 }
 0x372   : > { %v3054_v5 = vadd.f32 %v3053_v14, %v3023_v15  ;;  %v3039_v15 = vmul.f32 %v7419_v13, %v7419_v13 }
 0x374   : > { %v3055_v27 = vadd.f32 %v3054_v5, %v3024_v34  ;;  %v3040_v34 = vmul.f32 %v7422_v26, %v7422_v26 }
 0x376   : > { %v3056_v56 = vadd.f32 %v3055_v27, %v3025_v37  ;;  %v3041_v37 = vmul.f32 %v7425_v48, %v7425_v48 }
 0x378   : > { %v3057_v41 = vadd.f32 %v3056_v56, %v3026_v31  ;;  %v3042_v31 = vmul.f32 %v7427_v25, %v7427_v25 }
 0x37a   : > { %v3058_v55 = vadd.f32 %v3057_v41, %v3027_v57  ;;  %v3043_v57 = vmul.f32 %v7429_v50, %v7429_v50 }
 0x37c   : > { %v3059_v30 = vadd.f32 %v3058_v55, %v3028_v49  ;;  %v3044_v49 = vmul.f32 %v7431_v12, %v7431_v12 }
 0x37e   : > { %v3060_v47 = vadd.f32 %v3059_v30, %v3029_v10  ;;  %v3045_v10 = vmul.f32 %v7433_v28, %v7433_v28 }
 0x380   : > { %v3061_v7 = vadd.f32 %v3060_v47, %v3030_v21  ;;  %v3046_v21 = vmul.f32 %v7435_v35, %v7435_v35 }
 0x382   : > { %v3062_v16 = vadd.f32 %v3061_v7, %v3031_v1  ;;  %v3047_v1 = vmul.f32 %v7437_v19, %v7437_v19 }
 0x384   : > { %v3063_v6 = vadd.f32 %v3062_v16, %v3032_v2  ;;  %v3048_v2 = vmul.f32 %v7439_v59, %v7439_v59 }
 0x386   : > { %v3064_v38 = vadd.f32 %v3063_v6, %v3033_v44  ;;  %v3049_v44 = vmul.f32 %v7441_v22, %v7441_v22 }
 0x388   : > { %v3065_v4 = vadd.f32 %v3064_v38, %v3034_v42 }
 0x38a   : > { %v3066_v46 = vadd.f32 %v3065_v4, %v3035_v32 }
 0x38c   : > { %v3067_v11 = vadd.f32 %v3066_v46, %v3036_v3 }
 0x38e   : > { %v3068_v20 = vadd.f32 %v3067_v11, %v3037_v33 }
 0x390   : > { %v3069_v14 = vadd.f32 %v3068_v20, %v3038_v36 }
 0x392   : > { %v3070_v5 = vadd.f32 %v3069_v14, %v3039_v15  ;;  %v7536_v15 = vld [vmem:[%s8392_s4] ss:$0 sm:$0xff] }
 0x394   : > { %v3071_v27 = vadd.f32 %v3070_v5, %v3040_v34 }
 0x396   : > { %v3072_v56 = vadd.f32 %v3071_v27, %v3041_v37  ;;  %v7549_v27 = vld [vmem:[%s8393_s5] ss:$0 sm:$0xff] }
 0x398   : > { %v3073_v41 = vadd.f32 %v3072_v56, %v3042_v31 }
 0x39a   : > { %v3074_v55 = vadd.f32 %v3073_v41, %v3043_v57 }
 0x39c   : > { %v3075_v30 = vadd.f32 %v3074_v55, %v3044_v49 }
 0x39e   : > { %v3076_v47 = vadd.f32 %v3075_v30, %v3045_v10 }
 0x3a0   : > { %v3077_v7 = vadd.f32 %v3076_v47, %v3046_v21 }
 0x3a2   : > { %v3078_v16 = vadd.f32 %v3077_v7, %v3047_v1 }
 0x3a4   : > { %v3079_v6 = vadd.f32 %v3078_v16, %v3048_v2 }
 0x3a6   : > { %v3080_v42 = vadd.f32 %v3079_v6, %v3049_v44 }
 0x3a8   : > { %v3081_v38 = vrot.slane %v3080_v42, 4 }
 0x3aa   : > { %v3082_v32 = vadd.f32 %v3081_v38, %v3080_v42 }
 0x3ac   : > { %v3083_v4 = vrot.slane %v3082_v32, 2 }
 0x3ae   : > { %v3084_v3 = vadd.f32 %v3083_v4, %v3082_v32 }
 0x3b0   : > { %v3085_v46 = vrot.slane %v3084_v3, 1 }
 0x3b2   : > { %v3086_v33 = vadd.f32 %v3085_v46, %v3084_v3 }
 0x3b4   : > { %v3087_v11 = vmul.f32 0.00390625, %v3086_v33 }
 0x3b6   : > { %v3088_v36 = vadd.f32 1e-05, %v3087_v11 }
 0x3b8   : > { %4422 = vrsqrt.f32 %v3088_v36 }
 0x3c5   : > { %v7531_v20 = vpop.eup %4422 }
 0x3c6   : > { %v3090_v14 = vmul.f32 %v7531_v20, %v7444_v51  ;;  %v3091_v34 = vmul.f32 %v7531_v20, %v7447_v39  ;;  %v3092_v5 = vmul.f32 %v7531_v20, %v7450_v63  ;;  %v3093_v37 = vmul.f32 %v7531_v20, %v7457_v53 }
 0x3c7   : > { %v3094_v31 = vmul.f32 %v7531_v20, %v7460_v17  ;;  %v3095_v51 = vmul.f32 %v7531_v20, %v7465_v9  ;;  %v3096_v39 = vmul.f32 %v7531_v20, %v7470_v23  ;;  %v3097_v63 = vmul.f32 %v7531_v20, %v7475_v52 }
 0x3c8   : > { %v3128_v56 = vmul.f32 %v7536_v15, %v3090_v14  ;;  %v3129_v53 = vmul.f32 %v7536_v15, %v3091_v34  ;;  %v3130_v57 = vmul.f32 %v7536_v15, %v3092_v5  ;;  %v3131_v41 = vmul.f32 %v7536_v15, %v3093_v37 }
 0x3c9   : > { %v3132_v49 = vmul.f32 %v7536_v15, %v3094_v31  ;;  %v3133_v17 = vmul.f32 %v7536_v15, %v3095_v51  ;;  %v3134_v9 = vmul.f32 %v7536_v15, %v3096_v39  ;;  %v3135_v55 = vmul.f32 %v7536_v15, %v3097_v63 }
 0x3ca   : > { %v3166_v23 = vadd.f32 %v7549_v27, %v3128_v56  ;;  %v3167_v52 = vadd.f32 %v7549_v27, %v3129_v53  ;;  %v3168_v10 = vadd.f32 %v7549_v27, %v3130_v57  ;;  %v3169_v30 = vadd.f32 %v7549_v27, %v3131_v41 }
 0x3cb   : > { %v3170_v21 = vadd.f32 %v7549_v27, %v3132_v49  ;;  %v3171_v47 = vadd.f32 %v7549_v27, %v3133_v17  ;;  %v3172_v1 = vadd.f32 %v7549_v27, %v3134_v9  ;;  %v3173_v7 = vadd.f32 %v7549_v27, %v3135_v55 }
 0x3cc   : > { %vm3198_vm10 = vcmp.ge.f32.partialorder %v3166_v23, 0.0  ;;  %vm3199_vm12 = vcmp.ge.f32.partialorder %v3167_v52, 0.0  ;;  %v3230_v2 = vmul.f32 0.01, %v3166_v23  ;;  %v3231_v16 = vmul.f32 0.01, %v3167_v52 }
 0x3cd   : > { %vm3200_vm13 = vcmp.ge.f32.partialorder %v3168_v10, 0.0  ;;  %vm3201_vm1 = vcmp.ge.f32.partialorder %v3169_v30, 0.0  ;;  %v3232_v44 = vmul.f32 0.01, %v3168_v10  ;;  %v3233_v6 = vmul.f32 0.01, %v3169_v30 }
 0x3ce   : > { %v3262_v42 = vsel %vm3198_vm10, %v3166_v23, %v3230_v2  ;;  %v3263_v38 = vsel %vm3199_vm12, %v3167_v52, %v3231_v16  ;;  %vm3202_vm2 = vcmp.ge.f32.partialorder %v3170_v21, 0.0  ;;  %vm3203_vm3 = vcmp.ge.f32.partialorder %v3171_v47, 0.0 }
 0x3cf   : > { %v3294_v32 = vpack.c.bf16 %v3263_v38, %v3262_v42  ;;  %v3264_v4 = vsel %vm3200_vm13, %v3168_v10, %v3232_v44  ;;  %v3265_v3 = vsel %vm3201_vm1, %v3169_v30, %v3233_v6  ;;  %v3234_v46 = vmul.f32 0.01, %v3170_v21 }
 0x3d0   : > { %v3295_v33 = vpack.c.bf16 %v3265_v3, %v3264_v4  ;;  %v3235_v11 = vmul.f32 0.01, %v3171_v47  ;;  %vm3204_vm6 = vcmp.ge.f32.partialorder %v3172_v1, 0.0  ;;  %vm3205_vm7 = vcmp.ge.f32.partialorder %v3173_v7, 0.0 }
 0x3d1   : > { %4278 = vmatprep.mubr.bf16.mxu1 %v3294_v32  ;;  %v3266_v36 = vsel %vm3202_vm2, %v3170_v21, %v3234_v46  ;;  %v3236_v14 = vmul.f32 0.01, %v3172_v1  ;;  %v3237_v34 = vmul.f32 0.01, %v3173_v7  ;;  %v3098_v5 = vmul.f32 %v7531_v20, %v7380_v24 }
 0x3d2   : > { %4279 = vmatmul.mubr.bf16.vlgmr.msra.gmra.mxu1 %v3295_v33  ;;  %v3267_v37 = vsel %vm3203_vm3, %v3171_v47, %v3235_v11  ;;  %v3099_v31 = vmul.f32 %v7531_v20, %v7383_v29  ;;  %v3100_v51 = vmul.f32 %v7531_v20, %v7386_v43  ;;  %v3101_v39 = vmul.f32 %v7531_v20, %v7389_v8 }
 0x3d3   : > { %v3296_v63 = vpack.c.bf16 %v3267_v37, %v3266_v36  ;;  %v3268_v56 = vsel %vm3204_vm6, %v3172_v1, %v3236_v14  ;;  %v3269_v53 = vsel %vm3205_vm7, %v3173_v7, %v3237_v34  ;;  %v3136_v57 = vmul.f32 %v7536_v15, %v3098_v5 }
 0x3d4   : > { %v3297_v41 = vpack.c.bf16 %v3269_v53, %v3268_v56  ;;  %v3137_v49 = vmul.f32 %v7536_v15, %v3099_v31  ;;  %v3138_v24 = vmul.f32 %v7536_v15, %v3100_v51  ;;  %v3139_v17 = vmul.f32 %v7536_v15, %v3101_v39 }
 0x3d5   : > { %4282 = vmatprep.mubr.bf16.mxu1 %v3296_v63  ;;  %v3174_v29 = vadd.f32 %v7549_v27, %v3136_v57  ;;  %v3102_v43 = vmul.f32 %v7531_v20, %v7392_v54  ;;  %v3103_v8 = vmul.f32 %v7531_v20, %v7395_v58  ;;  %v3104_v9 = vmul.f32 %v7531_v20, %v7398_v62 }
 0x3d6   : > { %v3175_v55 = vadd.f32 %v7549_v27, %v3137_v49  ;;  %v3176_v23 = vadd.f32 %v7549_v27, %v3138_v24  ;;  %v3177_v52 = vadd.f32 %v7549_v27, %v3139_v17  ;;  %v3105_v10 = vmul.f32 %v7531_v20, %v7401_v18 }
 0x3d7   : > { %vm3206_vm8 = vcmp.ge.f32.partialorder %v3174_v29, 0.0  ;;  %v3238_v30 = vmul.f32 0.01, %v3174_v29  ;;  %v3140_v21 = vmul.f32 %v7536_v15, %v3102_v43  ;;  %v3141_v54 = vmul.f32 %v7536_v15, %v3103_v8 }
 0x3d8   : > { %vm3207_vm9 = vcmp.ge.f32.partialorder %v3175_v55, 0.0  ;;  %v3239_v58 = vmul.f32 0.01, %v3175_v55  ;;  %vm3208_vm14 = vcmp.ge.f32.partialorder %v3176_v23, 0.0  ;;  %vm3209_vm15 = vcmp.ge.f32.partialorder %v3177_v52, 0.0 }
 0x3d9   : > { %v3270_v62 = vsel %vm3206_vm8, %v3174_v29, %v3238_v30  ;;  %v3240_v47 = vmul.f32 0.01, %v3176_v23  ;;  %v3241_v1 = vmul.f32 0.01, %v3177_v52  ;;  %v3178_v7 = vadd.f32 %v7549_v27, %v3140_v21 }
 0x3da   : > { %4283 = vmatmul.mubr.bf16.gmra.mxu1 %v3297_v41  ;;  %v3271_v2 = vsel %vm3207_vm9, %v3175_v55, %v3239_v58  ;;  %v3179_v16 = vadd.f32 %v7549_v27, %v3141_v54  ;;  %v3142_v18 = vmul.f32 %v7536_v15, %v3104_v9  ;;  %v3143_v44 = vmul.f32 %v7536_v15, %v3105_v10 }
 0x3db   : > { %v3298_v6 = vpack.c.bf16 %v3271_v2, %v3270_v62  ;;  %v3272_v42 = vsel %vm3208_vm14, %v3176_v23, %v3240_v47  ;;  %vm3210_vm0 = vcmp.ge.f32.partialorder %v3178_v7, 0.0  ;;  %v3273_v38 = vsel %vm3209_vm15, %v3177_v52, %v3241_v1 }
 0x3dc   : > { %vm3211_vm4 = vcmp.ge.f32.partialorder %v3179_v16, 0.0  ;;  %v3242_v32 = vmul.f32 0.01, %v3178_v7  ;;  %v3243_v4 = vmul.f32 0.01, %v3179_v16  ;;  %v3180_v3 = vadd.f32 %v7549_v27, %v3142_v18 }
 0x3dd   : > { %4286 = vmatprep.mubr.bf16.mxu1 %v3298_v6  ;;  %v3181_v46 = vadd.f32 %v7549_v27, %v3143_v44  ;;  %v3106_v33 = vmul.f32 %v7531_v20, %v7404_v0  ;;  %v3107_v11 = vmul.f32 %v7531_v20, %v7407_v45  ;;  %v3108_v34 = vmul.f32 %v7531_v20, %v7410_v40 }
 0x3de   : > { %v3274_v36 = vsel %vm3210_vm0, %v3178_v7, %v3242_v32  ;;  %v3275_v14 = vsel %vm3211_vm4, %v3179_v16, %v3243_v4  ;;  %v3109_v5 = vmul.f32 %v7531_v20, %v7413_v61  ;;  %v3299_v37 = vpack.c.bf16 %v3273_v38, %v3272_v42 }
 0x3df   : > { %v3300_v31 = vpack.c.bf16 %v3275_v14, %v3274_v36  ;;  %v3244_v51 = vmul.f32 0.01, %v3180_v3  ;;  %v3144_v39 = vmul.f32 %v7536_v15, %v3106_v33  ;;  %v3145_v63 = vmul.f32 %v7536_v15, %v3107_v11 }
 0x3e0   : > { %v3146_v0 = vmul.f32 %v7536_v15, %v3108_v34  ;;  %v3245_v56 = vmul.f32 0.01, %v3181_v46  ;;  %v3147_v45 = vmul.f32 %v7536_v15, %v3109_v5  ;;  %v3110_v53 = vmul.f32 %v7531_v20, %v7416_v60 }
 0x3e1   : > { %v3111_v40 = vmul.f32 %v7531_v20, %v7419_v13  ;;  %vm3212_vm11 = vcmp.ge.f32.partialorder %v3180_v3, 0.0  ;;  %vm3213_vm5 = vcmp.ge.f32.partialorder %v3181_v46, 0.0  ;;  %v3182_v61 = vadd.f32 %v7549_v27, %v3144_v39 }
 0x3e2   : > { %4287 = vmatmul.mubr.bf16.gmra.mxu1 %v3299_v37  ;;  %v3183_v57 = vadd.f32 %v7549_v27, %v3145_v63  ;;  %v3184_v41 = vadd.f32 %v7549_v27, %v3146_v0  ;;  %v3185_v49 = vadd.f32 %v7549_v27, %v3147_v45  ;;  %v3148_v24 = vmul.f32 %v7536_v15, %v3110_v53 }
 0x3e3   : > { %4290 = vmatprep.mubr.bf16.mxu1 %v3300_v31  ;;  %v3149_v17 = vmul.f32 %v7536_v15, %v3111_v40  ;;  %vm3214_vm10 = vcmp.ge.f32.partialorder %v3182_v61, 0.0  ;;  %v3246_v60 = vmul.f32 0.01, %v3182_v61  ;;  %v3276_v29 = vsel %vm3212_vm11, %v3180_v3, %v3244_v51 }
 0x3e4   : > { %vm3215_vm12 = vcmp.ge.f32.partialorder %v3183_v57, 0.0  ;;  %v3247_v13 = vmul.f32 0.01, %v3183_v57  ;;  %v3277_v43 = vsel %vm3213_vm5, %v3181_v46, %v3245_v56  ;;  %v3186_v55 = vadd.f32 %v7549_v27, %v3148_v24 }
 0x3e5   : > { %v3278_v8 = vsel %vm3214_vm10, %v3182_v61, %v3246_v60  ;;  %v3187_v23 = vadd.f32 %v7549_v27, %v3149_v17  ;;  %v3112_v52 = vmul.f32 %v7531_v20, %v7422_v26  ;;  %v3301_v10 = vpack.c.bf16 %v3277_v43, %v3276_v29 }
 0x3e6   : > { %v3279_v9 = vsel %vm3215_vm12, %v3183_v57, %v3247_v13  ;;  %vm3216_vm13 = vcmp.ge.f32.partialorder %v3184_v41, 0.0  ;;  %v3248_v30 = vmul.f32 0.01, %v3184_v41  ;;  %v3249_v21 = vmul.f32 0.01, %v3185_v49 }
 0x3e7   : > { %v3302_v54 = vpack.c.bf16 %v3279_v9, %v3278_v8  ;;  %v3113_v58 = vmul.f32 %v7531_v20, %v7425_v48  ;;  %v3150_v62 = vmul.f32 %v7536_v15, %v3112_v52  ;;  %v3114_v47 = vmul.f32 %v7531_v20, %v7427_v25 }
 0x3e8   : > { %vm3217_vm1 = vcmp.ge.f32.partialorder %v3185_v49, 0.0  ;;  %v3250_v1 = vmul.f32 0.01, %v3186_v55  ;;  %v3251_v7 = vmul.f32 0.01, %v3187_v23  ;;  %v3115_v26 = vmul.f32 %v7531_v20, %v7429_v50 }
 0x3e9   : > { %vm3218_vm2 = vcmp.ge.f32.partialorder %v3186_v55, 0.0  ;;  %vm3219_vm3 = vcmp.ge.f32.partialorder %v3187_v23, 0.0  ;;  %v3151_v2 = vmul.f32 %v7536_v15, %v3113_v58  ;;  %v3152_v16 = vmul.f32 %v7536_v15, %v3114_v47 }
 0x3ea   : > { %4291 = vmatmul.mubr.bf16.gmra.mxu1 %v3301_v10  ;;  %v3153_v48 = vmul.f32 %v7536_v15, %v3115_v26  ;;  %v3116_v18 = vmul.f32 %v7531_v20, %v7431_v12  ;;  %v3117_v25 = vmul.f32 %v7531_v20, %v7433_v28  ;;  %v3280_v44 = vsel %vm3216_vm13, %v3184_v41, %v3248_v30 }
 0x3eb   : > { %4294 = vmatprep.mubr.bf16.mxu1 %v3302_v54  ;;  %v3281_v6 = vsel %vm3217_vm1, %v3185_v49, %v3249_v21  ;;  %v3188_v50 = vadd.f32 %v7549_v27, %v3150_v62  ;;  %v3189_v42 = vadd.f32 %v7549_v27, %v3151_v2  ;;  %v3282_v38 = vsel %vm3218_vm2, %v3186_v55, %v3250_v1 }
 0x3ec   : > { %v3283_v32 = vsel %vm3219_vm3, %v3187_v23, %v3251_v7  ;;  %v3190_v4 = vadd.f32 %v7549_v27, %v3152_v16  ;;  %v3191_v3 = vadd.f32 %v7549_v27, %v3153_v48  ;;  %v3118_v46 = vmul.f32 %v7531_v20, %v7435_v35 }
 0x3ed   : > { %v3303_v12 = vpack.c.bf16 %v3281_v6, %v3280_v44  ;;  %v3154_v33 = vmul.f32 %v7536_v15, %v3116_v18  ;;  %v3155_v28 = vmul.f32 %v7536_v15, %v3117_v25  ;;  %v3304_v11 = vpack.c.bf16 %v3283_v32, %v3282_v38 }
 0x3ee   : > { %vm3220_vm6 = vcmp.ge.f32.partialorder %v3188_v50, 0.0  ;;  %v3252_v36 = vmul.f32 0.01, %v3188_v50  ;;  %v3253_v14 = vmul.f32 0.01, %v3189_v42  ;;  %vm3221_vm7 = vcmp.ge.f32.partialorder %v3189_v42, 0.0 }
 0x3ef   : > { %v3254_v34 = vmul.f32 0.01, %v3190_v4  ;;  %v3255_v5 = vmul.f32 0.01, %v3191_v3  ;;  %v3119_v37 = vmul.f32 %v7531_v20, %v7437_v19  ;;  %vm3222_vm8 = vcmp.ge.f32.partialorder %v3190_v4, 0.0 }
 0x3f0   : > { %vm3223_vm9 = vcmp.ge.f32.partialorder %v3191_v3, 0.0  ;;  %v3156_v35 = vmul.f32 %v7536_v15, %v3118_v46  ;;  %v3192_v31 = vadd.f32 %v7549_v27, %v3154_v33  ;;  %v3193_v51 = vadd.f32 %v7549_v27, %v3155_v28 }
 0x3f1   : > { %v3157_v39 = vmul.f32 %v7536_v15, %v3119_v37  ;;  %v3284_v63 = vsel %vm3220_vm6, %v3188_v50, %v3252_v36  ;;  %v3285_v0 = vsel %vm3221_vm7, %v3189_v42, %v3253_v14  ;;  %v3120_v56 = vmul.f32 %v7531_v20, %v7439_v59 }
 0x3f2   : > { %4295 = vmatmul.mubr.bf16.gmra.mxu1 %v3303_v12  ;;  %v3121_v45 = vmul.f32 %v7531_v20, %v7441_v22  ;;  %v3286_v19 = vsel %vm3222_vm8, %v3190_v4, %v3254_v34  ;;  %v3287_v53 = vsel %vm3223_vm9, %v3191_v3, %v3255_v5  ;;  %v3194_v40 = vadd.f32 %v7549_v27, %v3156_v35 }
 0x3f3   : > { %4298 = vmatprep.mubr.bf16.mxu1 %v3304_v11  ;;  %v3195_v61 = vadd.f32 %v7549_v27, %v3157_v39  ;;  %v3305_v57 = vpack.c.bf16 %v3285_v0, %v3284_v63  ;;  %v3256_v41 = vmul.f32 0.01, %v3192_v31  ;;  %v3306_v49 = vpack.c.bf16 %v3287_v53, %v3286_v19 }
 0x3f4   : > { %v3257_v24 = vmul.f32 0.01, %v3193_v51  ;;  %v3158_v17 = vmul.f32 %v7536_v15, %v3120_v56  ;;  %v3159_v60 = vmul.f32 %v7536_v15, %v3121_v45  ;;  %vm3224_vm14 = vcmp.ge.f32.partialorder %v3192_v31, 0.0 }
 0x3f5   : > { %vm3225_vm15 = vcmp.ge.f32.partialorder %v3193_v51, 0.0  ;;  %v3258_v59 = vmul.f32 0.01, %v3194_v40  ;;  %v3259_v13 = vmul.f32 0.01, %v3195_v61  ;;  %vm3226_vm0 = vcmp.ge.f32.partialorder %v3194_v40, 0.0 }
 0x3f6   : > { %vm3227_vm4 = vcmp.ge.f32.partialorder %v3195_v61, 0.0  ;;  %v3288_v22 = vsel %vm3224_vm14, %v3192_v31, %v3256_v41  ;;  %v3289_v20 = vsel %vm3225_vm15, %v3193_v51, %v3257_v24  ;;  %v3196_v29 = vadd.f32 %v7549_v27, %v3158_v17 }
 0x3f7   : > { %v3197_v43 = vadd.f32 %v7549_v27, %v3159_v60  ;;  %v3290_v8 = vsel %vm3226_vm0, %v3194_v40, %v3258_v59  ;;  %v3291_v9 = vsel %vm3227_vm4, %v3195_v61, %v3259_v13  ;;  %v3307_v55 = vpack.c.bf16 %v3289_v20, %v3288_v22 }
 0x3f8   : > { %v3308_v23 = vpack.c.bf16 %v3291_v9, %v3290_v8  ;;  %v3260_v52 = vmul.f32 0.01, %v3196_v29  ;;  %vm3228_vm11 = vcmp.ge.f32.partialorder %v3196_v29, 0.0 }
 0x3f9   : > { %v3261_v15 = vmul.f32 0.01, %v3197_v43  ;;  %vm3229_vm5 = vcmp.ge.f32.partialorder %v3197_v43, 0.0 }
 0x3fa   : > { %4299 = vmatmul.mubr.bf16.gmra.mxu1 %v3305_v57  ;;  %v3292_v10 = vsel %vm3228_vm11, %v3196_v29, %v3260_v52 }
 0x3fb   : > { %4302 = vmatprep.mubr.bf16.mxu1 %v3306_v49  ;;  %v3293_v30 = vsel %vm3229_vm5, %v3197_v43, %v3261_v15 }
 0x3fc   : > { %v3309_v21 = vpack.c.bf16 %v3293_v30, %v3292_v10 }
 0x402   : > { %4303 = vmatmul.mubr.bf16.gmra.mxu1 %v3307_v55 }
 0x403   : > { %4306 = vmatprep.mubr.bf16.mxu1 %v3308_v23 }
 0x40a   : > { %4307 = vmatmul.mubr.bf16.gmra.mxu1 %v3309_v21 }
 0x492   : > { %v7672_v54 = vpop.f32.mrf.mxu1 }
 0x494   : > { %v7674_v58 = vpop.f32.mrf.mxu1 }
 0x496   : > { %v7676_v62 = vpop.f32.mrf.mxu1 }
 0x498   : > { %v7678_v27 = vpop.f32.mrf.mxu1 }
 0x499   : > { %v3537_v47 = vadd.f32 %v7678_v27, %v7674_v58 }
 0x49a   : > { %v7682_v1 = vpop.f32.mrf.mxu1 }
 0x49b   : > { %v3538_v7 = vadd.f32 %v7672_v54, %v3537_v47 }
 0x49c   : > { %v7685_v26 = vpop.f32.mrf.mxu1 }
 0x49d   : > { %v3539_v2 = vadd.f32 %v7676_v62, %v3538_v7 }
 0x49e   : > { %v7688_v16 = vpop.f32.mrf.mxu1 }
 0x49f   : > { %v3540_v48 = vadd.f32 %v3539_v2, %v7685_v26 }
 0x4a0   : > { %v7691_v18 = vpop.f32.mrf.mxu1 }
 0x4a1   : > { %v3541_v25 = vadd.f32 %v3540_v48, %v7691_v18 }
 0x4a2   : > { %v7694_v44 = vpop.f32.mrf.mxu1 }
 0x4a3   : > { %v3542_v6 = vadd.f32 %v7682_v1, %v3541_v25 }
 0x4a4   : > { %v7697_v50 = vpop.f32.mrf.mxu1 }
 0x4a5   : > { %v3543_v42 = vadd.f32 %v7688_v16, %v3542_v6 }
 0x4a6   : > { %v7700_v38 = vpop.f32.mrf.mxu1 }
 0x4a7   : > { %v3544_v32 = vadd.f32 %v3543_v42, %v7697_v50 }
 0x4a8   : > { %v7703_v4 = vpop.f32.mrf.mxu1 }
 0x4a9   : > { %v3545_v3 = vadd.f32 %v3544_v32, %v7703_v4 }
 0x4aa   : > { %v7706_v46 = vpop.f32.mrf.mxu1 }
 0x4ab   : > { %v3546_v12 = vadd.f32 %v7694_v44, %v3545_v3 }
 0x4ac   : > { %v7709_v33 = vpop.f32.mrf.mxu1 }
 0x4ad   : > { %v3547_v28 = vadd.f32 %v7700_v38, %v3546_v12 }
 0x4ae   : > { %v7712_v11 = vpop.f32.mrf.mxu1 }
 0x4af   : > { %v3548_v36 = vadd.f32 %v3547_v28, %v7709_v33 }
 0x4b0   : > { %v7715_v14 = vpop.f32.mrf.mxu1 }
 0x4b1   : > { %v3549_v34 = vadd.f32 %v3548_v36, %v7715_v14 }
 0x4b2   : > { %v7718_v5 = vpop.f32.mrf.mxu1 }
 0x4b3   : > { %v3550_v37 = vadd.f32 %v7706_v46, %v3549_v34 }
 0x4b4   : > { %v7721_v35 = vpop.f32.mrf.mxu1 }
 0x4b5   : > { %v3551_v31 = vadd.f32 %v7712_v11, %v3550_v37 }
 0x4b6   : > { %v7724_v51 = vpop.f32.mrf.mxu1 }
 0x4b7   : > { %v3552_v39 = vadd.f32 %v3551_v31, %v7721_v35 }
 0x4b8   : > { %v7727_v63 = vpop.f32.mrf.mxu1 }
 0x4b9   : > { %v3553_v0 = vadd.f32 %v3552_v39, %v7727_v63 }
 0x4ba   : > { %v7730_v56 = vpop.f32.mrf.mxu1 }
 0x4bb   : > { %v3554_v45 = vadd.f32 %v7718_v5, %v3553_v0 }
 0x4bc   : > { %v7733_v19 = vpop.f32.mrf.mxu1 }
 0x4bd   : > { %v3555_v53 = vadd.f32 %v7724_v51, %v3554_v45 }
 0x4be   : > { %v7736_v40 = vpop.f32.mrf.mxu1 }
 0x4bf   : > { %v3556_v61 = vadd.f32 %v3555_v53, %v7733_v19 }
 0x4c0   : > { %v7739_v57 = vpop.f32.mrf.mxu1 }
 0x4c1   : > { %v3557_v41 = vadd.f32 %v3556_v61, %v7739_v57 }
 0x4c2   : > { %v7742_v49 = vpop.f32.mrf.mxu1 }
 0x4c3   : > { %v3558_v24 = vadd.f32 %v7730_v56, %v3557_v41 }
 0x4c4   : > { %v7745_v17 = vpop.f32.mrf.mxu1 }
 0x4c5   : > { %v3559_v60 = vadd.f32 %v7736_v40, %v3558_v24 }
 0x4c6   : > { %v7748_v59 = vpop.f32.mrf.mxu1 }
 0x4c7   : > { %v3560_v13 = vadd.f32 %v3559_v60, %v7745_v17 }
 0x4c8   : > { %v7751_v22 = vpop.f32.mrf.mxu1 }
 0x4c9   : > { %v3561_v20 = vadd.f32 %v3560_v13, %v7751_v22 }
 0x4ca   : > { %v7754_v29 = vpop.f32.mrf.mxu1 }
 0x4cb   : > { %v3562_v43 = vadd.f32 %v7742_v49, %v3561_v20 }
 0x4cc   : > { %v7757_v8 = vpop.f32.mrf.mxu1 }
 0x4cd   : > { %v3563_v9 = vadd.f32 %v7748_v59, %v3562_v43 }
 0x4ce   : > { %v7760_v55 = vpop.f32.mrf.mxu1 }
 0x4cf   : > { %v3564_v23 = vadd.f32 %v3563_v9, %v7757_v8 }
 0x4d0   : > { %v7763_v52 = vpop.f32.mrf.mxu1 }
 0x4d1   : > { %v3565_v15 = vadd.f32 %v3564_v23, %v7763_v52 }
 0x4d3   : > { %v3566_v10 = vadd.f32 %v7754_v29, %v3565_v15 }
 0x4d5   : > { %v3567_v30 = vadd.f32 %v7760_v55, %v3566_v10 }
 0x4d7   : > { %v3568_v21 = vrot.slane %v3567_v30, 4 }
 0x4d9   : > { %v3569_v47 = vadd.f32 %v3568_v21, %v3567_v30 }
 0x4db   : > { %v3570_v7 = vrot.slane %v3569_v47, 2 }
 0x4dd   : > { %v3571_v2 = vadd.f32 %v3570_v7, %v3569_v47 }
 0x4df   : > { %v3572_v48 = vrot.slane %v3571_v2, 1 }
 0x4e1   : > { %v3573_v25 = vadd.f32 %v3572_v48, %v3571_v2 }
 0x4e3   : > { %v7768_v6 = vmul.f32 0.00390625, %v3573_v25 }
 0x4e5   : > { %v7772_v42 = vsub.f32 %v7674_v58, %v7768_v6  ;;  %v7776_v32 = vsub.f32 %v7678_v27, %v7768_v6  ;;  %v7780_v3 = vsub.f32 %v7672_v54, %v7768_v6  ;;  %v7788_v36 = vsub.f32 %v7676_v62, %v7768_v6 }
 0x4e6   : > { %v7792_v58 = vsub.f32 %v7685_v26, %v7768_v6  ;;  %v7798_v54 = vsub.f32 %v7691_v18, %v7768_v6  ;;  %v7804_v62 = vsub.f32 %v7682_v1, %v7768_v6  ;;  %v7810_v0 = vsub.f32 %v7688_v16, %v7768_v6 }
 0x4e7   : > { %v3607_v12 = vmul.f32 %v7772_v42, %v7772_v42  ;;  %v3608_v28 = vmul.f32 %v7776_v32, %v7776_v32  ;;  %v3609_v27 = vmul.f32 %v7780_v3, %v7780_v3  ;;  %v3610_v37 = vmul.f32 %v7788_v36, %v7788_v36 }
 0x4e8   : > { %v3611_v26 = vmul.f32 %v7792_v58, %v7792_v58  ;;  %v3612_v18 = vmul.f32 %v7798_v54, %v7798_v54  ;;  %v7816_v53 = vsub.f32 %v7697_v50, %v7768_v6  ;;  %v3613_v1 = vmul.f32 %v7804_v62, %v7804_v62 }
 0x4e9   : > { %v3639_v34 = vadd.f32 %v3608_v28, %v3607_v12  ;;  %v7822_v41 = vsub.f32 %v7703_v4, %v7768_v6  ;;  %v3614_v16 = vmul.f32 %v7810_v0, %v7810_v0  ;;  %v7828_v60 = vsub.f32 %v7694_v44, %v7768_v6 }
 0x4ea   : > { %v3615_v50 = vmul.f32 %v7816_v53, %v7816_v53  ;;  %v7834_v20 = vsub.f32 %v7700_v38, %v7768_v6  ;;  %v7840_v9 = vsub.f32 %v7709_v33, %v7768_v6  ;;  %v7846_v15 = vsub.f32 %v7715_v14, %v7768_v6 }
 0x4eb   : > { %v3640_v31 = vadd.f32 %v3639_v34, %v3609_v27  ;;  %v3616_v4 = vmul.f32 %v7822_v41, %v7822_v41  ;;  %v3617_v44 = vmul.f32 %v7828_v60, %v7828_v60  ;;  %v7852_v30 = vsub.f32 %v7706_v46, %v7768_v6 }
 0x4ec   : > { %v3618_v38 = vmul.f32 %v7834_v20, %v7834_v20  ;;  %v3619_v33 = vmul.f32 %v7840_v9, %v7840_v9  ;;  %v7858_v47 = vsub.f32 %v7712_v11, %v7768_v6  ;;  %v3620_v14 = vmul.f32 %v7846_v15, %v7846_v15 }
 0x4ed   : > { %v3641_v39 = vadd.f32 %v3640_v31, %v3610_v37  ;;  %v7864_v2 = vsub.f32 %v7721_v35, %v7768_v6  ;;  %v3621_v46 = vmul.f32 %v7852_v30, %v7852_v30  ;;  %v7870_v25 = vsub.f32 %v7727_v63, %v7768_v6 }
 0x4ee   : > { %v3622_v11 = vmul.f32 %v7858_v47, %v7858_v47  ;;  %v7876_v28 = vsub.f32 %v7718_v5, %v7768_v6  ;;  %v7882_v34 = vsub.f32 %v7724_v51, %v7768_v6  ;;  %v7888_v31 = vsub.f32 %v7733_v19, %v7768_v6 }
 0x4ef   : > { %v3642_v45 = vadd.f32 %v3641_v39, %v3611_v26  ;;  %v3623_v35 = vmul.f32 %v7864_v2, %v7864_v2  ;;  %v3624_v63 = vmul.f32 %v7870_v25, %v7870_v25  ;;  %v7894_v39 = vsub.f32 %v7739_v57, %v7768_v6 }
 0x4f0   : > { %v3625_v5 = vmul.f32 %v7876_v28, %v7876_v28  ;;  %v3626_v51 = vmul.f32 %v7882_v34, %v7882_v34  ;;  %v3627_v19 = vmul.f32 %v7888_v31, %v7888_v31 }
 0x4f1   : > { %v3643_v61 = vadd.f32 %v3642_v45, %v3612_v18  ;;  %v7900_v45 = vsub.f32 %v7730_v56, %v7768_v6  ;;  %v3628_v57 = vmul.f32 %v7894_v39, %v7894_v39 }
 0x4f3   : > { %v3644_v24 = vadd.f32 %v3643_v61, %v3613_v1  ;;  %v7906_v61 = vsub.f32 %v7736_v40, %v7768_v6  ;;  %v3629_v56 = vmul.f32 %v7900_v45, %v7900_v45 }
 0x4f5   : > { %v3645_v13 = vadd.f32 %v3644_v24, %v3614_v16  ;;  %v7912_v24 = vsub.f32 %v7745_v17, %v7768_v6  ;;  %v3630_v40 = vmul.f32 %v7906_v61, %v7906_v61 }
 0x4f7   : > { %v3646_v43 = vadd.f32 %v3645_v13, %v3615_v50  ;;  %v7918_v13 = vsub.f32 %v7751_v22, %v7768_v6  ;;  %v3631_v17 = vmul.f32 %v7912_v24, %v7912_v24 }
 0x4f9   : > { %v3647_v23 = vadd.f32 %v3646_v43, %v3616_v4  ;;  %v7924_v43 = vsub.f32 %v7742_v49, %v7768_v6  ;;  %v3632_v22 = vmul.f32 %v7918_v13, %v7918_v13 }
 0x4fb   : > { %v3648_v10 = vadd.f32 %v3647_v23, %v3617_v44  ;;  %v7930_v23 = vsub.f32 %v7748_v59, %v7768_v6  ;;  %v3633_v49 = vmul.f32 %v7924_v43, %v7924_v43 }
 0x4fd   : > { %v3649_v21 = vadd.f32 %v3648_v10, %v3618_v38  ;;  %v7936_v10 = vsub.f32 %v7757_v8, %v7768_v6  ;;  %v3606_v8 = vsub.f32 %v7760_v55, %v7768_v6  ;;  %v7953_v55 = vld [vmem:[%s8395_s7] ss:$0 sm:$0xff] }
 0x4ff   : > { %v3650_v7 = vadd.f32 %v3649_v21, %v3619_v33  ;;  %v3604_v21 = vsub.f32 %v7763_v52, %v7768_v6 }
 0x501   : > { %v3651_v48 = vadd.f32 %v3650_v7, %v3620_v14  ;;  %v3634_v14 = vmul.f32 %v7930_v23, %v7930_v23  ;;  %v3605_v7 = vsub.f32 %v7754_v29, %v7768_v6 }
 0x503   : > { %v3652_v12 = vadd.f32 %v3651_v48, %v3621_v46  ;;  %v3635_v46 = vmul.f32 %v7936_v10, %v7936_v10 }
 0x505   : > { %v3653_v27 = vadd.f32 %v3652_v12, %v3622_v11  ;;  %v3636_v11 = vmul.f32 %v3604_v21, %v3604_v21 }
 0x507   : > { %v3654_v37 = vadd.f32 %v3653_v27, %v3623_v35  ;;  %v3637_v35 = vmul.f32 %v3605_v7, %v3605_v7 }
 0x509   : > { %v3655_v26 = vadd.f32 %v3654_v37, %v3624_v63  ;;  %v3638_v63 = vmul.f32 %v3606_v8, %v3606_v8 }
 0x50b   : > { %v3656_v18 = vadd.f32 %v3655_v26, %v3625_v5 }
 0x50d   : > { %v3657_v1 = vadd.f32 %v3656_v18, %v3626_v51 }
 0x50f   : > { %v3658_v16 = vadd.f32 %v3657_v1, %v3627_v19 }
 0x511   : > { %v3659_v50 = vadd.f32 %v3658_v16, %v3628_v57 }
 0x513   : > { %v3660_v4 = vadd.f32 %v3659_v50, %v3629_v56  ;;  %v7958_v56 = vld [vmem:[%s8396_s8] ss:$0 sm:$0xff] }
 0x515   : > { %v3661_v44 = vadd.f32 %v3660_v4, %v3630_v40  ;;  %v3816_v40 = vld [vmem:[%s4869_s27 + $0xe8] sm:$0xff] }
 0x517   : > { %v3662_v38 = vadd.f32 %v3661_v44, %v3631_v17 }
 0x519   : > { %v3663_v33 = vadd.f32 %v3662_v38, %v3632_v22 }
 0x51b   : > { %v3664_v59 = vadd.f32 %v3663_v33, %v3633_v49 }
 0x51d   : > { %v3665_v48 = vadd.f32 %v3664_v59, %v3634_v14 }
 0x51f   : > { %v3666_v12 = vadd.f32 %v3665_v48, %v3635_v46 }
 0x521   : > { %v3667_v27 = vadd.f32 %v3666_v12, %v3636_v11 }
 0x523   : > { %v3668_v52 = vadd.f32 %v3667_v27, %v3637_v35 }
 0x525   : > { %v3669_v37 = vadd.f32 %v3668_v52, %v3638_v63 }
 0x527   : > { %v3670_v5 = vrot.slane %v3669_v37, 4 }
 0x529   : > { %v3671_v26 = vadd.f32 %v3670_v5, %v3669_v37 }
 0x52b   : > { %v3672_v51 = vrot.slane %v3671_v26, 2 }
 0x52d   : > { %v3673_v18 = vadd.f32 %v3672_v51, %v3671_v26 }
 0x52f   : > { %v3674_v29 = vrot.slane %v3673_v18, 1 }
 0x531   : > { %v3675_v19 = vadd.f32 %v3674_v29, %v3673_v18 }
 0x533   : > { %v3676_v1 = vmul.f32 0.00390625, %v3675_v19 }
 0x535   : > { %v3677_v57 = vadd.f32 1e-05, %v3676_v1 }
 0x537   : > { %4424 = vrsqrt.f32 %v3677_v57 }
 0x544   : > { %v4425_v16 = vpop.eup %4424 }
 0x545   : > { %v3708_v6 = vmul.f32 %v4425_v16, %v3604_v21  ;;  %v3679_v17 = vmul.f32 %v4425_v16, %v7772_v42  ;;  %v3680_v22 = vmul.f32 %v4425_v16, %v7776_v32  ;;  %v3681_v38 = vmul.f32 %v4425_v16, %v7780_v3 }
 0x546   : > { %v3682_v49 = vmul.f32 %v4425_v16, %v7788_v36  ;;  %v3683_v33 = vmul.f32 %v4425_v16, %v7792_v58  ;;  %v3684_v21 = vmul.f32 %v4425_v16, %v7798_v54  ;;  %v3685_v14 = vmul.f32 %v4425_v16, %v7804_v62 }
 0x547   : > { %v3746_v50 = vmul.f32 %v7953_v55, %v3708_v6  ;;  %v3686_v59 = vmul.f32 %v4425_v16, %v7810_v0  ;;  %v3687_v42 = vmul.f32 %v4425_v16, %v7816_v53  ;;  %v3688_v48 = vmul.f32 %v4425_v16, %v7822_v41 }
 0x548   : > { %v3689_v32 = vmul.f32 %v4425_v16, %v7828_v60  ;;  %v3690_v3 = vmul.f32 %v4425_v16, %v7834_v20  ;;  %v3691_v36 = vmul.f32 %v4425_v16, %v7840_v9  ;;  %v3692_v58 = vmul.f32 %v4425_v16, %v7846_v15 }
 0x549   : > { %v3784_v4 = vadd.f32 %v7958_v56, %v3746_v50  ;;  %v3693_v54 = vmul.f32 %v4425_v16, %v7852_v30  ;;  %v3694_v62 = vmul.f32 %v4425_v16, %v7858_v47  ;;  %v3695_v0 = vmul.f32 %v4425_v16, %v7864_v2 }
 0x54a   : > { %v3696_v53 = vmul.f32 %v4425_v16, %v7870_v25  ;;  %v3697_v41 = vmul.f32 %v4425_v16, %v7876_v28  ;;  %v3698_v60 = vmul.f32 %v4425_v16, %v7882_v34  ;;  %v3699_v20 = vmul.f32 %v4425_v16, %v7888_v31 }
 0x54b   : > { %v3848_v44 = vadd.f32 %v3816_v40, %v3784_v4  ;;  %v3700_v9 = vmul.f32 %v4425_v16, %v7894_v39  ;;  %v3701_v15 = vmul.f32 %v4425_v16, %v7900_v45  ;;  %v3702_v30 = vmul.f32 %v4425_v16, %v7906_v61 }
 0x54c   : > { %v3703_v47 = vmul.f32 %v4425_v16, %v7912_v24  ;;  %v3704_v2 = vmul.f32 %v4425_v16, %v7918_v13  ;;  %v3705_v12 = vmul.f32 %v4425_v16, %v7924_v43  ;;  %v3706_v25 = vmul.f32 %v4425_v16, %v7930_v23 }
 0x54d   : > { %vm3880_vm10 = vcmp.ge.f32.partialorder %v3848_v44, 0.0  ;;  %v3912_v46 = vmul.f32 0.01, %v3848_v44  ;;  %v3707_v28 = vmul.f32 %v4425_v16, %v7936_v10  ;;  %v3709_v35 = vmul.f32 %v4425_v16, %v3605_v7 }
 0x54e   : > { %v3710_v34 = vmul.f32 %v4425_v16, %v3606_v8  ;;  %v3717_v31 = vmul.f32 %v7953_v55, %v3679_v17  ;;  %v3718_v39 = vmul.f32 %v7953_v55, %v3680_v22  ;;  %v3719_v45 = vmul.f32 %v7953_v55, %v3681_v38 }
 0x54f   : > { %v3944_v11 = vsel %vm3880_vm10, %v3848_v44, %v3912_v46  ;;  %v3720_v61 = vmul.f32 %v7953_v55, %v3682_v49  ;;  %v3721_v24 = vmul.f32 %v7953_v55, %v3683_v33  ;;  %v3722_v13 = vmul.f32 %v7953_v55, %v3684_v21 }
 0x550   : > { %3976 = vst [vmem:[%s7982_s23 + $0xe8] sm:$0xff] %v3944_v11  ;;  %v3723_v43 = vmul.f32 %v7953_v55, %v3685_v14  ;;  %v3724_v23 = vmul.f32 %v7953_v55, %v3686_v59  ;;  %v3725_v10 = vmul.f32 %v7953_v55, %v3687_v42  ;;  %v3726_v7 = vmul.f32 %v7953_v55, %v3688_v48  ;;  %v3788_v11 = vld [vmem:[%s4869_s27 + $0x8] sm:$0xff] }
 0x551   : > { %v3727_v8 = vmul.f32 %v7953_v55, %v3689_v32  ;;  %v3728_v27 = vmul.f32 %v7953_v55, %v3690_v3  ;;  %v3729_v63 = vmul.f32 %v7953_v55, %v3691_v36  ;;  %v3730_v52 = vmul.f32 %v7953_v55, %v3692_v58  ;;  %v3789_v3 = vld [vmem:[%s4869_s27 + $0x10] sm:$0xff]  ;;  %v3787_v36 = vld [vmem:[%s4869_s27] sm:$0xff]  ;;  %v3790_v58 = vld [vmem:[%s4869_s27 + $0x18] sm:$0xff] }
 0x552   : > { %v3731_v37 = vmul.f32 %v7953_v55, %v3693_v54  ;;  %v3732_v5 = vmul.f32 %v7953_v55, %v3694_v62  ;;  %v3733_v26 = vmul.f32 %v7953_v55, %v3695_v0  ;;  %v3734_v51 = vmul.f32 %v7953_v55, %v3696_v53 }
 0x553   : > { %v3735_v18 = vmul.f32 %v7953_v55, %v3697_v41  ;;  %v3736_v29 = vmul.f32 %v7953_v55, %v3698_v60  ;;  %v3737_v19 = vmul.f32 %v7953_v55, %v3699_v20  ;;  %v3738_v1 = vmul.f32 %v7953_v55, %v3700_v9  ;;  %v3793_v41 = vld [vmem:[%s4869_s27 + $0x30] sm:$0xff]  ;;  %v3791_v60 = vld [vmem:[%s4869_s27 + $0x20] sm:$0xff]  ;;  %v3794_v20 = vld [vmem:[%s4869_s27 + $0x38] sm:$0xff] }
 0x554   : > { %v3739_v57 = vmul.f32 %v7953_v55, %v3701_v15  ;;  %v3740_v16 = vmul.f32 %v7953_v55, %v3702_v30  ;;  %v3741_v6 = vmul.f32 %v7953_v55, %v3703_v47  ;;  %v3742_v50 = vmul.f32 %v7953_v55, %v3704_v2  ;;  %v3792_v2 = vld [vmem:[%s4869_s27 + $0x28] sm:$0xff] }
 0x555   : > { %v3743_v40 = vmul.f32 %v7953_v55, %v3705_v12  ;;  %v3744_v4 = vmul.f32 %v7953_v55, %v3706_v25  ;;  %v3745_v17 = vmul.f32 %v7953_v55, %v3707_v28  ;;  %v3747_v44 = vmul.f32 %v7953_v55, %v3709_v35  ;;  %v3797_v12 = vld [vmem:[%s4869_s27 + $0x50] sm:$0xff]  ;;  %v3795_v25 = vld [vmem:[%s4869_s27 + $0x40] sm:$0xff] }
 0x556   : > { %v3748_v22 = vmul.f32 %v7953_v55, %v3710_v34  ;;  %v3755_v38 = vadd.f32 %v7958_v56, %v3717_v31  ;;  %v3756_v49 = vadd.f32 %v7958_v56, %v3718_v39  ;;  %v3757_v33 = vadd.f32 %v7958_v56, %v3719_v45  ;;  %v3798_v39 = vld [vmem:[%s4869_s27 + $0x58] sm:$0xff]  ;;  %v3796_v45 = vld [vmem:[%s4869_s27 + $0x48] sm:$0xff] }
 0x557   : > { %v3758_v21 = vadd.f32 %v7958_v56, %v3720_v61  ;;  %v3759_v14 = vadd.f32 %v7958_v56, %v3721_v24  ;;  %v3760_v59 = vadd.f32 %v7958_v56, %v3722_v13  ;;  %v3761_v46 = vadd.f32 %v7958_v56, %v3723_v43  ;;  %v3801_v61 = vld [vmem:[%s4869_s27 + $0x70] sm:$0xff] }
 0x558   : > { %v3762_v42 = vadd.f32 %v7958_v56, %v3724_v23  ;;  %v3763_v55 = vadd.f32 %v7958_v56, %v3725_v10  ;;  %v3764_v48 = vadd.f32 %v7958_v56, %v3726_v7  ;;  %v3765_v32 = vadd.f32 %v7958_v56, %v3727_v8  ;;  %v3799_v10 = vld [vmem:[%s4869_s27 + $0x60] sm:$0xff]  ;;  %v3802_v7 = vld [vmem:[%s4869_s27 + $0x78] sm:$0xff]  ;;  %v3800_v8 = vld [vmem:[%s4869_s27 + $0x68] sm:$0xff] }
 0x559   : > { %v3766_v54 = vadd.f32 %v7958_v56, %v3728_v27  ;;  %v3767_v62 = vadd.f32 %v7958_v56, %v3729_v63  ;;  %v3768_v0 = vadd.f32 %v7958_v56, %v3730_v52  ;;  %v3769_v53 = vadd.f32 %v7958_v56, %v3731_v37 }
 0x55a   : > { %v3770_v9 = vadd.f32 %v7958_v56, %v3732_v5  ;;  %v3771_v15 = vadd.f32 %v7958_v56, %v3733_v26  ;;  %v3772_v30 = vadd.f32 %v7958_v56, %v3734_v51  ;;  %v3773_v47 = vadd.f32 %v7958_v56, %v3735_v18  ;;  %v3805_v5 = vld [vmem:[%s4869_s27 + $0x90] sm:$0xff]  ;;  %v3803_v26 = vld [vmem:[%s4869_s27 + $0x80] sm:$0xff]  ;;  %v3806_v51 = vld [vmem:[%s4869_s27 + $0x98] sm:$0xff] }
 0x55b   : > { %v3774_v28 = vadd.f32 %v7958_v56, %v3736_v29  ;;  %v3775_v35 = vadd.f32 %v7958_v56, %v3737_v19  ;;  %v3776_v34 = vadd.f32 %v7958_v56, %v3738_v1  ;;  %v3777_v31 = vadd.f32 %v7958_v56, %v3739_v57  ;;  %v3804_v57 = vld [vmem:[%s4869_s27 + $0x88] sm:$0xff] }
 0x55c   : > { %v3778_v24 = vadd.f32 %v7958_v56, %v3740_v16  ;;  %v3779_v13 = vadd.f32 %v7958_v56, %v3741_v6  ;;  %v3780_v43 = vadd.f32 %v7958_v56, %v3742_v50  ;;  %v3781_v23 = vadd.f32 %v7958_v56, %v3743_v40  ;;  %v3809_v16 = vld [vmem:[%s4869_s27 + $0xb0] sm:$0xff]  ;;  %v3807_v6 = vld [vmem:[%s4869_s27 + $0xa0] sm:$0xff] }
 0x55d   : > { %v3782_v27 = vadd.f32 %v7958_v56, %v3744_v4  ;;  %v3783_v63 = vadd.f32 %v7958_v56, %v3745_v17  ;;  %v3785_v52 = vadd.f32 %v7958_v56, %v3747_v44  ;;  %v3786_v37 = vadd.f32 %v7958_v56, %v3748_v22  ;;  %v3810_v17 = vld [vmem:[%s4869_s27 + $0xb8] sm:$0xff]  ;;  %v3808_v44 = vld [vmem:[%s4869_s27 + $0xa8] sm:$0xff]  ;;  %v3813_v22 = vld [vmem:[%s4869_s27 + $0xd0] sm:$0xff] }
 0x55e   : > { %v8078_v18 = vadd.f32 %v3787_v36, %v3755_v38  ;;  %v8080_v29 = vadd.f32 %v3788_v11, %v3756_v49  ;;  %v8082_v19 = vadd.f32 %v3789_v3, %v3757_v33  ;;  %v8084_v1 = vadd.f32 %v3790_v58, %v3758_v21  ;;  %v3812_v3 = vld [vmem:[%s4869_s27 + $0xc8] sm:$0xff]  ;;  %v3817_v11 = vld [vmem:[%s4869_s27 + $0xf0] sm:$0xff] }
 0x55f   : > { %v8089_v56 = vadd.f32 %v3791_v60, %v3759_v14  ;;  %v8091_v50 = vadd.f32 %v3792_v2, %v3760_v59  ;;  %v8093_v40 = vadd.f32 %v3793_v41, %v3761_v46  ;;  %v8095_v4 = vadd.f32 %v3794_v20, %v3762_v42  ;;  %v3811_v14 = vld [vmem:[%s4869_s27 + $0xc0] sm:$0xff]  ;;  %v3814_v59 = vld [vmem:[%s4869_s27 + $0xd8] sm:$0xff] }
 0x560   : > { %v8100_v38 = vadd.f32 %v3795_v25, %v3763_v55  ;;  %v8102_v49 = vadd.f32 %v3796_v45, %v3764_v48  ;;  %v8104_v33 = vadd.f32 %v3797_v12, %v3765_v32  ;;  %v8106_v21 = vadd.f32 %v3798_v39, %v3766_v54  ;;  %v3815_v55 = vld [vmem:[%s4869_s27 + $0xe0] sm:$0xff]  ;;  %v3818_v12 = vld [vmem:[%s4869_s27 + $0xf8] sm:$0xff]  ;;  %s3980_s27 = scalar_lea.sflag [#allocation5], %s4863_s2 }
 0x561   : > { %v8111_v46 = vadd.f32 %v3799_v10, %v3767_v62  ;;  %v8113_v36 = vadd.f32 %v3800_v8, %v3768_v0  ;;  %v8115_v42 = vadd.f32 %v3801_v61, %v3769_v53  ;;  %v8117_v58 = vadd.f32 %v3802_v7, %v3770_v9 }
 0x562   : > { %v8121_v41 = vadd.f32 %v3803_v26, %v3771_v15  ;;  %v8123_v48 = vadd.f32 %v3804_v57, %v3772_v30  ;;  %v8125_v32 = vadd.f32 %v3805_v5, %v3773_v47  ;;  %v8127_v54 = vadd.f32 %v3806_v51, %v3774_v28 }
 0x563   : > { %v8129_v60 = vadd.f32 %v3807_v6, %v3775_v35  ;;  %v8131_v62 = vadd.f32 %v3808_v44, %v3776_v34  ;;  %v8133_v0 = vadd.f32 %v3809_v16, %v3777_v31  ;;  %v8135_v53 = vadd.f32 %v3810_v17, %v3778_v24 }
 0x564   : > { %v8137_v20 = vadd.f32 %v3811_v14, %v3779_v13  ;;  %v8139_v9 = vadd.f32 %v3812_v3, %v3780_v43  ;;  %v8141_v15 = vadd.f32 %v3813_v22, %v3781_v23  ;;  %v8143_v30 = vadd.f32 %v3814_v59, %v3782_v27 }
 0x565   : > { %v8145_v47 = vadd.f32 %v3815_v55, %v3783_v63  ;;  %v8147_v2 = vadd.f32 %v3817_v11, %v3785_v52  ;;  %vm3851_vm12 = vcmp.ge.f32.partialorder %v8078_v18, 0.0  ;;  %vm3852_vm13 = vcmp.ge.f32.partialorder %v8080_v29, 0.0 }
 0x566   : > { %vm3853_vm1 = vcmp.ge.f32.partialorder %v8082_v19, 0.0  ;;  %vm3854_vm2 = vcmp.ge.f32.partialorder %v8084_v1, 0.0  ;;  %vm3855_vm3 = vcmp.ge.f32.partialorder %v8089_v56, 0.0  ;;  %vm3856_vm6 = vcmp.ge.f32.partialorder %v8091_v50, 0.0 }
 0x567   : > { %vm3857_vm7 = vcmp.ge.f32.partialorder %v8093_v40, 0.0  ;;  %vm3858_vm8 = vcmp.ge.f32.partialorder %v8095_v4, 0.0  ;;  %vm3859_vm9 = vcmp.ge.f32.partialorder %v8100_v38, 0.0  ;;  %v3883_v25 = vmul.f32 0.01, %v8078_v18 }
 0x568   : > { %v3884_v28 = vmul.f32 0.01, %v8080_v29  ;;  %v8166_v35 = vadd.f32 %v3818_v12, %v3786_v37  ;;  %vm3866_vm10 = vcmp.ge.f32.partialorder %v8117_v58, 0.0  ;;  %vm3867_vm14 = vcmp.ge.f32.partialorder %v8121_v41, 0.0 }
 0x569   : > { %v3885_v34 = vmul.f32 0.01, %v8082_v19  ;;  %v3886_v31 = vmul.f32 0.01, %v8084_v1  ;;  %v3887_v39 = vmul.f32 0.01, %v8089_v56  ;;  %v3915_v13 = vsel %vm3851_vm12, %v8078_v18, %v3883_v25 }
 0x56a   : > { %vm3872_vm5 = vcmp.ge.f32.partialorder %v8131_v62, 0.0  ;;  %v3888_v45 = vmul.f32 0.01, %v8091_v50  ;;  %v3889_v61 = vmul.f32 0.01, %v8093_v40  ;;  %vm3873_vm15 = vcmp.ge.f32.partialorder %v8133_v0, 0.0  ;;  %3947 = vst [vmem:[%s7982_s23] sm:$0xff] %v3915_v13 }
 0x56b   : > { %v3890_v24 = vmul.f32 0.01, %v8095_v4  ;;  %v3891_v43 = vmul.f32 0.01, %v8100_v38  ;;  %v3892_v23 = vmul.f32 0.01, %v8102_v49  ;;  %v3916_v7 = vsel %vm3852_vm13, %v8080_v29, %v3884_v28 }
 0x56c   : > { %v3893_v10 = vmul.f32 0.01, %v8104_v33  ;;  %vm3877_vm12 = vcmp.ge.f32.partialorder %v8141_v15, 0.0  ;;  %vm3878_vm11 = vcmp.ge.f32.partialorder %v8143_v30, 0.0  ;;  %vm3879_vm4 = vcmp.ge.f32.partialorder %v8145_v47, 0.0  ;;  %3948 = vst [vmem:[%s7982_s23 + $0x8] sm:$0xff] %v3916_v7 }
 0x56d   : > { %vm3881_vm0 = vcmp.ge.f32.partialorder %v8147_v2, 0.0  ;;  %v3894_v8 = vmul.f32 0.01, %v8106_v21  ;;  %v3895_v27 = vmul.f32 0.01, %v8111_v46  ;;  %v3917_v52 = vsel %vm3853_vm1, %v8082_v19, %v3885_v34 }
 0x56e   : > { %v3896_v63 = vmul.f32 0.01, %v8113_v36  ;;  %vm3882_vm13 = vcmp.ge.f32.partialorder %v8166_v35, 0.0  ;;  %v3897_v37 = vmul.f32 0.01, %v8115_v42  ;;  %v3918_v51 = vsel %vm3854_vm2, %v8084_v1, %v3886_v31  ;;  %3949 = vst [vmem:[%s7982_s23 + $0x10] sm:$0xff] %v3917_v52 }
 0x56f   : > { %v3898_v5 = vmul.f32 0.01, %v8117_v58  ;;  %v3899_v26 = vmul.f32 0.01, %v8121_v41  ;;  %v3900_v18 = vmul.f32 0.01, %v8123_v48  ;;  %v3919_v57 = vsel %vm3855_vm3, %v8089_v56, %v3887_v39 }
 0x570   : > { %v3901_v29 = vmul.f32 0.01, %v8125_v32  ;;  %v3902_v19 = vmul.f32 0.01, %v8127_v54  ;;  %3950 = vst [vmem:[%s7982_s23 + $0x18] sm:$0xff] %v3918_v51  ;;  %v3920_v17 = vsel %vm3856_vm6, %v8091_v50, %v3888_v45  ;;  %3951 = vst [vmem:[%s7982_s23 + $0x20] sm:$0xff] %v3919_v57  ;;  %v3921_v14 = vsel %vm3857_vm7, %v8093_v40, %v3889_v61 }
 0x571   : > { %v3903_v16 = vmul.f32 0.01, %v8129_v60  ;;  %v3904_v6 = vmul.f32 0.01, %v8131_v62  ;;  %v3905_v1 = vmul.f32 0.01, %v8133_v0  ;;  %v3922_v11 = vsel %vm3858_vm8, %v8095_v4, %v3890_v24 }
 0x572   : > { %v3906_v44 = vmul.f32 0.01, %v8135_v53  ;;  %v3907_v22 = vmul.f32 0.01, %v8137_v20  ;;  %v3908_v56 = vmul.f32 0.01, %v8139_v9  ;;  %v3923_v12 = vsel %vm3859_vm9, %v8100_v38, %v3891_v43 }
 0x573   : > { %3952 = vst [vmem:[%s7982_s23 + $0x28] sm:$0xff] %v3920_v17  ;;  %v3909_v59 = vmul.f32 0.01, %v8141_v15  ;;  %v3910_v50 = vmul.f32 0.01, %v8143_v30  ;;  %3953 = vst [vmem:[%s7982_s23 + $0x30] sm:$0xff] %v3921_v14 }
 0x574   : > { %v3911_v3 = vmul.f32 0.01, %v8145_v47  ;;  %v3913_v55 = vmul.f32 0.01, %v8147_v2  ;;  %v3914_v40 = vmul.f32 0.01, %v8166_v35 }
 0x575   : > { %vm8950_vm1 = vcmp.ge.f32.partialorder %v8102_v49, 0.0  ;;  %3954 = vst [vmem:[%s7982_s23 + $0x38] sm:$0xff] %v3922_v11  ;;  %vm8951_vm2 = vcmp.ge.f32.partialorder %v8104_v33, 0.0  ;;  %vm8952_vm3 = vcmp.ge.f32.partialorder %v8106_v21, 0.0  ;;  %vm8953_vm6 = vcmp.ge.f32.partialorder %v8111_v46, 0.0  ;;  %3955 = vst [vmem:[%s7982_s23 + $0x40] sm:$0xff] %v3923_v12 }
 0x576   : > { %v3924_v25 = vsel %vm8950_vm1, %v8102_v49, %v3892_v23  ;;  %v3925_v4 = vsel %vm8951_vm2, %v8104_v33, %v3893_v10  ;;  %v3926_v28 = vsel %vm8952_vm3, %v8106_v21, %v3894_v8  ;;  %v3927_v38 = vsel %vm8953_vm6, %v8111_v46, %v3895_v27 }
 0x577   : > { %vm8954_vm7 = vcmp.ge.f32.partialorder %v8113_v36, 0.0  ;;  %3956 = vst [vmem:[%s7982_s23 + $0x48] sm:$0xff] %v3924_v25  ;;  %vm8955_vm8 = vcmp.ge.f32.partialorder %v8115_v42, 0.0  ;;  %v3930_v33 = vsel %vm3866_vm10, %v8117_v58, %v3898_v5  ;;  %v3931_v21 = vsel %vm3867_vm14, %v8121_v41, %v3899_v26  ;;  %3957 = vst [vmem:[%s7982_s23 + $0x50] sm:$0xff] %v3925_v4 }
 0x578   : > { %v3928_v34 = vsel %vm8954_vm7, %v8113_v36, %v3896_v63  ;;  %v3929_v49 = vsel %vm8955_vm8, %v8115_v42, %v3897_v37  ;;  %vm8956_vm9 = vcmp.ge.f32.partialorder %v8123_v48, 0.0  ;;  %3958 = vst [vmem:[%s7982_s23 + $0x58] sm:$0xff] %v3926_v28  ;;  %3959 = vst [vmem:[%s7982_s23 + $0x60] sm:$0xff] %v3927_v38  ;;  %vm8957_vm1 = vcmp.ge.f32.partialorder %v8125_v32, 0.0 }
 0x579   : > { %v3932_v46 = vsel %vm8956_vm9, %v8123_v48, %v3900_v18  ;;  %3960 = vst [vmem:[%s7982_s23 + $0x68] sm:$0xff] %v3928_v34  ;;  %v3933_v36 = vsel %vm8957_vm1, %v8125_v32, %v3901_v29  ;;  %vm8958_vm10 = vcmp.ge.f32.partialorder %v8127_v54, 0.0  ;;  %vm8959_vm14 = vcmp.ge.f32.partialorder %v8129_v60, 0.0  ;;  %3961 = vst [vmem:[%s7982_s23 + $0x70] sm:$0xff] %v3929_v49 }
 0x57a   : > { %v3934_v42 = vsel %vm8958_vm10, %v8127_v54, %v3902_v19  ;;  %v3935_v58 = vsel %vm8959_vm14, %v8129_v60, %v3903_v16  ;;  %v3936_v41 = vsel %vm3872_vm5, %v8131_v62, %v3904_v6  ;;  %3962 = vst [vmem:[%s7982_s23 + $0x78] sm:$0xff] %v3930_v33  ;;  %3963 = vst [vmem:[%s7982_s23 + $0x80] sm:$0xff] %v3931_v21  ;;  %vm8960_vm2 = vcmp.ge.f32.partialorder %v8135_v53, 0.0 }
 0x57b   : > { %3964 = vst [vmem:[%s7982_s23 + $0x88] sm:$0xff] %v3932_v46  ;;  %v3937_v48 = vsel %vm3873_vm15, %v8133_v0, %v3905_v1  ;;  %v3938_v32 = vsel %vm8960_vm2, %v8135_v53, %v3906_v44  ;;  %vm8961_vm3 = vcmp.ge.f32.partialorder %v8137_v20, 0.0  ;;  %vm8962_vm5 = vcmp.ge.f32.partialorder %v8139_v9, 0.0  ;;  %3965 = vst [vmem:[%s7982_s23 + $0x90] sm:$0xff] %v3933_v36 }
 0x57c   : > { %v3939_v54 = vsel %vm8961_vm3, %v8137_v20, %v3907_v22  ;;  %v3940_v60 = vsel %vm8962_vm5, %v8139_v9, %v3908_v56  ;;  %3966 = vst [vmem:[%s7982_s23 + $0x98] sm:$0xff] %v3934_v42  ;;  %3967 = vst [vmem:[%s7982_s23 + $0xa0] sm:$0xff] %v3935_v58  ;;  %v3941_v62 = vsel %vm3877_vm12, %v8141_v15, %v3909_v59 }
 0x57d   : > { %3968 = vst [vmem:[%s7982_s23 + $0xa8] sm:$0xff] %v3936_v41  ;;  %v3942_v0 = vsel %vm3878_vm11, %v8143_v30, %v3910_v50  ;;  %v3943_v53 = vsel %vm3879_vm4, %v8145_v47, %v3911_v3  ;;  %v3945_v20 = vsel %vm3881_vm0, %v8147_v2, %v3913_v55  ;;  %3969 = vst [vmem:[%s7982_s23 + $0xb0] sm:$0xff] %v3937_v48 }
 0x57e   : > { %3970 = vst [vmem:[%s7982_s23 + $0xb8] sm:$0xff] %v3938_v32  ;;  %3971 = vst [vmem:[%s7982_s23 + $0xc0] sm:$0xff] %v3939_v54  ;;  %v3946_v9 = vsel %vm3882_vm13, %v8166_v35, %v3914_v40 }
 0x57f   : > { %3972 = vst [vmem:[%s7982_s23 + $0xc8] sm:$0xff] %v3940_v60  ;;  %3973 = vst [vmem:[%s7982_s23 + $0xd0] sm:$0xff] %v3941_v62 }
 0x580   : > { %3974 = vst [vmem:[%s7982_s23 + $0xd8] sm:$0xff] %v3942_v0  ;;  %3975 = vst [vmem:[%s7982_s23 + $0xe0] sm:$0xff] %v3943_v53 }
 0x581   : > { %3977 = vst [vmem:[%s7982_s23 + $0xf0] sm:$0xff] %v3945_v20  ;;  %3978 = vst [vmem:[%s7982_s23 + $0xf8] sm:$0xff] %v3946_v9 }
 0x582   : > { %4587 = shalt.err (!%p4584_p5)
}
 0x583   : > { %s4588_s28 = scalar_lea.hbm %s8319_s21, 4096  ;;  %s4592_s18 = scalar_lea.hbm %s8397_s9, 8192 }
 0x584   : > { %p4589_p6 = scmp.ne.s32.totalorder %s8319_s21, %s4588_s28  ;;  %p4593_p9 = scmp.lt.s32.totalorder %s8319_s21, %s8397_s9 }
 0x585   : > { %p4594_p2 = scmp.lt.s32.totalorder %s4592_s18, %s4588_s28 }
 0x586   : > { %p4590_p4 = pnand %p4589_p6, %p8963_p12 }
 0x587   : > { %p4595_p3 = por %p4594_p2, %p4593_p9 }
 0x588   : > { %p4591_p8 = pneg %p4590_p4 }
 0x58a   : > { %p4596_p10 = pnand %p4595_p3, %p4591_p8 }
 0x58c   : > { %4599 = shalt.err (!%p4596_p10)
}
 0x58d   : > { %s4659_s13 = smov 128   ;;  %s4660_s3 = smov 8  }
 0x58e   : > { %4328 = dma.vmem_to_hbm [thread:$0]  (%p8963_p12), %s8321_s25, 4096, %s8319_s21, %s3980_s27, %s4659_s13, %s4659_s13, %s4660_s3  }
 0x58f PF: > { %s4008_s15 = sand.u32 1, %s4634_s30   ;;  %p8964_p7 = scmp.ne.s32.totalorder %s8593_s16, 0 }
 0x590   : > { %p8965_p1 = scmp.ge.s32.totalorder %s4646_s12, 2  ;;  %s4009_s17 = scalar_lea.sflag [#allocation5], %s4008_s15 }
 0x592   : > { %p4348_p13 = pnand %p8965_p1, %p8964_p7 }
 0x594   : > { %p4349_p0 = pneg %p4348_p13 }
 0x596   : > { %4629 = dma.done.wait (%p4349_p0), %s4009_s17, 4096  }
 0x597   : > { %4631 = vsyncadd (%p4349_p0), %s4009_s17, 4294963200  ;;  %p24_p11 = scmp.ge.s32.totalorder %s4805_s24, 4   ;;  %s8966_s30 = smov %s4638_s10 }
 0x598   : > { %s8967_s10 = smov %s4642_s11  ;;  %s8968_s11 = smov %s4821_s22 }
 0x599   : > { %s8969_s12 = smov %s4805_s24  ;;  %26 = sbr.rel (!%p24_p11) target bundleno = 11 (0xb), region = 119 }
 0x59e   :  { %4014 = vsyncpa [#allocation4], 1 }
 0x59f   :  { %4016 = vsyncpa [#allocation4 + $0x1], 1 }
 0x5a0   :  { %4017 = vsyncpa [#allocation7], 1 }
 0x5a1   :  { %4018 = vsyncpa [#allocation10], 1 }
 0x5a2   :  { %4019 = vsyncpa [#allocation5], 1 }
 0x5a3   :  { %4021 = vsyncpa [#allocation5 + $0x1], 1 }

</bundles_post_ra>
